<compile_context>
chip_gen: v6e
topology: v6e:2x2x1
jax: 0.10.0
libtpu: 0.0.40
codegen_flags: <defaults>
</compile_context>

<pallas_src>
import jax
import jax.numpy as jnp
from jax import lax
from jax.experimental import pallas as pl
from jax.experimental.pallas import tpu as pltpu

D_MODEL = 1024
D_HIDDEN = 4096


def _ffn_kernel(x_ref, w1_ref, w2_ref, o_ref, acc_ref=None):
    # Grid = (M tiles [parallel], H tiles [reduction]); H is the inner (last) axis.
    h = pl.program_id(1)
    acc = o_ref if acc_ref is None else acc_ref  # f32 accumulator

    @pl.when(h == 0)
    def _():
        acc[...] = jnp.zeros_like(acc)

    x = x_ref[...].astype(w1_ref.dtype)

    # hid = relu(x @ W1[h_tile, :].T)  -- contract feature dim (last dim of both).
    hid = lax.dot_general(
        x, w1_ref[...],
        dimension_numbers=(((1,), (1,)), ((), ())),
        preferred_element_type=jnp.float32)
    hid = jnp.maximum(hid, 0.0).astype(w2_ref.dtype)

    # partial = hid @ W2[:, h_tile].T  -- contract hidden-tile dim (last dim of both).
    acc[...] += lax.dot_general(
        hid, w2_ref[...],
        dimension_numbers=(((1,), (1,)), ((), ())),
        preferred_element_type=jnp.float32)

    if acc_ref is not None:
        @pl.when(h == pl.num_programs(1) - 1)
        def _():
            o_ref[...] = acc_ref[...].astype(o_ref.dtype)


def naive_ffn(x, w1, w2, *, th=1024):
    """Fused FFN forward.

    x  : [..., 1024]   activations (any float dtype).
    w1 : [4096, 1024]  first Linear weight, torch [out, in] layout (ideally bf16).
    w2 : [1024, 4096]  second Linear weight, torch [out, in] layout (ideally bf16).
    """
    assert w1.shape == (D_HIDDEN, D_MODEL) and w2.shape == (D_MODEL, D_HIDDEN)
    assert x.shape[-1] == D_MODEL
    assert D_HIDDEN % th == 0, "hidden tile must divide 4096 (no tail handling)"

    orig_shape = x.shape
    m = 1
    for s in orig_shape[:-1]:
        m *= s
    x2d = x.reshape(m, D_MODEL)

    # M tile: <= 256 rows keeps the (tm, th) f32 `hid` temporary small and total
    # VMEM well inside every chip's budget; Pallas masks a partial tail block.
    tm = m if m <= 256 else 256
    grid = (pl.cdiv(m, tm), D_HIDDEN // th)

    out_dtype = x.dtype
    # f32 output: accumulate straight into the (resident) output block, no scratch.
    use_scratch = out_dtype != jnp.float32
    scratch_shapes = [pltpu.VMEM((tm, D_MODEL), jnp.float32)] if use_scratch else []

    out = pl.pallas_call(
        _ffn_kernel,
        out_shape=jax.ShapeDtypeStruct((m, D_MODEL), out_dtype),
        grid_spec=pltpu.PrefetchScalarGridSpec(
            num_scalar_prefetch=0,
            grid=grid,
            in_specs=[
                pl.BlockSpec((tm, D_MODEL), lambda i, h: (i, 0)),  # x rows (resident over h)
                pl.BlockSpec((th, D_MODEL), lambda i, h: (h, 0)),  # W1 hidden tile (torch layout)
                pl.BlockSpec((D_MODEL, th), lambda i, h: (0, h)),  # W2 hidden tile (torch layout)
            ],
            out_specs=pl.BlockSpec((tm, D_MODEL), lambda i, h: (i, 0)),
            scratch_shapes=scratch_shapes,
        ),
        compiler_params=pltpu.CompilerParams(
            # M axis parallel (2 TCs on v7x); hidden axis is the reduction.
            dimension_semantics=("parallel", "arbitrary"),
            vmem_limit_bytes=32 * 1024 * 1024,
        ),
    )(x2d, w1, w2)

    return out.reshape(orig_shape)


if __name__ == "__main__":
    key = jax.random.PRNGKey(0)
    kx, k1, k2 = jax.random.split(key, 3)

    batch, seq = 2, 8
    x = jax.random.normal(kx, (batch, seq, D_MODEL), dtype=jnp.float32)

    # torch.nn.Linear default init, weight shape [out, in].
    bound1 = 1.0 / jnp.sqrt(D_MODEL)
    bound2 = 1.0 / jnp.sqrt(D_HIDDEN)
    w1_f32 = jax.random.uniform(k1, (D_HIDDEN, D_MODEL), jnp.float32, -bound1, bound1)
    w2_f32 = jax.random.uniform(k2, (D_MODEL, D_HIDDEN), jnp.float32, -bound2, bound2)

    # Pre-cast the weights ONCE (parameter-init time); the hot path streams bf16.
    w1 = w1_f32.astype(jnp.bfloat16)
    w2 = w2_f32.astype(jnp.bfloat16)

    out = jax.block_until_ready(naive_ffn(x, w1, w2))
    assert out.shape == (batch, seq, D_MODEL)
    assert out.dtype == x.dtype

    # Reference 1: identical bf16-weight math in plain JAX (tight tolerance).
    xb = x.reshape(-1, D_MODEL).astype(jnp.bfloat16)
    hid_ref = jnp.maximum(
        lax.dot_general(xb, w1, (((1,), (1,)), ((), ())),
                        preferred_element_type=jnp.float32), 0.0).astype(jnp.bfloat16)
    ref_bf16 = lax.dot_general(hid_ref, w2, (((1,), (1,)), ((), ())),
                               preferred_element_type=jnp.float32).reshape(x.shape)
    assert jnp.allclose(out, ref_bf16, atol=1e-2, rtol=1e-2), "mismatch vs bf16 reference"

    # Reference 2: full-precision module math (loose tolerance due to bf16 weights).
    ref_f32 = jnp.maximum(x @ w1_f32.T, 0.0) @ w2_f32.T
    assert jnp.allclose(out, ref_f32, atol=5e-2, rtol=5e-2), "mismatch vs f32 reference"

    print("KERNEL_OK")
</pallas_src>

<mosaic_0001>
module attributes {stable_mosaic.version = 11 : i64} {
  func.func @_ffn_kernel(%arg0: i32, %arg1: i32, %arg2: memref<16x1024xf32, #tpu.memory_space<vmem>>, %arg3: memref<1024x1024xbf16, #tpu.memory_space<vmem>>, %arg4: memref<1024x1024xbf16, #tpu.memory_space<vmem>>, %arg5: memref<16x1024xf32, #tpu.memory_space<vmem>>) attributes {dimension_semantics = [#tpu.dimension_semantics<parallel>, #tpu.dimension_semantics<arbitrary>], iteration_bounds = array<i64: 1, 4>, scalar_prefetch = 0 : i64, scratch_operands = 0 : i64, tpu.core_type = #tpu.core_type<tc>, window_params = [{transform_indices = @transform_0, window_bounds = array<i64: 16, 1024>}, {transform_indices = @transform_1, window_bounds = array<i64: 1024, 1024>}, {transform_indices = @transform_2, window_bounds = array<i64: 1024, 1024>}, {transform_indices = @transform_3, window_bounds = array<i64: 16, 1024>}]} {
    %c0_i32 = arith.constant 0 : i32
    %0 = arith.cmpi eq, %arg1, %c0_i32 : i32
    %1 = arith.extui %0 : i1 to i32
    %c0_i32_0 = arith.constant 0 : i32
    %2 = arith.cmpi ne, %1, %c0_i32_0 : i32
    scf.if %2 {
      %cst_12 = arith.constant 0.000000e+00 : f32
      %15 = vector.broadcast %cst_12 : f32 to vector<16x1024xf32>
      %c0_13 = arith.constant 0 : index
      %c0_14 = arith.constant 0 : index
      %16 = vector.load %arg5[%c0_13, %c0_14] : memref<16x1024xf32, #tpu.memory_space<vmem>>, vector<16x1024xf32>
      tpu.vector_store %arg5[%c0_13, %c0_14], %15 {strides = array<i32>} : memref<16x1024xf32, #tpu.memory_space<vmem>>, vector<16x1024xf32>,
    } else {
    }
    %c0 = arith.constant 0 : index
    %c0_1 = arith.constant 0 : index
    %3 = vector.load %arg2[%c0, %c0_1] : memref<16x1024xf32, #tpu.memory_space<vmem>>, vector<16x1024xf32>
    %4 = arith.truncf %3 : vector<16x1024xf32> to vector<16x1024xbf16>
    %c0_2 = arith.constant 0 : index
    %c0_3 = arith.constant 0 : index
    %5 = vector.load %arg3[%c0_2, %c0_3] : memref<1024x1024xbf16, #tpu.memory_space<vmem>>, vector<1024x1024xbf16>
    %cst = arith.constant dense<0.000000e+00> : vector<16x1024xf32>
    %6 = tpu.matmul %4, %5, %cst {dimension_numbers = #tpu.dot_dimension_numbers<[1], [1], [0], [0], [0, 0, 1, 0], [], []>} : vector<16x1024xbf16>, vector<1024x1024xbf16>, vector<16x1024xf32> -> vector<16x1024xf32>
    %cst_4 = arith.constant 0.000000e+00 : f32
    %7 = vector.broadcast %cst_4 : f32 to vector<16x1024xf32>
    %8 = arith.maximumf %6, %7 : vector<16x1024xf32>
    %9 = arith.truncf %8 : vector<16x1024xf32> to vector<16x1024xbf16>
    %c0_5 = arith.constant 0 : index
    %c0_6 = arith.constant 0 : index
    %10 = vector.load %arg5[%c0_5, %c0_6] : memref<16x1024xf32, #tpu.memory_space<vmem>>, vector<16x1024xf32>
    %c0_7 = arith.constant 0 : index
    %c0_8 = arith.constant 0 : index
    %11 = vector.load %arg4[%c0_7, %c0_8] : memref<1024x1024xbf16, #tpu.memory_space<vmem>>, vector<1024x1024xbf16>
    %cst_9 = arith.constant dense<0.000000e+00> : vector<16x1024xf32>
    %12 = tpu.matmul %9, %11, %cst_9 {dimension_numbers = #tpu.dot_dimension_numbers<[1], [1], [0], [0], [0, 0, 1, 0], [], []>} : vector<16x1024xbf16>, vector<1024x1024xbf16>, vector<16x1024xf32> -> vector<16x1024xf32>
    %13 = arith.addf %10, %12 : vector<16x1024xf32>
    %c0_10 = arith.constant 0 : index
    %c0_11 = arith.constant 0 : index
    %14 = vector.load %arg5[%c0_10, %c0_11] : memref<16x1024xf32, #tpu.memory_space<vmem>>, vector<16x1024xf32>
    tpu.vector_store %arg5[%c0_10, %c0_11], %13 {strides = array<i32>} : memref<16x1024xf32, #tpu.memory_space<vmem>>, vector<16x1024xf32>,
    return
  }
  func.func @transform_0(%arg0: i32, %arg1: i32) -> (i32, i32) {
    %c0_i32 = arith.constant 0 : i32
    %c0_i32_0 = arith.constant 0 : i32
    return %arg0, %c0_i32 : i32, i32
  }
  func.func @transform_1(%arg0: i32, %arg1: i32) -> (i32, i32) {
    %c0_i32 = arith.constant 0 : i32
    %c0_i32_0 = arith.constant 0 : i32
    return %arg1, %c0_i32 : i32, i32
  }
  func.func @transform_2(%arg0: i32, %arg1: i32) -> (i32, i32) {
    %c0_i32 = arith.constant 0 : i32
    %c0_i32_0 = arith.constant 0 : i32
    return %c0_i32, %arg1 : i32, i32
  }
  func.func @transform_3(%arg0: i32, %arg1: i32) -> (i32, i32) {
    %c0_i32 = arith.constant 0 : i32
    %c0_i32_0 = arith.constant 0 : i32
    return %arg0, %c0_i32 : i32, i32
  }
}

</mosaic_0001>

<bundles_post_ra>
// kernel: tpu_custom_call.1
= control target key start
LH: loop header
LB: loop body
LE: loop exit
PB: predicated region body
PF: predicated region fallthrough
CT: control target
= control target key end

     0   :  { %8 = vsyncpa [#allocation3], 0  ;;  %s10734_s0 = inlined_call_operand.hbm [shape: f32[16,1024], index: 0, kind: input, shape index: {}]   ;;  %s10735_s1 = inlined_call_operand.hbm [shape: bf16[4096,1024], index: 1, kind: input, shape index: {}]   ;;  %s10736_s2 = inlined_call_operand.hbm [shape: bf16[1024,4096], index: 2, kind: input, shape index: {}]   ;;  %s10737_s3 = inlined_call_operand.hbm [shape: f32[16,1024], index: 3, kind: output, shape index: {}]  }
   0x1   :  { %9 = vsyncpa [#allocation6], 0 }
   0x2   :  { %11 = vsyncpa [#allocation6 + $0x1], 0 }
   0x3   :  { %12 = vsyncpa [#allocation4], 0  ;;  %s9335_s12 = smov 0   ;;  %s9337_s13 = smov 0  }
   0x4   :  { %s9339_s14 = smov 0   ;;  %s9341_s15 = smov 0  }
   0x5   :  { %s9343_s16 = smov 0   ;;  %s9345_s17 = smov 0  }
   0x6 LB: > { %s27_s18 = sadd.s32 1, %s9297_s16  ;;  %s63_s19 = sadd.s32 1, %s9289_s14  ;;  %s9301_s17 = sphi %s9345_s17, %s18_s17   ;;  %s9297_s16 = sphi %s9343_s16, %s10746_s16   ;;  %s9293_s15 = sphi %s9341_s15, %s10745_s15   ;;  %s9289_s14 = sphi %s9339_s14, %s10744_s14   ;;  %s9285_s13 = sphi %s9337_s13, %s10743_s13   ;;  %s9281_s12 = sphi %s9335_s12, %s10742_s12  }
   0x7   : > { %p28_p0 = scmp.ge.s32.totalorder %s27_s18, 4  ;;  %p70_p1 = scmp.ne.s32.totalorder %s9289_s14, %s9285_s13 }
   0x8   : > { %p71_p2 = scmp.eq.s32.totalorder %s9301_s17, 0  ;;  %p9075_p4 = scmp.lt.s32.totalorder %s9301_s17, 4 }
   0x9   : > { %s10748_s18 = smov (%p28_p0, %s27_s18), 0  ;;  %s169_s21 = sand.u32 1, %s9301_s17  }
   0xa   : > { %p72_p3 = por %p71_p2, %p70_p1  ;;  %s60_s20 = ssub.s32 %s9297_s16, %s10748_s18 }
   0xb   : > { %p61_p5 = scmp.eq.s32.totalorder %s60_s20, 0  ;;  %s171_s22 = sand.u32 1, %s9289_s14  }
   0xc   : > { %s9049_s23 = sshll.u32 %s9297_s16, 16  ;;  %s8008_s25 = sshll.u32 %s171_s22, 12 }
   0xd   : > { %s9379_s24 = scalar_select %p61_p5, %s9289_s14, %s63_s19  }
   0xe   : > { %s180_s28 = scalar_lea.hbm %s10735_s1, %s9049_s23  ;;  %p9384_p6 = pnand %p9075_p4, %p72_p3 }
   0xf   : > { %s173_s30 = scalar_lea.vmem [#allocation5], %s8008_s25  ;;  %s9388_s5 = scalar_lea.sflag [#allocation6], %s169_s21 }
  0x10   : > { %s181_s4 = sshll.u32 %s173_s30, 4  ;;  %p9139_p7 = pneg %p9384_p6  ;;  %s182_s4 = int_to_ptr.vmem [resolvable:$true] %s181_s4 }
  0x11   : > { %s9150_s6 = scalar_lea.vmem %s182_s4, 65536  ;;  %s9303_s7 = smov [#allocation5]  }
  0x12   : > { %p9151_p8 = scmp.ne.s32.totalorder %s182_s4, %s9150_s6  ;;  %s9155_s8 = sshll.u32 %s9303_s7, 4  ;;  %s9156_s8 = int_to_ptr.vmem [resolvable:$false] %s9155_s8 }
  0x13   : > { %s9157_s9 = scalar_lea.vmem %s9156_s8, 131072  ;;  %p9158_p11 = scmp.lt.s32.totalorder %s182_s4, %s9156_s8 }
  0x14   : > { %p9153_p9 = pnand %p9151_p8, %p9139_p7  ;;  %p9159_p12 = scmp.lt.s32.totalorder %s9157_s9, %s9150_s6 }
  0x16   : > { %p9154_p10 = pneg %p9153_p9  ;;  %p9160_p13 = por %p9159_p12, %p9158_p11 }
  0x18   : > { %p9161_p0 = pnand %p9160_p13, %p9154_p10 }
  0x1a   : > { %9164 = shalt.err (!%p9161_p0)
}
  0x1b   : > { %s9304_s10 = smov 512   ;;  %s9305_s11 = smov 32  }
  0x1c   : > { %9070 = dma.hbm_to_vmem [thread:$0]  (!%p9384_p6), %s180_s28, 65536, %s182_s4, %s9388_s5, %s9304_s10, %s9304_s10, %s9305_s11  }
  0x1d   : > { %s195_s19 = scalar_lea.vmem [#allocation7], %s8008_s25  ;;  %s9404_s21 = sadd.s32 4294967295, %s9301_s17  }
  0x1e   : > { %s202_s20 = sshll.u32 %s195_s19, 4  ;;  %p76_p1 = scmp.ne.s32.totalorder %s9285_s13, %s9281_s12  ;;  %s9401_s20 = int_to_ptr.vmem [resolvable:$true] %s202_s20 }
  0x1f   : > { %p77_p2 = scmp.eq.s32.totalorder %s9404_s21, 0  ;;  %p8005_p3 = scmp.ge.s32.totalorder %s9301_s17, 1 }
  0x20   : > { %p139_p4 = scmp.lt.s32.totalorder %s9301_s17, 5  ;;  %s9306_s25 = smov [#allocation2]  }
  0x21   : > { %p9413_p5 = por %p77_p2, %p76_p1  ;;  %s155_s26 = sshll.u32 %s9306_s25, 4  ;;  %s9421_s26 = int_to_ptr.vmem [resolvable:$true] %s155_s26 }
  0x22   : > { %p9417_p8 = pnand %p8005_p3, %p139_p4  ;;  %s9050_s12 = sshll.u32 %s9297_s16, 9 }
  0x23   : > { %s201_s4 = scalar_lea.hbm %s10736_s2, %s9050_s12  ;;  %s9178_s6 = scalar_lea.vmem %s9401_s20, 65536 }
  0x24   : > { %p9063_p9 = pneg %p9417_p8  ;;  %p9179_p11 = scmp.ne.s32.totalorder %s9401_s20, %s9178_s6 }
  0x25   : > { %s9307_s7 = smov [#allocation7]  }
  0x26   : > { %p9428_p10 = pnand %p9063_p9, %p77_p2  ;;  %p9181_p12 = pnand %p9179_p11, %p9139_p7 }
  0x27   : > { %s9183_s8 = sshll.u32 %s9307_s7, 4  ;;  %s9184_s8 = int_to_ptr.vmem [resolvable:$false] %s9183_s8 }
  0x28   : > { %p9182_p13 = pneg %p9181_p12  ;;  %s9185_s9 = scalar_lea.vmem %s9184_s8, 131072 }
  0x29   : > { %p9186_p0 = scmp.lt.s32.totalorder %s9401_s20, %s9184_s8  ;;  %p9187_p1 = scmp.lt.s32.totalorder %s9185_s9, %s9178_s6 }
  0x2b   : > { %p9188_p3 = por %p9187_p1, %p9186_p0 }
  0x2d   : > { %p9189_p4 = pnand %p9188_p3, %p9182_p13 }
  0x2f   : > { %9192 = shalt.err (!%p9189_p4)
}
  0x30   : > { %s9308_s19 = smov 2048   ;;  %p9195_p7 = pneg %p9428_p10 }
  0x31   : > { %9073 = dma.hbm_to_vmem [thread:$0]  (!%p9384_p6), %s201_s4, 65536, %s9401_s20, %s9388_s5, %s9308_s19, %s9304_s10, %s9305_s11  }
  0x32   : > { %s9204_s25 = scalar_lea.vmem %s9421_s26, 2048  ;;  %p9212_p13 = scmp.lt.s32.totalorder %s9421_s26, %s9421_s26 }
  0x33   : > { %p9205_p9 = scmp.ne.s32.totalorder %s9421_s26, %s9204_s25  ;;  %p9213_p0 = scmp.lt.s32.totalorder %s9204_s25, %s9204_s25 }
  0x35   : > { %p9207_p11 = pnand %p9205_p9, %p9195_p7  ;;  %p9214_p1 = por %p9213_p0, %p9212_p13 }
  0x37   : > { %p9208_p12 = pneg %p9207_p11 }
  0x39   : > { %p9215_p3 = pnand %p9214_p1, %p9208_p12 }
  0x3b   : > { %9218 = shalt.err (!%p9215_p3)
}
  0x3c   : > { %s9309_s29 = smov 1024   ;;  %s9310_s12 = smov 64  }
  0x3d   : > { %9066 = dma.hbm_to_vmem [thread:$0]  (!%p9428_p10), %s10734_s0, 2048, %s9421_s26, [#allocation3], %s9309_s29, %s9309_s29, %s9310_s12  }
  0x3e   : > { %214 = sbr.rel (%p9417_p8) target bundleno = 2351 (0x92f), region = 32 }
  0x43   : > { %9268 = dma.done.wait (%p77_p2), [#allocation3], 2048  }
  0x44   : > { %9270 = vsyncadd (%p77_p2), [#allocation3], 4294965248  ;;  %s220_s5 = sand.u32 1, %s9404_s21   ;;  %s222_s10 = sand.u32 1, %s9285_s13  }
  0x45   : > { %s8017_s11 = sshll.u32 %s222_s10, 12  ;;  %s221_s20 = scalar_lea.sflag [#allocation6], %s220_s5 }
  0x46   : > { %s9467_s27 = scalar_lea.vmem [#allocation5], %s8017_s11 }
  0x47   : > { %9272 = dma.done.wait (%p9413_p5), %s221_s20, 131072  }
  0x48   : > { %9274 = vsyncadd (%p9413_p5), %s221_s20, 4294836224  ;;  %s9473_s23 = scalar_lea.vmem [#allocation7], %s8017_s11  ;;  %p8019_p6 = scmp.ne.s32.totalorder %s9293_s15, 0 }
  0x4a   : > { %263 = sbr.rel (%p8019_p6) target bundleno = 88 (0x58), region = 48 }
  0x4f   : > { %v9311_v0 = vmov 0.0  }
  0x50   : > { %264 = vst [vmem:[#allocation8] sm:$0xff] %v9311_v0  ;;  %265 = vst [vmem:[#allocation8 + $0x8] sm:$0xff] %v9311_v0 }
  0x51   : > { %266 = vst [vmem:[#allocation8 + $0x10] sm:$0xff] %v9311_v0  ;;  %267 = vst [vmem:[#allocation8 + $0x18] sm:$0xff] %v9311_v0 }
  0x52   : > { %268 = vst [vmem:[#allocation8 + $0x20] sm:$0xff] %v9311_v0  ;;  %269 = vst [vmem:[#allocation8 + $0x28] sm:$0xff] %v9311_v0 }
  0x53   : > { %270 = vst [vmem:[#allocation8 + $0x30] sm:$0xff] %v9311_v0  ;;  %271 = vst [vmem:[#allocation8 + $0x38] sm:$0xff] %v9311_v0 }
  0x54   : > { %272 = vst [vmem:[#allocation8 + $0x40] sm:$0xff] %v9311_v0  ;;  %273 = vst [vmem:[#allocation8 + $0x48] sm:$0xff] %v9311_v0 }
  0x55   : > { %274 = vst [vmem:[#allocation8 + $0x50] sm:$0xff] %v9311_v0  ;;  %275 = vst [vmem:[#allocation8 + $0x58] sm:$0xff] %v9311_v0 }
  0x56   : > { %276 = vst [vmem:[#allocation8 + $0x60] sm:$0xff] %v9311_v0  ;;  %277 = vst [vmem:[#allocation8 + $0x68] sm:$0xff] %v9311_v0 }
  0x57   : > { %278 = vst [vmem:[#allocation8 + $0x70] sm:$0xff] %v9311_v0  ;;  %279 = vst [vmem:[#allocation8 + $0x78] sm:$0xff] %v9311_v0 }
  0x58 PF: > { %v360_v1 = vld [vmem:[%s9467_s27 + $0x1c0] sm:$0xff]  ;;  %v361_v3 = vld [vmem:[%s9467_s27 + $0x1c8] sm:$0xff]  ;;  %v283_v36 = vld [vmem:[#allocation2 + $0x18] sm:$0xff]  ;;  %s9312_s15 = smov [#allocation8]   ;;  %p9077_p2 = scmp.eq.s32.totalorder %s9404_s21, 3 }
  0x59   : > { %v364_v2 = vld [vmem:[%s9467_s27 + $0x1e0] sm:$0xff]  ;;  %v365_v5 = vld [vmem:[%s9467_s27 + $0x1e8] sm:$0xff]  ;;  %v291_v37 = vld [vmem:[#allocation2 + $0x58] sm:$0xff]  ;;  %s7906_s22 = sshll.u32 %s9312_s15, 4  ;;  %s7907_s22 = int_to_ptr.vmem [resolvable:$true] %s7906_s22 }
  0x5a   : > { %v8077_v4 = vcombine.high %v360_v1, %v364_v2  ;;  %v8076_v6 = vcombine.low %v360_v1, %v364_v2  ;;  %v352_v7 = vld [vmem:[%s9467_s27 + $0x180] sm:$0xff]  ;;  %v8079_v9 = vcombine.high %v361_v3, %v365_v5  ;;  %v8078_v10 = vcombine.low %v361_v3, %v365_v5  ;;  %v353_v12 = vld [vmem:[%s9467_s27 + $0x188] sm:$0xff]  ;;  %s9219_s26 = scalar_lea.vmem %s7907_s22, 2048  ;;  %p9226_p4 = scmp.lt.s32.totalorder %s7907_s22, %s7907_s22 }
  0x5b   : > { %v356_v8 = vld [vmem:[%s9467_s27 + $0x1a0] sm:$0xff]  ;;  %v357_v13 = vld [vmem:[%s9467_s27 + $0x1a8] sm:$0xff]  ;;  %v9498_v40 = vpack.c.bf16 %v291_v37, %v283_v36  ;;  %p9220_p5 = scmp.ne.s32.totalorder %s7907_s22, %s9219_s26  ;;  %p9227_p7 = scmp.lt.s32.totalorder %s9219_s26, %s9219_s26 }
  0x5c   : > { %v8069_v11 = vcombine.high %v352_v7, %v356_v8  ;;  %3376 = vmatprep.subr.bf16.mxu0 %v8077_v4  ;;  %v8071_v14 = vcombine.high %v353_v12, %v357_v13  ;;  %3419 = vmatprep.subr.bf16.mxu1 %v8079_v9  ;;  %v344_v15 = vld [vmem:[%s9467_s27 + $0x140] sm:$0xff]  ;;  %v345_v17 = vld [vmem:[%s9467_s27 + $0x148] sm:$0xff]  ;;  %v8068_v19 = vcombine.low %v352_v7, %v356_v8 }
  0x5d   : > { %3377 = vmatpush1.bf16.xpose.msra.mxu0 %v8076_v6  ;;  %3420 = vmatpush1.bf16.xpose.msra.mxu1 %v8078_v10  ;;  %v348_v16 = vld [vmem:[%s9467_s27 + $0x160] sm:$0xff]  ;;  %v349_v18 = vld [vmem:[%s9467_s27 + $0x168] sm:$0xff]  ;;  %v8070_v20 = vcombine.low %v353_v12, %v357_v13  ;;  %p9221_p8 = pnand %p9220_p5, %p9077_p2  ;;  %p9228_p9 = por %p9227_p7, %p9226_p4 }
  0x5e   : > { %3378 = vmatprep.subr.bf16.mxu0 %v8069_v11  ;;  %3421 = vmatprep.subr.bf16.mxu1 %v8071_v14  ;;  %v8061_v21 = vcombine.high %v344_v15, %v348_v16  ;;  %v8063_v22 = vcombine.high %v345_v17, %v349_v18  ;;  %v336_v23 = vld [vmem:[%s9467_s27 + $0x100] sm:$0xff]  ;;  %v337_v25 = vld [vmem:[%s9467_s27 + $0x108] sm:$0xff]  ;;  %v8060_v27 = vcombine.low %v344_v15, %v348_v16 }
  0x5f   : > { %v340_v24 = vld [vmem:[%s9467_s27 + $0x120] sm:$0xff]  ;;  %v341_v26 = vld [vmem:[%s9467_s27 + $0x128] sm:$0xff]  ;;  %v8062_v28 = vcombine.low %v345_v17, %v349_v18  ;;  %3451 = vmatprep.mubr.bf16.mxu1 %v9498_v40  ;;  %p9222_p10 = pneg %p9221_p8 }
  0x60   : > { %v8053_v29 = vcombine.high %v336_v23, %v340_v24  ;;  %v8055_v30 = vcombine.high %v337_v25, %v341_v26  ;;  %v328_v31 = vld [vmem:[%s9467_s27 + $0xc0] sm:$0xff]  ;;  %v281_v32 = vld [vmem:[#allocation2 + $0x8] sm:$0xff]  ;;  %v8052_v41 = vcombine.low %v336_v23, %v340_v24  ;;  %v8054_v42 = vcombine.low %v337_v25, %v341_v26 }
  0x61   : > { %v289_v33 = vld [vmem:[#allocation2 + $0x48] sm:$0xff]  ;;  %v332_v34 = vld [vmem:[%s9467_s27 + $0xe0] sm:$0xff]  ;;  %p9229_p11 = pnand %p9228_p9, %p9222_p10 }
  0x62   : > { %v9494_v35 = vpack.c.bf16 %v289_v33, %v281_v32  ;;  %v329_v38 = vld [vmem:[%s9467_s27 + $0xc8] sm:$0xff]  ;;  %v8045_v43 = vcombine.high %v328_v31, %v332_v34  ;;  %v320_v45 = vld [vmem:[%s9467_s27 + $0x80] sm:$0xff]  ;;  %v8044_v49 = vcombine.low %v328_v31, %v332_v34 }
  0x63   : > { %v333_v39 = vld [vmem:[%s9467_s27 + $0xe8] sm:$0xff]  ;;  %v324_v46 = vld [vmem:[%s9467_s27 + $0xa0] sm:$0xff] }
  0x64   : > { %3408 = vmatprep.mubr.bf16.mxu0 %v9494_v35  ;;  %v8047_v44 = vcombine.high %v329_v38, %v333_v39  ;;  %v321_v47 = vld [vmem:[%s9467_s27 + $0x88] sm:$0xff]  ;;  %v8046_v50 = vcombine.low %v329_v38, %v333_v39  ;;  %v8037_v51 = vcombine.high %v320_v45, %v324_v46  ;;  %v312_v53 = vld [vmem:[%s9467_s27 + $0x40] sm:$0xff]  ;;  %v8036_v57 = vcombine.low %v320_v45, %v324_v46 }
  0x65   : > { %3379 = vmatpush1.bf16.xpose.msra.mxu0 %v8068_v19  ;;  %3422 = vmatpush1.bf16.xpose.msra.mxu1 %v8070_v20  ;;  %v325_v48 = vld [vmem:[%s9467_s27 + $0xa8] sm:$0xff]  ;;  %v316_v54 = vld [vmem:[%s9467_s27 + $0x60] sm:$0xff] }
  0x66   : > { %3380 = vmatprep.subr.bf16.mxu0 %v8061_v21  ;;  %3423 = vmatprep.subr.bf16.mxu1 %v8063_v22  ;;  %v8039_v52 = vcombine.high %v321_v47, %v325_v48  ;;  %v313_v55 = vld [vmem:[%s9467_s27 + $0x48] sm:$0xff]  ;;  %v8038_v58 = vcombine.low %v321_v47, %v325_v48  ;;  %v8029_v59 = vcombine.high %v312_v53, %v316_v54  ;;  %v304_v61 = vld [vmem:[%s9467_s27] sm:$0xff] }
  0x67   : > { %v317_v56 = vld [vmem:[%s9467_s27 + $0x68] sm:$0xff]  ;;  %v308_v62 = vld [vmem:[%s9467_s27 + $0x20] sm:$0xff]  ;;  %v8028_v1 = vcombine.low %v312_v53, %v316_v54 }
  0x68   : > { %v8031_v60 = vcombine.high %v313_v55, %v317_v56  ;;  %v305_v63 = vld [vmem:[%s9467_s27 + $0x8] sm:$0xff]  ;;  %v8030_v2 = vcombine.low %v313_v55, %v317_v56  ;;  %v8021_v3 = vcombine.high %v304_v61, %v308_v62  ;;  %v424_v5 = vld [vmem:[%s9467_s27 + $0x3c0] sm:$0xff]  ;;  %v8020_v9 = vcombine.low %v304_v61, %v308_v62 }
  0x69   : > { %v309_v0 = vld [vmem:[%s9467_s27 + $0x28] sm:$0xff]  ;;  %v428_v6 = vld [vmem:[%s9467_s27 + $0x3e0] sm:$0xff] }
  0x6a   : > { %v8023_v4 = vcombine.high %v305_v63, %v309_v0  ;;  %v425_v7 = vld [vmem:[%s9467_s27 + $0x3c8] sm:$0xff]  ;;  %v8022_v10 = vcombine.low %v305_v63, %v309_v0  ;;  %v8141_v11 = vcombine.high %v424_v5, %v428_v6  ;;  %v416_v13 = vld [vmem:[%s9467_s27 + $0x380] sm:$0xff]  ;;  %v8140_v17 = vcombine.low %v424_v5, %v428_v6 }
  0x6b   : > { %v429_v8 = vld [vmem:[%s9467_s27 + $0x3e8] sm:$0xff]  ;;  %v420_v14 = vld [vmem:[%s9467_s27 + $0x3a0] sm:$0xff] }
  0x6c   : > { %v8143_v12 = vcombine.high %v425_v7, %v429_v8  ;;  %v417_v15 = vld [vmem:[%s9467_s27 + $0x388] sm:$0xff]  ;;  %v8142_v18 = vcombine.low %v425_v7, %v429_v8  ;;  %v8133_v19 = vcombine.high %v416_v13, %v420_v14  ;;  %v408_v21 = vld [vmem:[%s9467_s27 + $0x340] sm:$0xff]  ;;  %v8132_v25 = vcombine.low %v416_v13, %v420_v14  ;;  %v362_v7 = vld [vmem:[%s9467_s27 + $0x1d0] sm:$0xff] }
  0x6d   : > { %3381 = vmatpush1.bf16.xpose.msra.mxu0 %v8060_v27  ;;  %3424 = vmatpush1.bf16.xpose.msra.mxu1 %v8062_v28  ;;  %v421_v16 = vld [vmem:[%s9467_s27 + $0x3a8] sm:$0xff]  ;;  %v412_v22 = vld [vmem:[%s9467_s27 + $0x360] sm:$0xff]  ;;  %v366_v8 = vld [vmem:[%s9467_s27 + $0x1f0] sm:$0xff] }
  0x6e   : > { %3382 = vmatprep.subr.bf16.mxu0 %v8053_v29  ;;  %3425 = vmatprep.subr.bf16.mxu1 %v8055_v30  ;;  %v8135_v20 = vcombine.high %v417_v15, %v421_v16  ;;  %v409_v23 = vld [vmem:[%s9467_s27 + $0x348] sm:$0xff]  ;;  %v8134_v26 = vcombine.low %v417_v15, %v421_v16  ;;  %v8125_v27 = vcombine.high %v408_v21, %v412_v22  ;;  %v400_v29 = vld [vmem:[%s9467_s27 + $0x300] sm:$0xff] }
  0x6f   : > { %v413_v24 = vld [vmem:[%s9467_s27 + $0x368] sm:$0xff]  ;;  %v404_v30 = vld [vmem:[%s9467_s27 + $0x320] sm:$0xff]  ;;  %v8124_v33 = vcombine.low %v408_v21, %v412_v22  ;;  %v8081_v13 = vcombine.high %v362_v7, %v366_v8  ;;  %v355_v21 = vld [vmem:[%s9467_s27 + $0x198] sm:$0xff] }
  0x70   : > { %v8127_v28 = vcombine.high %v409_v23, %v413_v24  ;;  %v401_v31 = vld [vmem:[%s9467_s27 + $0x308] sm:$0xff]  ;;  %v8126_v34 = vcombine.low %v409_v23, %v413_v24  ;;  %v8117_v36 = vcombine.high %v400_v29, %v404_v30  ;;  %v392_v38 = vld [vmem:[%s9467_s27 + $0x2c0] sm:$0xff]  ;;  %v359_v23 = vld [vmem:[%s9467_s27 + $0x1b8] sm:$0xff] }
  0x71   : > { %v405_v32 = vld [vmem:[%s9467_s27 + $0x328] sm:$0xff]  ;;  %v396_v39 = vld [vmem:[%s9467_s27 + $0x2e0] sm:$0xff] }
  0x72   : > { %v8119_v37 = vcombine.high %v401_v31, %v405_v32  ;;  %v8109_v45 = vcombine.high %v392_v38, %v396_v39  ;;  %v384_v47 = vld [vmem:[%s9467_s27 + $0x280] sm:$0xff]  ;;  %v285_v24 = vld [vmem:[#allocation2 + $0x28] sm:$0xff] }
  0x73   : > { %v388_v48 = vld [vmem:[%s9467_s27 + $0x2a0] sm:$0xff] }
  0x74   : > { %v8101_v53 = vcombine.high %v384_v47, %v388_v48  ;;  %v376_v55 = vld [vmem:[%s9467_s27 + $0x240] sm:$0xff] }
  0x75   : > { %3383 = vmatpush1.bf16.xpose.msra.mxu0 %v8052_v41  ;;  %3426 = vmatpush1.bf16.xpose.msra.mxu1 %v8054_v42  ;;  %v393_v41 = vld [vmem:[%s9467_s27 + $0x2c8] sm:$0xff]  ;;  %v380_v56 = vld [vmem:[%s9467_s27 + $0x260] sm:$0xff] }
  0x76   : > { %3384 = vmatprep.subr.bf16.mxu0 %v8045_v43  ;;  %3427 = vmatprep.subr.bf16.mxu1 %v8047_v44  ;;  %v397_v42 = vld [vmem:[%s9467_s27 + $0x2e8] sm:$0xff]  ;;  %v8116_v43 = vcombine.low %v400_v29, %v404_v30  ;;  %v8118_v44 = vcombine.low %v401_v31, %v405_v32  ;;  %v8093_v61 = vcombine.high %v376_v55, %v380_v56  ;;  %v368_v63 = vld [vmem:[%s9467_s27 + $0x200] sm:$0xff]  ;;  %v295_v29 = vld [vmem:[#allocation2 + $0x78] sm:$0xff] }
  0x77   : > { %v8111_v46 = vcombine.high %v393_v41, %v397_v42  ;;  %v372_v0 = vld [vmem:[%s9467_s27 + $0x220] sm:$0xff]  ;;  %v8075_v32 = vcombine.high %v355_v21, %v359_v23 }
  0x78   : > { %v8085_v5 = vcombine.high %v368_v63, %v372_v0  ;;  %v280_v15 = vld [vmem:[#allocation2] sm:$0xff] }
  0x79   : > { %v288_v16 = vld [vmem:[#allocation2 + $0x40] sm:$0xff] }
  0x7a   : > { %v9553_v22 = vpack.c.bf16 %v288_v16, %v280_v15  ;;  %v307_v15 = vld [vmem:[%s9467_s27 + $0x18] sm:$0xff] }
  0x7b   : > { %v311_v16 = vld [vmem:[%s9467_s27 + $0x38] sm:$0xff] }
  0x7d   : > { %3385 = vmatpush1.bf16.xpose.msra.mxu0 %v8044_v49  ;;  %3428 = vmatpush1.bf16.xpose.msra.mxu1 %v8046_v50  ;;  %v385_v49 = vld [vmem:[%s9467_s27 + $0x288] sm:$0xff] }
  0x7e   : > { %3386 = vmatprep.subr.bf16.mxu0 %v8037_v51  ;;  %3429 = vmatprep.subr.bf16.mxu1 %v8039_v52  ;;  %v389_v50 = vld [vmem:[%s9467_s27 + $0x2a8] sm:$0xff]  ;;  %v8108_v51 = vcombine.low %v392_v38, %v396_v39  ;;  %v8110_v52 = vcombine.low %v393_v41, %v397_v42  ;;  %v347_v38 = vld [vmem:[%s9467_s27 + $0x158] sm:$0xff]  ;;  %v8074_v42 = vcombine.low %v355_v21, %v359_v23  ;;  %v426_v21 = vld [vmem:[%s9467_s27 + $0x3d0] sm:$0xff] }
  0x7f   : > { %v8103_v54 = vcombine.high %v385_v49, %v389_v50  ;;  %v351_v39 = vld [vmem:[%s9467_s27 + $0x178] sm:$0xff]  ;;  %v430_v23 = vld [vmem:[%s9467_s27 + $0x3f0] sm:$0xff] }
  0x85   : > { %3387 = vmatpush1.bf16.xpose.msra.mxu0 %v8036_v57  ;;  %3430 = vmatpush1.bf16.xpose.msra.mxu1 %v8038_v58  ;;  %v377_v57 = vld [vmem:[%s9467_s27 + $0x248] sm:$0xff] }
  0x86   : > { %3388 = vmatprep.subr.bf16.mxu0 %v8029_v59  ;;  %3431 = vmatprep.subr.bf16.mxu1 %v8031_v60  ;;  %v381_v58 = vld [vmem:[%s9467_s27 + $0x268] sm:$0xff]  ;;  %v8100_v59 = vcombine.low %v384_v47, %v388_v48  ;;  %v8102_v60 = vcombine.low %v385_v49, %v389_v50  ;;  %v339_v47 = vld [vmem:[%s9467_s27 + $0x118] sm:$0xff]  ;;  %v8066_v50 = vcombine.low %v347_v38, %v351_v39 }
  0x87   : > { %v8095_v62 = vcombine.high %v377_v57, %v381_v58  ;;  %v343_v48 = vld [vmem:[%s9467_s27 + $0x138] sm:$0xff] }
  0x8d   : > { %3389 = vmatpush1.bf16.xpose.msra.mxu0 %v8028_v1  ;;  %3432 = vmatpush1.bf16.xpose.msra.mxu1 %v8030_v2  ;;  %v369_v1 = vld [vmem:[%s9467_s27 + $0x208] sm:$0xff] }
  0x8e   : > { %3390 = vmatprep.subr.bf16.mxu0 %v8021_v3  ;;  %3433 = vmatprep.subr.bf16.mxu1 %v8023_v4  ;;  %v373_v2 = vld [vmem:[%s9467_s27 + $0x228] sm:$0xff]  ;;  %v8092_v3 = vcombine.low %v376_v55, %v380_v56  ;;  %v8094_v4 = vcombine.low %v377_v57, %v381_v58  ;;  %v331_v55 = vld [vmem:[%s9467_s27 + $0xd8] sm:$0xff]  ;;  %v8058_v58 = vcombine.low %v339_v47, %v343_v48 }
  0x8f   : > { %v8087_v6 = vcombine.high %v369_v1, %v373_v2  ;;  %v335_v56 = vld [vmem:[%s9467_s27 + $0xf8] sm:$0xff] }
  0x95   : > { %3391 = vmatpush1.bf16.xpose.msra.mxu0 %v8020_v9  ;;  %3434 = vmatpush1.bf16.xpose.msra.mxu1 %v8022_v10  ;;  %v363_v9 = vld [vmem:[%s9467_s27 + $0x1d8] sm:$0xff] }
  0x96   : > { %3392 = vmatprep.subr.bf16.mxu0 %v8141_v11  ;;  %3435 = vmatprep.subr.bf16.mxu1 %v8143_v12  ;;  %v367_v10 = vld [vmem:[%s9467_s27 + $0x1f8] sm:$0xff]  ;;  %v8084_v11 = vcombine.low %v368_v63, %v372_v0  ;;  %v8086_v12 = vcombine.low %v369_v1, %v373_v2  ;;  %v8050_v2 = vcombine.low %v331_v55, %v335_v56 }
  0x97   : > { %v8083_v14 = vcombine.high %v363_v9, %v367_v10  ;;  %v8082_v30 = vcombine.low %v363_v9, %v367_v10  ;;  %v323_v63 = vld [vmem:[%s9467_s27 + $0x98] sm:$0xff] }
  0x98   : > { %v327_v0 = vld [vmem:[%s9467_s27 + $0xb8] sm:$0xff] }
  0x99   : > { %v8042_v10 = vcombine.low %v323_v63, %v327_v0 }
  0x9d   : > { %3393 = vmatpush2.bf16.xpose.msra.mxu0 %v8140_v17  ;;  %3436 = vmatpush2.bf16.xpose.msra.mxu1 %v8142_v18  ;;  %v282_v17 = vld [vmem:[#allocation2 + $0x10] sm:$0xff] }
  0x9e   : > { %3394 = vmatprep.subr.bf16.mxu0 %v8133_v19  ;;  %3437 = vmatprep.subr.bf16.mxu1 %v8135_v20  ;;  %v290_v18 = vld [vmem:[#allocation2 + $0x50] sm:$0xff] }
  0x9f   : > { %v354_v19 = vld [vmem:[%s9467_s27 + $0x190] sm:$0xff] }
  0xa0   : > { %v358_v20 = vld [vmem:[%s9467_s27 + $0x1b0] sm:$0xff] }
  0xa1   : > { %v8073_v31 = vcombine.high %v354_v19, %v358_v20  ;;  %v8072_v41 = vcombine.low %v354_v19, %v358_v20  ;;  %v8027_v20 = vcombine.high %v307_v15, %v311_v16 }
  0xa5   : > { %3395 = vmatpush2.bf16.xpose.msra.mxu0 %v8132_v25  ;;  %3438 = vmatpush2.bf16.xpose.msra.mxu1 %v8134_v26  ;;  %v293_v25 = vld [vmem:[#allocation2 + $0x68] sm:$0xff]  ;;  %v9556_v26 = vpack.c.bf16 %v290_v18, %v282_v17 }
  0xa6   : > { %3396 = vmatprep.subr.bf16.mxu0 %v8125_v27  ;;  %3439 = vmatprep.subr.bf16.mxu1 %v8127_v28  ;;  %v8080_v27 = vcombine.low %v362_v7, %v366_v8  ;;  %v287_v28 = vld [vmem:[#allocation2 + $0x38] sm:$0xff] }
  0xa7   : > { %v315_v7 = vld [vmem:[%s9467_s27 + $0x58] sm:$0xff] }
  0xa8   : > { %v319_v8 = vld [vmem:[%s9467_s27 + $0x78] sm:$0xff] }
  0xa9   : > { %v8034_v18 = vcombine.low %v315_v7, %v319_v8 }
  0xad   : > { %3397 = vmatpush2.bf16.xpose.msra.mxu0 %v8124_v33  ;;  %3440 = vmatpush2.bf16.xpose.msra.mxu1 %v8126_v34  ;;  %v9558_v33 = vpack.c.bf16 %v293_v25, %v285_v24  ;;  %v9561_v34 = vpack.c.bf16 %v295_v29, %v287_v28  ;;  %v427_v24 = vld [vmem:[%s9467_s27 + $0x3d8] sm:$0xff]  ;;  %v8026_v28 = vcombine.low %v307_v15, %v311_v16 }
  0xae   : > { %3398 = vmatprep.subr.bf16.mxu0 %v8117_v36  ;;  %3441 = vmatprep.subr.bf16.mxu1 %v8119_v37  ;;  %v346_v36 = vld [vmem:[%s9467_s27 + $0x150] sm:$0xff]  ;;  %v431_v25 = vld [vmem:[%s9467_s27 + $0x3f8] sm:$0xff]  ;;  %v8145_v29 = vcombine.high %v426_v21, %v430_v23 }
  0xaf   : > { %v350_v37 = vld [vmem:[%s9467_s27 + $0x170] sm:$0xff] }
  0xb0   : > { %v8064_v49 = vcombine.low %v346_v36, %v350_v37 }
  0xb5   : > { %3399 = vmatpush2.bf16.xpose.msra.mxu0 %v8116_v43  ;;  %3442 = vmatpush2.bf16.xpose.msra.mxu1 %v8118_v44  ;;  %v8065_v43 = vcombine.high %v346_v36, %v350_v37  ;;  %v8067_v44 = vcombine.high %v347_v38, %v351_v39  ;;  %v419_v36 = vld [vmem:[%s9467_s27 + $0x398] sm:$0xff]  ;;  %v8144_v38 = vcombine.low %v426_v21, %v430_v23 }
  0xb6   : > { %3400 = vmatprep.subr.bf16.mxu0 %v8109_v45  ;;  %3443 = vmatprep.subr.bf16.mxu1 %v8111_v46  ;;  %v338_v45 = vld [vmem:[%s9467_s27 + $0x110] sm:$0xff]  ;;  %v423_v37 = vld [vmem:[%s9467_s27 + $0x3b8] sm:$0xff]  ;;  %v8146_v39 = vcombine.low %v427_v24, %v431_v25 }
  0xb7   : > { %v342_v46 = vld [vmem:[%s9467_s27 + $0x130] sm:$0xff]  ;;  %v371_v21 = vld [vmem:[%s9467_s27 + $0x218] sm:$0xff] }
  0xb8   : > { %v8056_v57 = vcombine.low %v338_v45, %v342_v46  ;;  %v375_v23 = vld [vmem:[%s9467_s27 + $0x238] sm:$0xff] }
  0xbd   : > { %3401 = vmatpush2.bf16.xpose.msra.mxu0 %v8108_v51  ;;  %3444 = vmatpush2.bf16.xpose.msra.mxu1 %v8110_v52  ;;  %v8057_v51 = vcombine.high %v338_v45, %v342_v46  ;;  %v8059_v52 = vcombine.high %v339_v47, %v343_v48  ;;  %v411_v45 = vld [vmem:[%s9467_s27 + $0x358] sm:$0xff]  ;;  %v8138_v48 = vcombine.low %v419_v36, %v423_v37 }
  0xbe   : > { %3402 = vmatprep.subr.bf16.mxu0 %v8101_v53  ;;  %3445 = vmatprep.subr.bf16.mxu1 %v8103_v54  ;;  %v330_v53 = vld [vmem:[%s9467_s27 + $0xd0] sm:$0xff]  ;;  %v415_v46 = vld [vmem:[%s9467_s27 + $0x378] sm:$0xff] }
  0xbf   : > { %v334_v54 = vld [vmem:[%s9467_s27 + $0xf0] sm:$0xff] }
  0xc0   : > { %v8048_v1 = vcombine.low %v330_v53, %v334_v54 }
  0xc5   : > { %3403 = vmatpush2.bf16.xpose.msra.mxu0 %v8100_v59  ;;  %3446 = vmatpush2.bf16.xpose.msra.mxu1 %v8102_v60  ;;  %v8049_v59 = vcombine.high %v330_v53, %v334_v54  ;;  %v8051_v60 = vcombine.high %v331_v55, %v335_v56  ;;  %v403_v53 = vld [vmem:[%s9467_s27 + $0x318] sm:$0xff]  ;;  %v8130_v56 = vcombine.low %v411_v45, %v415_v46 }
  0xc6   : > { %3404 = vmatprep.subr.bf16.mxu0 %v8093_v61  ;;  %3447 = vmatprep.subr.bf16.mxu1 %v8095_v62  ;;  %v322_v61 = vld [vmem:[%s9467_s27 + $0x90] sm:$0xff]  ;;  %v407_v54 = vld [vmem:[%s9467_s27 + $0x338] sm:$0xff] }
  0xc7   : > { %v326_v62 = vld [vmem:[%s9467_s27 + $0xb0] sm:$0xff] }
  0xc8   : > { %v8040_v9 = vcombine.low %v322_v61, %v326_v62 }
  0xcd   : > { %3405 = vmatpush2.bf16.xpose.msra.mxu0 %v8092_v3  ;;  %3448 = vmatpush2.bf16.xpose.msra.mxu1 %v8094_v4  ;;  %v8041_v3 = vcombine.high %v322_v61, %v326_v62  ;;  %v8043_v4 = vcombine.high %v323_v63, %v327_v0  ;;  %v395_v61 = vld [vmem:[%s9467_s27 + $0x2d8] sm:$0xff]  ;;  %v8122_v0 = vcombine.low %v403_v53, %v407_v54 }
  0xce   : > { %3406 = vmatprep.subr.bf16.mxu0 %v8085_v5  ;;  %3449 = vmatprep.subr.bf16.mxu1 %v8087_v6  ;;  %v314_v5 = vld [vmem:[%s9467_s27 + $0x50] sm:$0xff]  ;;  %v399_v62 = vld [vmem:[%s9467_s27 + $0x2f8] sm:$0xff] }
  0xcf   : > { %v318_v6 = vld [vmem:[%s9467_s27 + $0x70] sm:$0xff] }
  0xd0   : > { %v8032_v17 = vcombine.low %v314_v5, %v318_v6 }
  0xd5   : > { %3407 = vmatpush2.bf16.xpose.msra.mxu0 %v8084_v11  ;;  %3450 = vmatpush2.bf16.xpose.msra.mxu1 %v8086_v12  ;;  %v8033_v11 = vcombine.high %v314_v5, %v318_v6  ;;  %v8035_v12 = vcombine.high %v315_v7, %v319_v8  ;;  %v387_v5 = vld [vmem:[%s9467_s27 + $0x298] sm:$0xff]  ;;  %v8114_v8 = vcombine.low %v395_v61, %v399_v62 }
  0xd6   : > { %3462 = vmatprep.subr.bf16.mxu0 %v8081_v13  ;;  %3505 = vmatprep.subr.bf16.mxu1 %v8083_v14  ;;  %v306_v13 = vld [vmem:[%s9467_s27 + $0x10] sm:$0xff]  ;;  %v391_v6 = vld [vmem:[%s9467_s27 + $0x2b8] sm:$0xff] }
  0xd7   : > { %v310_v14 = vld [vmem:[%s9467_s27 + $0x30] sm:$0xff]  ;;  %v8106_v16 = vcombine.low %v387_v5, %v391_v6 }
  0xd8   : > { %v8025_v19 = vcombine.high %v306_v13, %v310_v14 }
  0xdc   : > { %3409 = vmatmul.mubr.bf16.vlgmr.msra.gmra.mxu0 %v9553_v22  ;;  %3452 = vmatmul.mubr.bf16.vlgmr.msra.gmra.mxu1 %v9556_v26 }
  0xdd   : > { %3463 = vmatpush1.bf16.xpose.msra.mxu0 %v8080_v27  ;;  %3506 = vmatpush1.bf16.xpose.msra.mxu1 %v8082_v30  ;;  %v8024_v27 = vcombine.low %v306_v13, %v310_v14  ;;  %v8147_v30 = vcombine.high %v427_v24, %v431_v25  ;;  %v379_v13 = vld [vmem:[%s9467_s27 + $0x258] sm:$0xff] }
  0xde   : > { %3464 = vmatprep.subr.bf16.mxu0 %v8073_v31  ;;  %3507 = vmatprep.subr.bf16.mxu1 %v8075_v32  ;;  %v418_v31 = vld [vmem:[%s9467_s27 + $0x390] sm:$0xff]  ;;  %v383_v14 = vld [vmem:[%s9467_s27 + $0x278] sm:$0xff] }
  0xdf   : > { %3494 = vmatprep.mubr.bf16.mxu0 %v9558_v33  ;;  %3537 = vmatprep.mubr.bf16.mxu1 %v9561_v34  ;;  %v422_v32 = vld [vmem:[%s9467_s27 + $0x3b0] sm:$0xff]  ;;  %v8098_v25 = vcombine.low %v379_v13, %v383_v14 }
  0xe0   : > { %v8136_v47 = vcombine.low %v418_v31, %v422_v32 }
  0xe5   : > { %3465 = vmatpush1.bf16.xpose.msra.mxu0 %v8072_v41  ;;  %3508 = vmatpush1.bf16.xpose.msra.mxu1 %v8074_v42  ;;  %v8137_v41 = vcombine.high %v418_v31, %v422_v32  ;;  %v8139_v42 = vcombine.high %v419_v36, %v423_v37  ;;  %v489_v31 = vld [vmem:[%s9467_s27 + $0x5c8] sm:$0xff]  ;;  %v8090_v37 = vcombine.low %v371_v21, %v375_v23 }
  0xe6   : > { %3466 = vmatprep.subr.bf16.mxu0 %v8065_v43  ;;  %3509 = vmatprep.subr.bf16.mxu1 %v8067_v44  ;;  %v410_v43 = vld [vmem:[%s9467_s27 + $0x350] sm:$0xff]  ;;  %v493_v32 = vld [vmem:[%s9467_s27 + $0x5e8] sm:$0xff] }
  0xe7   : > { %v414_v44 = vld [vmem:[%s9467_s27 + $0x370] sm:$0xff] }
  0xe8   : > { %v8128_v55 = vcombine.low %v410_v43, %v414_v44 }
  0xed   : > { %3467 = vmatpush1.bf16.xpose.msra.mxu0 %v8064_v49  ;;  %3510 = vmatpush1.bf16.xpose.msra.mxu1 %v8066_v50  ;;  %v8129_v49 = vcombine.high %v410_v43, %v414_v44  ;;  %v8131_v50 = vcombine.high %v411_v45, %v415_v46  ;;  %v286_v43 = vld [vmem:[#allocation2 + $0x30] sm:$0xff]  ;;  %v480_v45 = vld [vmem:[%s9467_s27 + $0x580] sm:$0xff] }
  0xee   : > { %3468 = vmatprep.subr.bf16.mxu0 %v8057_v51  ;;  %3511 = vmatprep.subr.bf16.mxu1 %v8059_v52  ;;  %v402_v51 = vld [vmem:[%s9467_s27 + $0x310] sm:$0xff]  ;;  %v484_v46 = vld [vmem:[%s9467_s27 + $0x5a0] sm:$0xff] }
  0xef   : > { %v406_v52 = vld [vmem:[%s9467_s27 + $0x330] sm:$0xff] }
  0xf0   : > { %v8120_v63 = vcombine.low %v402_v51, %v406_v52  ;;  %v294_v44 = vld [vmem:[#allocation2 + $0x70] sm:$0xff] }
  0xf5   : > { %3469 = vmatpush1.bf16.xpose.msra.mxu0 %v8056_v57  ;;  %3512 = vmatpush1.bf16.xpose.msra.mxu1 %v8058_v58  ;;  %v8121_v57 = vcombine.high %v402_v51, %v406_v52  ;;  %v8123_v58 = vcombine.high %v403_v53, %v407_v54  ;;  %v8206_v52 = vcombine.low %v489_v31, %v493_v32 }
  0xf6   : > { %3470 = vmatprep.subr.bf16.mxu0 %v8049_v59  ;;  %3513 = vmatprep.subr.bf16.mxu1 %v8051_v60  ;;  %v394_v59 = vld [vmem:[%s9467_s27 + $0x2d0] sm:$0xff]  ;;  %v8197_v53 = vcombine.high %v480_v45, %v484_v46 }
  0xf7   : > { %v398_v60 = vld [vmem:[%s9467_s27 + $0x2f0] sm:$0xff] }
  0xf8   : > { %v8112_v7 = vcombine.low %v394_v59, %v398_v60 }
  0xfd   : > { %3471 = vmatpush1.bf16.xpose.msra.mxu0 %v8048_v1  ;;  %3514 = vmatpush1.bf16.xpose.msra.mxu1 %v8050_v2  ;;  %v8113_v1 = vcombine.high %v394_v59, %v398_v60  ;;  %v8115_v2 = vcombine.high %v395_v61, %v399_v62  ;;  %v8196_v59 = vcombine.low %v480_v45, %v484_v46  ;;  %v552_v45 = vld [vmem:[%s9467_s27 + $0x7c0] sm:$0xff] }
  0xfe   : > { %3472 = vmatprep.subr.bf16.mxu0 %v8041_v3  ;;  %3515 = vmatprep.subr.bf16.mxu1 %v8043_v4  ;;  %v386_v3 = vld [vmem:[%s9467_s27 + $0x290] sm:$0xff]  ;;  %v556_v46 = vld [vmem:[%s9467_s27 + $0x7e0] sm:$0xff] }
  0xff   : > { %v390_v4 = vld [vmem:[%s9467_s27 + $0x2b0] sm:$0xff] }
 0x100   : > { %v8104_v15 = vcombine.low %v386_v3, %v390_v4 }
 0x105   : > { %3473 = vmatpush1.bf16.xpose.msra.mxu0 %v8040_v9  ;;  %3516 = vmatpush1.bf16.xpose.msra.mxu1 %v8042_v10  ;;  %v8105_v9 = vcombine.high %v386_v3, %v390_v4  ;;  %v8107_v10 = vcombine.high %v387_v5, %v391_v6 }
 0x106   : > { %3474 = vmatprep.subr.bf16.mxu0 %v8033_v11  ;;  %3517 = vmatprep.subr.bf16.mxu1 %v8035_v12  ;;  %v378_v11 = vld [vmem:[%s9467_s27 + $0x250] sm:$0xff] }
 0x107   : > { %v382_v12 = vld [vmem:[%s9467_s27 + $0x270] sm:$0xff] }
 0x108   : > { %v8096_v24 = vcombine.low %v378_v11, %v382_v12 }
 0x10d   : > { %3475 = vmatpush1.bf16.xpose.msra.mxu0 %v8032_v17  ;;  %3518 = vmatpush1.bf16.xpose.msra.mxu1 %v8034_v18  ;;  %v8097_v17 = vcombine.high %v378_v11, %v382_v12  ;;  %v8099_v18 = vcombine.high %v379_v13, %v383_v14 }
 0x10e   : > { %3476 = vmatprep.subr.bf16.mxu0 %v8025_v19  ;;  %3519 = vmatprep.subr.bf16.mxu1 %v8027_v20  ;;  %v370_v19 = vld [vmem:[%s9467_s27 + $0x210] sm:$0xff] }
 0x10f   : > { %v374_v20 = vld [vmem:[%s9467_s27 + $0x230] sm:$0xff] }
 0x110   : > { %v8088_v36 = vcombine.low %v370_v19, %v374_v20 }
 0x115   : > { %3477 = vmatpush1.bf16.xpose.msra.mxu0 %v8024_v27  ;;  %3520 = vmatpush1.bf16.xpose.msra.mxu1 %v8026_v28  ;;  %v8089_v27 = vcombine.high %v370_v19, %v374_v20  ;;  %v8091_v28 = vcombine.high %v371_v21, %v375_v23 }
 0x116   : > { %3478 = vmatprep.subr.bf16.mxu0 %v8145_v29  ;;  %3521 = vmatprep.subr.bf16.mxu1 %v8147_v30  ;;  %v488_v29 = vld [vmem:[%s9467_s27 + $0x5c0] sm:$0xff] }
 0x117   : > { %v492_v30 = vld [vmem:[%s9467_s27 + $0x5e0] sm:$0xff] }
 0x118   : > { %v8204_v51 = vcombine.low %v488_v29, %v492_v30 }
 0x11d   : > { %3479 = vmatpush2.bf16.xpose.msra.mxu0 %v8144_v38  ;;  %3522 = vmatpush2.bf16.xpose.msra.mxu1 %v8146_v39  ;;  %v8205_v38 = vcombine.high %v488_v29, %v492_v30  ;;  %v8207_v39 = vcombine.high %v489_v31, %v493_v32 }
 0x11e   : > { %3480 = vmatprep.subr.bf16.mxu0 %v8137_v41  ;;  %3523 = vmatprep.subr.bf16.mxu1 %v8139_v42  ;;  %v284_v41 = vld [vmem:[#allocation2 + $0x20] sm:$0xff] }
 0x11f   : > { %v292_v42 = vld [vmem:[#allocation2 + $0x60] sm:$0xff] }
 0x125   : > { %3481 = vmatpush2.bf16.xpose.msra.mxu0 %v8136_v47  ;;  %3524 = vmatpush2.bf16.xpose.msra.mxu1 %v8138_v48  ;;  %v9628_v47 = vpack.c.bf16 %v292_v42, %v284_v41  ;;  %v481_v48 = vld [vmem:[%s9467_s27 + $0x588] sm:$0xff] }
 0x126   : > { %3482 = vmatprep.subr.bf16.mxu0 %v8129_v49  ;;  %3525 = vmatprep.subr.bf16.mxu1 %v8131_v50  ;;  %v485_v49 = vld [vmem:[%s9467_s27 + $0x5a8] sm:$0xff]  ;;  %v9632_v50 = vpack.c.bf16 %v294_v44, %v286_v43 }
 0x127   : > { %v8199_v54 = vcombine.high %v481_v48, %v485_v49  ;;  %v8198_v60 = vcombine.low %v481_v48, %v485_v49  ;;  %v553_v48 = vld [vmem:[%s9467_s27 + $0x7c8] sm:$0xff] }
 0x128   : > { %v557_v49 = vld [vmem:[%s9467_s27 + $0x7e8] sm:$0xff] }
 0x12d   : > { %3483 = vmatpush2.bf16.xpose.msra.mxu0 %v8128_v55  ;;  %3526 = vmatpush2.bf16.xpose.msra.mxu1 %v8130_v56  ;;  %v472_v55 = vld [vmem:[%s9467_s27 + $0x540] sm:$0xff] }
 0x12e   : > { %3484 = vmatprep.subr.bf16.mxu0 %v8121_v57  ;;  %3527 = vmatprep.subr.bf16.mxu1 %v8123_v58  ;;  %v476_v56 = vld [vmem:[%s9467_s27 + $0x560] sm:$0xff]  ;;  %v473_v57 = vld [vmem:[%s9467_s27 + $0x548] sm:$0xff] }
 0x12f   : > { %v477_v58 = vld [vmem:[%s9467_s27 + $0x568] sm:$0xff]  ;;  %v8189_v61 = vcombine.high %v472_v55, %v476_v56  ;;  %v8188_v3 = vcombine.low %v472_v55, %v476_v56  ;;  %v544_v55 = vld [vmem:[%s9467_s27 + $0x780] sm:$0xff] }
 0x130   : > { %v8191_v62 = vcombine.high %v473_v57, %v477_v58  ;;  %v8190_v4 = vcombine.low %v473_v57, %v477_v58  ;;  %v548_v56 = vld [vmem:[%s9467_s27 + $0x7a0] sm:$0xff]  ;;  %v545_v57 = vld [vmem:[%s9467_s27 + $0x788] sm:$0xff] }
 0x131   : > { %v549_v58 = vld [vmem:[%s9467_s27 + $0x7a8] sm:$0xff] }
 0x135   : > { %3485 = vmatpush2.bf16.xpose.msra.mxu0 %v8120_v63  ;;  %3528 = vmatpush2.bf16.xpose.msra.mxu1 %v8122_v0  ;;  %v464_v63 = vld [vmem:[%s9467_s27 + $0x500] sm:$0xff] }
 0x136   : > { %3486 = vmatprep.subr.bf16.mxu0 %v8113_v1  ;;  %3529 = vmatprep.subr.bf16.mxu1 %v8115_v2  ;;  %v468_v0 = vld [vmem:[%s9467_s27 + $0x520] sm:$0xff]  ;;  %v465_v1 = vld [vmem:[%s9467_s27 + $0x508] sm:$0xff] }
 0x137   : > { %v469_v2 = vld [vmem:[%s9467_s27 + $0x528] sm:$0xff]  ;;  %v8181_v5 = vcombine.high %v464_v63, %v468_v0  ;;  %v8180_v11 = vcombine.low %v464_v63, %v468_v0 }
 0x138   : > { %v8183_v6 = vcombine.high %v465_v1, %v469_v2  ;;  %v8182_v12 = vcombine.low %v465_v1, %v469_v2 }
 0x13d   : > { %3487 = vmatpush2.bf16.xpose.msra.mxu0 %v8112_v7  ;;  %3530 = vmatpush2.bf16.xpose.msra.mxu1 %v8114_v8  ;;  %v456_v7 = vld [vmem:[%s9467_s27 + $0x4c0] sm:$0xff] }
 0x13e   : > { %3488 = vmatprep.subr.bf16.mxu0 %v8105_v9  ;;  %3531 = vmatprep.subr.bf16.mxu1 %v8107_v10  ;;  %v460_v8 = vld [vmem:[%s9467_s27 + $0x4e0] sm:$0xff]  ;;  %v457_v9 = vld [vmem:[%s9467_s27 + $0x4c8] sm:$0xff] }
 0x13f   : > { %v461_v10 = vld [vmem:[%s9467_s27 + $0x4e8] sm:$0xff]  ;;  %v8173_v13 = vcombine.high %v456_v7, %v460_v8  ;;  %v8172_v19 = vcombine.low %v456_v7, %v460_v8 }
 0x140   : > { %v8175_v14 = vcombine.high %v457_v9, %v461_v10  ;;  %v8174_v20 = vcombine.low %v457_v9, %v461_v10  ;;  %v537_v7 = vld [vmem:[%s9467_s27 + $0x748] sm:$0xff]  ;;  %v8260_v10 = vcombine.low %v544_v55, %v548_v56 }
 0x141   : > { %v541_v8 = vld [vmem:[%s9467_s27 + $0x768] sm:$0xff] }
 0x145   : > { %3489 = vmatpush2.bf16.xpose.msra.mxu0 %v8104_v15  ;;  %3532 = vmatpush2.bf16.xpose.msra.mxu1 %v8106_v16  ;;  %v448_v15 = vld [vmem:[%s9467_s27 + $0x480] sm:$0xff] }
 0x146   : > { %3490 = vmatprep.subr.bf16.mxu0 %v8097_v17  ;;  %3533 = vmatprep.subr.bf16.mxu1 %v8099_v18  ;;  %v452_v16 = vld [vmem:[%s9467_s27 + $0x4a0] sm:$0xff]  ;;  %v449_v17 = vld [vmem:[%s9467_s27 + $0x488] sm:$0xff] }
 0x147   : > { %v453_v18 = vld [vmem:[%s9467_s27 + $0x4a8] sm:$0xff]  ;;  %v8165_v21 = vcombine.high %v448_v15, %v452_v16  ;;  %v8164_v29 = vcombine.low %v448_v15, %v452_v16  ;;  %v528_v15 = vld [vmem:[%s9467_s27 + $0x700] sm:$0xff] }
 0x148   : > { %v8167_v23 = vcombine.high %v449_v17, %v453_v18  ;;  %v8166_v30 = vcombine.low %v449_v17, %v453_v18  ;;  %v532_v16 = vld [vmem:[%s9467_s27 + $0x720] sm:$0xff]  ;;  %v529_v17 = vld [vmem:[%s9467_s27 + $0x708] sm:$0xff] }
 0x149   : > { %v533_v18 = vld [vmem:[%s9467_s27 + $0x728] sm:$0xff] }
 0x14d   : > { %3491 = vmatpush2.bf16.xpose.msra.mxu0 %v8096_v24  ;;  %3534 = vmatpush2.bf16.xpose.msra.mxu1 %v8098_v25  ;;  %v440_v24 = vld [vmem:[%s9467_s27 + $0x440] sm:$0xff] }
 0x14e   : > { %3492 = vmatprep.subr.bf16.mxu0 %v8089_v27  ;;  %3535 = vmatprep.subr.bf16.mxu1 %v8091_v28  ;;  %v444_v25 = vld [vmem:[%s9467_s27 + $0x460] sm:$0xff]  ;;  %v441_v27 = vld [vmem:[%s9467_s27 + $0x448] sm:$0xff] }
 0x14f   : > { %v445_v28 = vld [vmem:[%s9467_s27 + $0x468] sm:$0xff]  ;;  %v8157_v31 = vcombine.high %v440_v24, %v444_v25  ;;  %v8156_v41 = vcombine.low %v440_v24, %v444_v25  ;;  %v520_v24 = vld [vmem:[%s9467_s27 + $0x6c0] sm:$0xff] }
 0x150   : > { %v8159_v32 = vcombine.high %v441_v27, %v445_v28  ;;  %v8158_v42 = vcombine.low %v441_v27, %v445_v28  ;;  %v524_v25 = vld [vmem:[%s9467_s27 + $0x6e0] sm:$0xff]  ;;  %v521_v27 = vld [vmem:[%s9467_s27 + $0x6c8] sm:$0xff] }
 0x151   : > { %v525_v28 = vld [vmem:[%s9467_s27 + $0x6e8] sm:$0xff] }
 0x155   : > { %3493 = vmatpush2.bf16.xpose.msra.mxu0 %v8088_v36  ;;  %3536 = vmatpush2.bf16.xpose.msra.mxu1 %v8090_v37  ;;  %v432_v36 = vld [vmem:[%s9467_s27 + $0x400] sm:$0xff] }
 0x156   : > { %3548 = vmatprep.subr.bf16.mxu0 %v8205_v38  ;;  %3591 = vmatprep.subr.bf16.mxu1 %v8207_v39  ;;  %v436_v37 = vld [vmem:[%s9467_s27 + $0x420] sm:$0xff]  ;;  %v433_v38 = vld [vmem:[%s9467_s27 + $0x408] sm:$0xff] }
 0x157   : > { %v437_v39 = vld [vmem:[%s9467_s27 + $0x428] sm:$0xff]  ;;  %v8149_v43 = vcombine.high %v432_v36, %v436_v37 }
 0x158   : > { %v8151_v44 = vcombine.high %v433_v38, %v437_v39 }
 0x15c   : > { %3495 = vmatmul.mubr.bf16.vlgmr.msra.gmra.mxu0 %v9628_v47  ;;  %3538 = vmatmul.mubr.bf16.vlgmr.msra.gmra.mxu1 %v9632_v50 }
 0x15d   : > { %3549 = vmatpush1.bf16.xpose.msra.mxu0 %v8204_v51  ;;  %3592 = vmatpush1.bf16.xpose.msra.mxu1 %v8206_v52  ;;  %v8148_v51 = vcombine.low %v432_v36, %v436_v37  ;;  %v8150_v52 = vcombine.low %v433_v38, %v437_v39  ;;  %v512_v36 = vld [vmem:[%s9467_s27 + $0x680] sm:$0xff]  ;;  %v513_v38 = vld [vmem:[%s9467_s27 + $0x688] sm:$0xff] }
 0x15e   : > { %3550 = vmatprep.subr.bf16.mxu0 %v8197_v53  ;;  %3593 = vmatprep.subr.bf16.mxu1 %v8199_v54  ;;  %v8269_v53 = vcombine.high %v552_v45, %v556_v46  ;;  %v8271_v54 = vcombine.high %v553_v48, %v557_v49  ;;  %v516_v37 = vld [vmem:[%s9467_s27 + $0x6a0] sm:$0xff]  ;;  %v517_v39 = vld [vmem:[%s9467_s27 + $0x6a8] sm:$0xff] }
 0x15f   : > { %3580 = vmatprep.mubr.bf16.mxu0 %v9494_v35  ;;  %3623 = vmatprep.mubr.bf16.mxu1 %v9498_v40 }
 0x165   : > { %3551 = vmatpush1.bf16.xpose.msra.mxu0 %v8196_v59  ;;  %3594 = vmatpush1.bf16.xpose.msra.mxu1 %v8198_v60  ;;  %v8268_v59 = vcombine.low %v552_v45, %v556_v46  ;;  %v8270_v60 = vcombine.low %v553_v48, %v557_v49  ;;  %v504_v45 = vld [vmem:[%s9467_s27 + $0x640] sm:$0xff]  ;;  %v505_v48 = vld [vmem:[%s9467_s27 + $0x648] sm:$0xff] }
 0x166   : > { %3552 = vmatprep.subr.bf16.mxu0 %v8189_v61  ;;  %3595 = vmatprep.subr.bf16.mxu1 %v8191_v62  ;;  %v8261_v61 = vcombine.high %v544_v55, %v548_v56  ;;  %v8263_v62 = vcombine.high %v545_v57, %v549_v58  ;;  %v508_v46 = vld [vmem:[%s9467_s27 + $0x660] sm:$0xff]  ;;  %v509_v49 = vld [vmem:[%s9467_s27 + $0x668] sm:$0xff] }
 0x167   : > { %v496_v55 = vld [vmem:[%s9467_s27 + $0x600] sm:$0xff] }
 0x168   : > { %v500_v56 = vld [vmem:[%s9467_s27 + $0x620] sm:$0xff] }
 0x16d   : > { %3553 = vmatpush1.bf16.xpose.msra.mxu0 %v8188_v3  ;;  %3596 = vmatpush1.bf16.xpose.msra.mxu1 %v8190_v4  ;;  %v536_v4 = vld [vmem:[%s9467_s27 + $0x740] sm:$0xff] }
 0x16e   : > { %3554 = vmatprep.subr.bf16.mxu0 %v8181_v5  ;;  %3597 = vmatprep.subr.bf16.mxu1 %v8183_v6  ;;  %v540_v5 = vld [vmem:[%s9467_s27 + $0x760] sm:$0xff] }
 0x175   : > { %3555 = vmatpush1.bf16.xpose.msra.mxu0 %v8180_v11  ;;  %3598 = vmatpush1.bf16.xpose.msra.mxu1 %v8182_v12  ;;  %v8262_v12 = vcombine.low %v545_v57, %v549_v58  ;;  %v497_v57 = vld [vmem:[%s9467_s27 + $0x608] sm:$0xff] }
 0x176   : > { %3556 = vmatprep.subr.bf16.mxu0 %v8173_v13  ;;  %3599 = vmatprep.subr.bf16.mxu1 %v8175_v14  ;;  %v8253_v13 = vcombine.high %v536_v4, %v540_v5  ;;  %v8255_v14 = vcombine.high %v537_v7, %v541_v8  ;;  %v501_v58 = vld [vmem:[%s9467_s27 + $0x628] sm:$0xff] }
 0x17d   : > { %3557 = vmatpush1.bf16.xpose.msra.mxu0 %v8172_v19  ;;  %3600 = vmatpush1.bf16.xpose.msra.mxu1 %v8174_v20  ;;  %v8252_v19 = vcombine.low %v536_v4, %v540_v5  ;;  %v8254_v20 = vcombine.low %v537_v7, %v541_v8  ;;  %v491_v4 = vld [vmem:[%s9467_s27 + $0x5d8] sm:$0xff]  ;;  %v8214_v7 = vcombine.low %v497_v57, %v501_v58 }
 0x17e   : > { %3558 = vmatprep.subr.bf16.mxu0 %v8165_v21  ;;  %3601 = vmatprep.subr.bf16.mxu1 %v8167_v23  ;;  %v8245_v21 = vcombine.high %v528_v15, %v532_v16  ;;  %v8247_v23 = vcombine.high %v529_v17, %v533_v18  ;;  %v495_v5 = vld [vmem:[%s9467_s27 + $0x5f8] sm:$0xff] }
 0x185   : > { %3559 = vmatpush1.bf16.xpose.msra.mxu0 %v8164_v29  ;;  %3602 = vmatpush1.bf16.xpose.msra.mxu1 %v8166_v30  ;;  %v8244_v29 = vcombine.low %v528_v15, %v532_v16  ;;  %v8246_v30 = vcombine.low %v529_v17, %v533_v18  ;;  %v8210_v16 = vcombine.low %v491_v4, %v495_v5 }
 0x186   : > { %3560 = vmatprep.subr.bf16.mxu0 %v8157_v31  ;;  %3603 = vmatprep.subr.bf16.mxu1 %v8159_v32  ;;  %v8237_v31 = vcombine.high %v520_v24, %v524_v25  ;;  %v8239_v32 = vcombine.high %v521_v27, %v525_v28 }
 0x18d   : > { %3561 = vmatpush1.bf16.xpose.msra.mxu0 %v8156_v41  ;;  %3604 = vmatpush1.bf16.xpose.msra.mxu1 %v8158_v42  ;;  %v8236_v41 = vcombine.low %v520_v24, %v524_v25  ;;  %v8238_v42 = vcombine.low %v521_v27, %v525_v28 }
 0x18e   : > { %3562 = vmatprep.subr.bf16.mxu0 %v8149_v43  ;;  %3605 = vmatprep.subr.bf16.mxu1 %v8151_v44  ;;  %v8229_v43 = vcombine.high %v512_v36, %v516_v37  ;;  %v8231_v44 = vcombine.high %v513_v38, %v517_v39 }
 0x195   : > { %3563 = vmatpush1.bf16.xpose.msra.mxu0 %v8148_v51  ;;  %3606 = vmatpush1.bf16.xpose.msra.mxu1 %v8150_v52  ;;  %v8228_v51 = vcombine.low %v512_v36, %v516_v37  ;;  %v8230_v52 = vcombine.low %v513_v38, %v517_v39 }
 0x196   : > { %3564 = vmatprep.subr.bf16.mxu0 %v8269_v53  ;;  %3607 = vmatprep.subr.bf16.mxu1 %v8271_v54  ;;  %v8221_v53 = vcombine.high %v504_v45, %v508_v46  ;;  %v8223_v54 = vcombine.high %v505_v48, %v509_v49 }
 0x19c   : > { %v3410_v63 = vpop.f32.mrf.mxu0  ;;  %v3453_v0 = vpop.f32.mrf.mxu1 }
 0x19d   : > { %3565 = vmatpush2.bf16.xpose.msra.mxu0 %v8268_v59  ;;  %v9670_v1 = vadd.f32 %v3453_v0, %v3410_v63  ;;  %3608 = vmatpush2.bf16.xpose.msra.mxu1 %v8270_v60  ;;  %v8220_v59 = vcombine.low %v504_v45, %v508_v46  ;;  %v8222_v60 = vcombine.low %v505_v48, %v509_v49  ;;  %v490_v63 = vld [vmem:[%s9467_s27 + $0x5d0] sm:$0xff] }
 0x19e   : > { %v9672_v2 = vpop.f32.mrf.mxu0  ;;  %3566 = vmatprep.subr.bf16.mxu0 %v8261_v61  ;;  %v9674_v3 = vpop.f32.mrf.mxu1  ;;  %3609 = vmatprep.subr.bf16.mxu1 %v8263_v62  ;;  %v8213_v61 = vcombine.high %v496_v55, %v500_v56  ;;  %v8215_v62 = vcombine.high %v497_v57, %v501_v58  ;;  %v494_v0 = vld [vmem:[%s9467_s27 + $0x5f0] sm:$0xff] }
 0x19f   : > { %v8209_v8 = vcombine.high %v490_v63, %v494_v0  ;;  %v8208_v15 = vcombine.low %v490_v63, %v494_v0 }
 0x1a0   : > { %v3414_v6 = vpop.f32.mrf.mxu0  ;;  %v3457_v9 = vpop.f32.mrf.mxu1 }
 0x1a1   : > { %v9680_v11 = vadd.f32 %v3457_v9, %v3414_v6  ;;  %v8212_v6 = vcombine.low %v496_v55, %v500_v56  ;;  %v8211_v9 = vcombine.high %v491_v4, %v495_v5 }
 0x1a5   : > { %3567 = vmatpush2.bf16.xpose.msra.mxu0 %v8260_v10  ;;  %3610 = vmatpush2.bf16.xpose.msra.mxu1 %v8262_v12  ;;  %v482_v10 = vld [vmem:[%s9467_s27 + $0x590] sm:$0xff] }
 0x1a6   : > { %3568 = vmatprep.subr.bf16.mxu0 %v8253_v13  ;;  %3611 = vmatprep.subr.bf16.mxu1 %v8255_v14  ;;  %v486_v12 = vld [vmem:[%s9467_s27 + $0x5b0] sm:$0xff]  ;;  %v483_v13 = vld [vmem:[%s9467_s27 + $0x598] sm:$0xff] }
 0x1a7   : > { %v487_v14 = vld [vmem:[%s9467_s27 + $0x5b8] sm:$0xff]  ;;  %v8201_v17 = vcombine.high %v482_v10, %v486_v12  ;;  %v8200_v24 = vcombine.low %v482_v10, %v486_v12 }
 0x1a8   : > { %v8203_v18 = vcombine.high %v483_v13, %v487_v14  ;;  %v8202_v25 = vcombine.low %v483_v13, %v487_v14 }
 0x1ad   : > { %3569 = vmatpush2.bf16.xpose.msra.mxu0 %v8252_v19  ;;  %3612 = vmatpush2.bf16.xpose.msra.mxu1 %v8254_v20  ;;  %v474_v19 = vld [vmem:[%s9467_s27 + $0x550] sm:$0xff] }
 0x1ae   : > { %3570 = vmatprep.subr.bf16.mxu0 %v8245_v21  ;;  %3613 = vmatprep.subr.bf16.mxu1 %v8247_v23  ;;  %v478_v20 = vld [vmem:[%s9467_s27 + $0x570] sm:$0xff]  ;;  %v475_v21 = vld [vmem:[%s9467_s27 + $0x558] sm:$0xff] }
 0x1af   : > { %v479_v23 = vld [vmem:[%s9467_s27 + $0x578] sm:$0xff]  ;;  %v8193_v27 = vcombine.high %v474_v19, %v478_v20  ;;  %v8192_v36 = vcombine.low %v474_v19, %v478_v20 }
 0x1b0   : > { %v8195_v28 = vcombine.high %v475_v21, %v479_v23  ;;  %v8194_v37 = vcombine.low %v475_v21, %v479_v23 }
 0x1b5   : > { %3571 = vmatpush2.bf16.xpose.msra.mxu0 %v8244_v29  ;;  %3614 = vmatpush2.bf16.xpose.msra.mxu1 %v8246_v30  ;;  %v466_v29 = vld [vmem:[%s9467_s27 + $0x510] sm:$0xff] }
 0x1b6   : > { %3572 = vmatprep.subr.bf16.mxu0 %v8237_v31  ;;  %3615 = vmatprep.subr.bf16.mxu1 %v8239_v32  ;;  %v470_v30 = vld [vmem:[%s9467_s27 + $0x530] sm:$0xff]  ;;  %v467_v31 = vld [vmem:[%s9467_s27 + $0x518] sm:$0xff] }
 0x1b7   : > { %v471_v32 = vld [vmem:[%s9467_s27 + $0x538] sm:$0xff]  ;;  %v8185_v38 = vcombine.high %v466_v29, %v470_v30  ;;  %v8184_v45 = vcombine.low %v466_v29, %v470_v30  ;;  %v9746_v30 = vpop.f32.mrf.mxu0 }
 0x1b8   : > { %v8187_v39 = vcombine.high %v467_v31, %v471_v32  ;;  %v8186_v46 = vcombine.low %v467_v31, %v471_v32 }
 0x1bd   : > { %3573 = vmatpush2.bf16.xpose.msra.mxu0 %v8236_v41  ;;  %3616 = vmatpush2.bf16.xpose.msra.mxu1 %v8238_v42  ;;  %v458_v41 = vld [vmem:[%s9467_s27 + $0x4d0] sm:$0xff] }
 0x1be   : > { %3574 = vmatprep.subr.bf16.mxu0 %v8229_v43  ;;  %3617 = vmatprep.subr.bf16.mxu1 %v8231_v44  ;;  %v462_v42 = vld [vmem:[%s9467_s27 + $0x4f0] sm:$0xff]  ;;  %v459_v43 = vld [vmem:[%s9467_s27 + $0x4d8] sm:$0xff] }
 0x1bf   : > { %v463_v44 = vld [vmem:[%s9467_s27 + $0x4f8] sm:$0xff]  ;;  %v8177_v48 = vcombine.high %v458_v41, %v462_v42  ;;  %v8176_v55 = vcombine.low %v458_v41, %v462_v42 }
 0x1c0   : > { %v8179_v49 = vcombine.high %v459_v43, %v463_v44  ;;  %v8178_v56 = vcombine.low %v459_v43, %v463_v44 }
 0x1c5   : > { %3575 = vmatpush2.bf16.xpose.msra.mxu0 %v8228_v51  ;;  %3618 = vmatpush2.bf16.xpose.msra.mxu1 %v8230_v52  ;;  %v450_v51 = vld [vmem:[%s9467_s27 + $0x490] sm:$0xff] }
 0x1c6   : > { %3576 = vmatprep.subr.bf16.mxu0 %v8221_v53  ;;  %3619 = vmatprep.subr.bf16.mxu1 %v8223_v54  ;;  %v454_v52 = vld [vmem:[%s9467_s27 + $0x4b0] sm:$0xff]  ;;  %v451_v53 = vld [vmem:[%s9467_s27 + $0x498] sm:$0xff] }
 0x1c7   : > { %v455_v54 = vld [vmem:[%s9467_s27 + $0x4b8] sm:$0xff]  ;;  %v8169_v57 = vcombine.high %v450_v51, %v454_v52  ;;  %v8168_v63 = vcombine.low %v450_v51, %v454_v52 }
 0x1c8   : > { %v8171_v58 = vcombine.high %v451_v53, %v455_v54  ;;  %v8170_v0 = vcombine.low %v451_v53, %v455_v54  ;;  %v543_v51 = vld [vmem:[%s9467_s27 + $0x778] sm:$0xff] }
 0x1cd   : > { %3577 = vmatpush2.bf16.xpose.msra.mxu0 %v8220_v59  ;;  %3620 = vmatpush2.bf16.xpose.msra.mxu1 %v8222_v60  ;;  %v442_v59 = vld [vmem:[%s9467_s27 + $0x450] sm:$0xff] }
 0x1ce   : > { %3578 = vmatprep.subr.bf16.mxu0 %v8213_v61  ;;  %3621 = vmatprep.subr.bf16.mxu1 %v8215_v62  ;;  %v446_v60 = vld [vmem:[%s9467_s27 + $0x470] sm:$0xff]  ;;  %v443_v61 = vld [vmem:[%s9467_s27 + $0x458] sm:$0xff] }
 0x1cf   : > { %v447_v62 = vld [vmem:[%s9467_s27 + $0x478] sm:$0xff]  ;;  %v8161_v4 = vcombine.high %v442_v59, %v446_v60  ;;  %v8160_v10 = vcombine.low %v442_v59, %v446_v60 }
 0x1d0   : > { %v8163_v5 = vcombine.high %v443_v61, %v447_v62  ;;  %v8162_v12 = vcombine.low %v443_v61, %v447_v62  ;;  %v534_v61 = vld [vmem:[%s9467_s27 + $0x730] sm:$0xff]  ;;  %v531_v62 = vld [vmem:[%s9467_s27 + $0x718] sm:$0xff] }
 0x1d5   : > { %3579 = vmatpush2.bf16.xpose.msra.mxu0 %v8212_v6  ;;  %3622 = vmatpush2.bf16.xpose.msra.mxu1 %v8214_v7  ;;  %v434_v6 = vld [vmem:[%s9467_s27 + $0x410] sm:$0xff] }
 0x1d6   : > { %3634 = vmatprep.subr.bf16.mxu0 %v8209_v8  ;;  %3677 = vmatprep.subr.bf16.mxu1 %v8211_v9  ;;  %v438_v7 = vld [vmem:[%s9467_s27 + $0x430] sm:$0xff]  ;;  %v435_v8 = vld [vmem:[%s9467_s27 + $0x418] sm:$0xff] }
 0x1d7   : > { %v439_v9 = vld [vmem:[%s9467_s27 + $0x438] sm:$0xff]  ;;  %v8153_v13 = vcombine.high %v434_v6, %v438_v7  ;;  %v8152_v19 = vcombine.low %v434_v6, %v438_v7  ;;  %v522_v7 = vld [vmem:[%s9467_s27 + $0x6d0] sm:$0xff] }
 0x1d8   : > { %v8155_v14 = vcombine.high %v435_v8, %v439_v9  ;;  %v8154_v20 = vcombine.low %v435_v8, %v439_v9  ;;  %v526_v8 = vld [vmem:[%s9467_s27 + $0x6f0] sm:$0xff]  ;;  %v523_v9 = vld [vmem:[%s9467_s27 + $0x6d8] sm:$0xff] }
 0x1dc   : > { %3581 = vmatmul.mubr.bf16.vlgmr.msra.gmra.mxu0 %v9553_v22  ;;  %3624 = vmatmul.mubr.bf16.vlgmr.msra.gmra.mxu1 %v9556_v26 }
 0x1dd   : > { %3635 = vmatpush1.bf16.xpose.msra.mxu0 %v8208_v15  ;;  %3678 = vmatpush1.bf16.xpose.msra.mxu1 %v8210_v16  ;;  %v554_v15 = vld [vmem:[%s9467_s27 + $0x7d0] sm:$0xff] }
 0x1de   : > { %3636 = vmatprep.subr.bf16.mxu0 %v8201_v17  ;;  %3679 = vmatprep.subr.bf16.mxu1 %v8203_v18  ;;  %v558_v16 = vld [vmem:[%s9467_s27 + $0x7f0] sm:$0xff]  ;;  %v555_v17 = vld [vmem:[%s9467_s27 + $0x7d8] sm:$0xff] }
 0x1df   : > { %3666 = vmatprep.mubr.bf16.mxu0 %v9558_v33  ;;  %3709 = vmatprep.mubr.bf16.mxu1 %v9561_v34  ;;  %v559_v18 = vld [vmem:[%s9467_s27 + $0x7f8] sm:$0xff]  ;;  %v8273_v21 = vcombine.high %v554_v15, %v558_v16  ;;  %v8272_v29 = vcombine.low %v554_v15, %v558_v16  ;;  %v514_v16 = vld [vmem:[%s9467_s27 + $0x690] sm:$0xff] }
 0x1e0   : > { %v8275_v23 = vcombine.high %v555_v17, %v559_v18  ;;  %v8274_v31 = vcombine.low %v555_v17, %v559_v18  ;;  %v518_v17 = vld [vmem:[%s9467_s27 + $0x6b0] sm:$0xff]  ;;  %v515_v18 = vld [vmem:[%s9467_s27 + $0x698] sm:$0xff] }
 0x1e5   : > { %3637 = vmatpush1.bf16.xpose.msra.mxu0 %v8200_v24  ;;  %3680 = vmatpush1.bf16.xpose.msra.mxu1 %v8202_v25  ;;  %v546_v24 = vld [vmem:[%s9467_s27 + $0x790] sm:$0xff] }
 0x1e6   : > { %3638 = vmatprep.subr.bf16.mxu0 %v8193_v27  ;;  %3681 = vmatprep.subr.bf16.mxu1 %v8195_v28  ;;  %v550_v25 = vld [vmem:[%s9467_s27 + $0x7b0] sm:$0xff]  ;;  %v547_v27 = vld [vmem:[%s9467_s27 + $0x798] sm:$0xff] }
 0x1e7   : > { %v551_v28 = vld [vmem:[%s9467_s27 + $0x7b8] sm:$0xff]  ;;  %v8265_v32 = vcombine.high %v546_v24, %v550_v25 }
 0x1e8   : > { %v8266_v54 = vcombine.low %v547_v27, %v551_v28 }
 0x1ed   : > { %3639 = vmatpush1.bf16.xpose.msra.mxu0 %v8192_v36  ;;  %3682 = vmatpush1.bf16.xpose.msra.mxu1 %v8194_v37  ;;  %v9748_v36 = vpop.f32.mrf.mxu1  ;;  %v8267_v37 = vcombine.high %v547_v27, %v551_v28  ;;  %v510_v27 = vld [vmem:[%s9467_s27 + $0x670] sm:$0xff]  ;;  %v507_v28 = vld [vmem:[%s9467_s27 + $0x658] sm:$0xff] }
 0x1ee   : > { %3640 = vmatprep.subr.bf16.mxu0 %v8185_v38  ;;  %3683 = vmatprep.subr.bf16.mxu1 %v8187_v39 }
 0x1f5   : > { %3641 = vmatpush1.bf16.xpose.msra.mxu0 %v8184_v45  ;;  %3684 = vmatpush1.bf16.xpose.msra.mxu1 %v8186_v46  ;;  %v538_v45 = vld [vmem:[%s9467_s27 + $0x750] sm:$0xff] }
 0x1f6   : > { %3642 = vmatprep.subr.bf16.mxu0 %v8177_v48  ;;  %3685 = vmatprep.subr.bf16.mxu1 %v8179_v49  ;;  %v542_v46 = vld [vmem:[%s9467_s27 + $0x770] sm:$0xff]  ;;  %v539_v49 = vld [vmem:[%s9467_s27 + $0x758] sm:$0xff] }
 0x1fd   : > { %3643 = vmatpush1.bf16.xpose.msra.mxu0 %v8176_v55  ;;  %3686 = vmatpush1.bf16.xpose.msra.mxu1 %v8178_v56  ;;  %v8257_v55 = vcombine.high %v538_v45, %v542_v46 }
 0x1fe   : > { %3644 = vmatprep.subr.bf16.mxu0 %v8169_v57  ;;  %3687 = vmatprep.subr.bf16.mxu1 %v8171_v58  ;;  %v8259_v57 = vcombine.high %v539_v49, %v543_v51 }
 0x205   : > { %3645 = vmatpush1.bf16.xpose.msra.mxu0 %v8168_v63  ;;  %3688 = vmatpush1.bf16.xpose.msra.mxu1 %v8170_v0  ;;  %v535_v63 = vld [vmem:[%s9467_s27 + $0x738] sm:$0xff]  ;;  %v8256_v0 = vcombine.low %v538_v45, %v542_v46 }
 0x206   : > { %3646 = vmatprep.subr.bf16.mxu0 %v8161_v4  ;;  %3689 = vmatprep.subr.bf16.mxu1 %v8163_v5  ;;  %v8258_v4 = vcombine.low %v539_v49, %v543_v51  ;;  %v8251_v6 = vcombine.high %v531_v62, %v535_v63  ;;  %v503_v45 = vld [vmem:[%s9467_s27 + $0x638] sm:$0xff] }
 0x20d   : > { %3647 = vmatpush1.bf16.xpose.msra.mxu0 %v8160_v10  ;;  %3690 = vmatpush1.bf16.xpose.msra.mxu1 %v8162_v12  ;;  %v527_v10 = vld [vmem:[%s9467_s27 + $0x6f8] sm:$0xff] }
 0x20e   : > { %3648 = vmatprep.subr.bf16.mxu0 %v8153_v13  ;;  %3691 = vmatprep.subr.bf16.mxu1 %v8155_v14  ;;  %v8250_v13 = vcombine.low %v531_v62, %v535_v63  ;;  %v8241_v14 = vcombine.high %v522_v7, %v526_v8  ;;  %v8243_v15 = vcombine.high %v523_v9, %v527_v10  ;;  %v613_v62 = vld [vmem:[%s9467_s27 + $0x9a8] sm:$0xff] }
 0x215   : > { %3649 = vmatpush1.bf16.xpose.msra.mxu0 %v8152_v19  ;;  %3692 = vmatpush1.bf16.xpose.msra.mxu1 %v8154_v20  ;;  %v519_v19 = vld [vmem:[%s9467_s27 + $0x6b8] sm:$0xff]  ;;  %v8240_v20 = vcombine.low %v522_v7, %v526_v8  ;;  %v604_v7 = vld [vmem:[%s9467_s27 + $0x960] sm:$0xff]  ;;  %v601_v8 = vld [vmem:[%s9467_s27 + $0x948] sm:$0xff] }
 0x216   : > { %3650 = vmatprep.subr.bf16.mxu0 %v8273_v21  ;;  %3693 = vmatprep.subr.bf16.mxu1 %v8275_v23  ;;  %v8242_v21 = vcombine.low %v523_v9, %v527_v10  ;;  %v8233_v23 = vcombine.high %v514_v16, %v518_v17  ;;  %v605_v9 = vld [vmem:[%s9467_s27 + $0x968] sm:$0xff] }
 0x21c   : > { %v3496_v38 = vpop.f32.mrf.mxu0  ;;  %v3539_v41 = vpop.f32.mrf.mxu1 }
 0x21d   : > { %v3497_v39 = vadd.f32 %v3496_v38, %v9670_v1  ;;  %3651 = vmatpush2.bf16.xpose.msra.mxu0 %v8272_v29  ;;  %3694 = vmatpush2.bf16.xpose.msra.mxu1 %v8274_v31  ;;  %v8264_v1 = vcombine.low %v546_v24, %v550_v25  ;;  %v8235_v24 = vcombine.high %v515_v18, %v519_v19  ;;  %v506_v25 = vld [vmem:[%s9467_s27 + $0x650] sm:$0xff]  ;;  %v511_v29 = vld [vmem:[%s9467_s27 + $0x678] sm:$0xff] }
 0x21e   : > { %v9751_v42 = vpop.f32.mrf.mxu0  ;;  %3652 = vmatprep.subr.bf16.mxu0 %v8265_v32  ;;  %v9753_v44 = vpop.f32.mrf.mxu1  ;;  %3695 = vmatprep.subr.bf16.mxu1 %v8267_v37  ;;  %v8232_v31 = vcombine.low %v514_v16, %v518_v17  ;;  %v8234_v32 = vcombine.low %v515_v18, %v519_v19  ;;  %v8225_v37 = vcombine.high %v506_v25, %v510_v27  ;;  %v596_v16 = vld [vmem:[%s9467_s27 + $0x920] sm:$0xff]  ;;  %v593_v17 = vld [vmem:[%s9467_s27 + $0x908] sm:$0xff] }
 0x21f   : > { %v3540_v43 = vadd.f32 %v3539_v41, %v3497_v39  ;;  %v8227_v38 = vcombine.high %v507_v28, %v511_v29  ;;  %v498_v39 = vld [vmem:[%s9467_s27 + $0x610] sm:$0xff]  ;;  %v8224_v46 = vcombine.low %v506_v25, %v510_v27  ;;  %v597_v18 = vld [vmem:[%s9467_s27 + $0x928] sm:$0xff]  ;;  %v588_v25 = vld [vmem:[%s9467_s27 + $0x8e0] sm:$0xff] }
 0x220   : > { %v3500_v48 = vpop.f32.mrf.mxu0  ;;  %v3543_v53 = vpop.f32.mrf.mxu1  ;;  %v502_v41 = vld [vmem:[%s9467_s27 + $0x630] sm:$0xff]  ;;  %v585_v27 = vld [vmem:[%s9467_s27 + $0x8c8] sm:$0xff] }
 0x221   : > { %v3501_v52 = vadd.f32 %v3500_v48, %v9680_v11  ;;  %v4064_v58 = vmax.f32 %v3540_v43, 0.0  ;;  %v530_v11 = vld [vmem:[%s9467_s27 + $0x710] sm:$0xff]  ;;  %v499_v43 = vld [vmem:[%s9467_s27 + $0x618] sm:$0xff]  ;;  %v8226_v48 = vcombine.low %v507_v28, %v511_v29  ;;  %v8217_v49 = vcombine.high %v498_v39, %v502_v41  ;;  %v589_v28 = vld [vmem:[%s9467_s27 + $0x8e8] sm:$0xff] }
 0x222   : > { %v8249_v5 = vcombine.high %v530_v11, %v534_v61  ;;  %v8248_v12 = vcombine.low %v530_v11, %v534_v61  ;;  %v8219_v51 = vcombine.high %v499_v43, %v503_v45  ;;  %v612_v11 = vld [vmem:[%s9467_s27 + $0x9a0] sm:$0xff]  ;;  %v609_v61 = vld [vmem:[%s9467_s27 + $0x988] sm:$0xff] }
 0x223   : > { %v3544_v56 = vadd.f32 %v3543_v53, %v3501_v52  ;;  %v616_v52 = vld [vmem:[%s9467_s27 + $0x9c0] sm:$0xff]  ;;  %v617_v53 = vld [vmem:[%s9467_s27 + $0x9c8] sm:$0xff] }
 0x225   : > { %v4072_v59 = vmax.f32 %v3544_v56, 0.0  ;;  %3653 = vmatpush2.bf16.xpose.msra.mxu0 %v8264_v1  ;;  %3696 = vmatpush2.bf16.xpose.msra.mxu1 %v8266_v54  ;;  %v620_v1 = vld [vmem:[%s9467_s27 + $0x9e0] sm:$0xff]  ;;  %v621_v54 = vld [vmem:[%s9467_s27 + $0x9e8] sm:$0xff]  ;;  %v8218_v56 = vcombine.low %v499_v43, %v503_v45 }
 0x226   : > { %3654 = vmatprep.subr.bf16.mxu0 %v8257_v55  ;;  %3697 = vmatprep.subr.bf16.mxu1 %v8259_v57  ;;  %v8216_v55 = vcombine.low %v498_v39, %v502_v41  ;;  %v8333_v57 = vcombine.high %v616_v52, %v620_v1  ;;  %v8332_v63 = vcombine.low %v616_v52, %v620_v1  ;;  %v580_v39 = vld [vmem:[%s9467_s27 + $0x8a0] sm:$0xff]  ;;  %v577_v41 = vld [vmem:[%s9467_s27 + $0x888] sm:$0xff] }
 0x227   : > { %v9760_v60 = vpack.c.bf16 %v4072_v59, %v4064_v58  ;;  %v8335_v58 = vcombine.high %v617_v53, %v621_v54  ;;  %v608_v59 = vld [vmem:[%s9467_s27 + $0x980] sm:$0xff]  ;;  %v581_v43 = vld [vmem:[%s9467_s27 + $0x8a8] sm:$0xff] }
 0x228   : > { %v8324_v10 = vcombine.low %v608_v59, %v612_v11  ;;  %v572_v52 = vld [vmem:[%s9467_s27 + $0x860] sm:$0xff]  ;;  %v569_v1 = vld [vmem:[%s9467_s27 + $0x848] sm:$0xff] }
 0x22d   : > { %3655 = vmatpush2.bf16.xpose.msra.mxu0 %v8256_v0  ;;  %3698 = vmatpush2.bf16.xpose.msra.mxu1 %v8258_v4  ;;  %v8334_v0 = vcombine.low %v617_v53, %v621_v54  ;;  %v8325_v4 = vcombine.high %v608_v59, %v612_v11  ;;  %v573_v53 = vld [vmem:[%s9467_s27 + $0x868] sm:$0xff]  ;;  %v564_v59 = vld [vmem:[%s9467_s27 + $0x820] sm:$0xff] }
 0x22e   : > { %3656 = vmatprep.subr.bf16.mxu0 %v8249_v5  ;;  %3699 = vmatprep.subr.bf16.mxu1 %v8251_v6  ;;  %v8327_v5 = vcombine.high %v609_v61, %v613_v62  ;;  %v600_v6 = vld [vmem:[%s9467_s27 + $0x940] sm:$0xff]  ;;  %v561_v11 = vld [vmem:[%s9467_s27 + $0x808] sm:$0xff] }
 0x22f   : > { %v8316_v19 = vcombine.low %v600_v6, %v604_v7 }
 0x235   : > { %3657 = vmatpush2.bf16.xpose.msra.mxu0 %v8248_v12  ;;  %3700 = vmatpush2.bf16.xpose.msra.mxu1 %v8250_v13  ;;  %v8326_v12 = vcombine.low %v609_v61, %v613_v62  ;;  %v8317_v13 = vcombine.high %v600_v6, %v604_v7  ;;  %v565_v61 = vld [vmem:[%s9467_s27 + $0x828] sm:$0xff]  ;;  %v684_v6 = vld [vmem:[%s9467_s27 + $0xbe0] sm:$0xff] }
 0x236   : > { %3658 = vmatprep.subr.bf16.mxu0 %v8241_v14  ;;  %3701 = vmatprep.subr.bf16.mxu1 %v8243_v15  ;;  %v8319_v14 = vcombine.high %v601_v8, %v605_v9  ;;  %v592_v15 = vld [vmem:[%s9467_s27 + $0x900] sm:$0xff]  ;;  %v681_v7 = vld [vmem:[%s9467_s27 + $0xbc8] sm:$0xff] }
 0x237   : > { %v8308_v29 = vcombine.low %v592_v15, %v596_v16 }
 0x23d   : > { %3659 = vmatpush2.bf16.xpose.msra.mxu0 %v8240_v20  ;;  %3702 = vmatpush2.bf16.xpose.msra.mxu1 %v8242_v21  ;;  %v8318_v20 = vcombine.low %v601_v8, %v605_v9  ;;  %v8309_v21 = vcombine.high %v592_v15, %v596_v16  ;;  %v685_v8 = vld [vmem:[%s9467_s27 + $0xbe8] sm:$0xff]  ;;  %v676_v15 = vld [vmem:[%s9467_s27 + $0xba0] sm:$0xff] }
 0x23e   : > { %3660 = vmatprep.subr.bf16.mxu0 %v8233_v23  ;;  %3703 = vmatprep.subr.bf16.mxu1 %v8235_v24  ;;  %v8311_v23 = vcombine.high %v593_v17, %v597_v18  ;;  %v584_v24 = vld [vmem:[%s9467_s27 + $0x8c0] sm:$0xff]  ;;  %v673_v16 = vld [vmem:[%s9467_s27 + $0xb88] sm:$0xff] }
 0x23f   : > { %v8300_v45 = vcombine.low %v584_v24, %v588_v25 }
 0x245   : > { %3661 = vmatpush2.bf16.xpose.msra.mxu0 %v8232_v31  ;;  %3704 = vmatpush2.bf16.xpose.msra.mxu1 %v8234_v32  ;;  %v8310_v31 = vcombine.low %v593_v17, %v597_v18  ;;  %v8301_v32 = vcombine.high %v584_v24, %v588_v25  ;;  %v677_v17 = vld [vmem:[%s9467_s27 + $0xba8] sm:$0xff] }
 0x246   : > { %3662 = vmatprep.subr.bf16.mxu0 %v8225_v37  ;;  %3705 = vmatprep.subr.bf16.mxu1 %v8227_v38  ;;  %v8303_v37 = vcombine.high %v585_v27, %v589_v28  ;;  %v576_v38 = vld [vmem:[%s9467_s27 + $0x880] sm:$0xff]  ;;  %v8391_v24 = vcombine.high %v673_v16, %v677_v17 }
 0x247   : > { %v8292_v54 = vcombine.low %v576_v38, %v580_v39 }
 0x24d   : > { %3663 = vmatpush2.bf16.xpose.msra.mxu0 %v8224_v46  ;;  %3706 = vmatpush2.bf16.xpose.msra.mxu1 %v8226_v48  ;;  %v8302_v46 = vcombine.low %v585_v27, %v589_v28  ;;  %v8293_v48 = vcombine.high %v576_v38, %v580_v39  ;;  %v665_v39 = vld [vmem:[%s9467_s27 + $0xb48] sm:$0xff] }
 0x24e   : > { %3664 = vmatprep.subr.bf16.mxu0 %v8217_v49  ;;  %3707 = vmatprep.subr.bf16.mxu1 %v8219_v51  ;;  %v8295_v49 = vcombine.high %v577_v41, %v581_v43  ;;  %v568_v51 = vld [vmem:[%s9467_s27 + $0x840] sm:$0xff] }
 0x24f   : > { %v8284_v62 = vcombine.low %v568_v51, %v572_v52 }
 0x255   : > { %3665 = vmatpush2.bf16.xpose.msra.mxu0 %v8216_v55  ;;  %3708 = vmatpush2.bf16.xpose.msra.mxu1 %v8218_v56  ;;  %v8294_v55 = vcombine.low %v577_v41, %v581_v43  ;;  %v8285_v56 = vcombine.high %v568_v51, %v572_v52  ;;  %v669_v41 = vld [vmem:[%s9467_s27 + $0xb68] sm:$0xff]  ;;  %v656_v52 = vld [vmem:[%s9467_s27 + $0xb00] sm:$0xff] }
 0x256   : > { %3720 = vmatprep.subr.bf16.mxu0 %v8333_v57  ;;  %3763 = vmatprep.subr.bf16.mxu1 %v8335_v58  ;;  %v8287_v57 = vcombine.high %v569_v1, %v573_v53  ;;  %v560_v58 = vld [vmem:[%s9467_s27 + $0x800] sm:$0xff]  ;;  %v8383_v51 = vcombine.high %v665_v39, %v669_v41 }
 0x257   : > { %v8276_v9 = vcombine.low %v560_v58, %v564_v59 }
 0x25c   : > { %3667 = vmatmul.mubr.bf16.vlgmr.msra.gmra.mxu0 %v9628_v47  ;;  %3710 = vmatmul.mubr.bf16.vlgmr.msra.gmra.mxu1 %v9632_v50 }
 0x25d   : > { %3721 = vmatpush1.bf16.xpose.msra.mxu0 %v8332_v63  ;;  %3764 = vmatpush1.bf16.xpose.msra.mxu1 %v8334_v0  ;;  %v8286_v63 = vcombine.low %v569_v1, %v573_v53  ;;  %v8277_v0 = vcombine.high %v560_v58, %v564_v59  ;;  %v660_v1 = vld [vmem:[%s9467_s27 + $0xb20] sm:$0xff]  ;;  %v657_v53 = vld [vmem:[%s9467_s27 + $0xb08] sm:$0xff] }
 0x25e   : > { %3722 = vmatprep.subr.bf16.mxu0 %v8325_v4  ;;  %3765 = vmatprep.subr.bf16.mxu1 %v8327_v5  ;;  %v8279_v4 = vcombine.high %v561_v11, %v565_v61  ;;  %v680_v5 = vld [vmem:[%s9467_s27 + $0xbc0] sm:$0xff] }
 0x25f   : > { %3752 = vmatprep.mubr.bf16.mxu0 %v9494_v35  ;;  %3795 = vmatprep.mubr.bf16.mxu1 %v9498_v40  ;;  %v8396_v18 = vcombine.low %v680_v5, %v684_v6  ;;  %v648_v59 = vld [vmem:[%s9467_s27 + $0xac0] sm:$0xff] }
 0x265   : > { %3723 = vmatpush1.bf16.xpose.msra.mxu0 %v8324_v10  ;;  %3766 = vmatpush1.bf16.xpose.msra.mxu1 %v8326_v12  ;;  %v8278_v10 = vcombine.low %v561_v11, %v565_v61  ;;  %v8397_v12 = vcombine.high %v680_v5, %v684_v6  ;;  %v652_v11 = vld [vmem:[%s9467_s27 + $0xae0] sm:$0xff]  ;;  %v649_v61 = vld [vmem:[%s9467_s27 + $0xac8] sm:$0xff] }
 0x266   : > { %3724 = vmatprep.subr.bf16.mxu0 %v8317_v13  ;;  %3767 = vmatprep.subr.bf16.mxu1 %v8319_v14  ;;  %v8399_v13 = vcombine.high %v681_v7, %v685_v8  ;;  %v672_v14 = vld [vmem:[%s9467_s27 + $0xb80] sm:$0xff] }
 0x267   : > { %v640_v6 = vld [vmem:[%s9467_s27 + $0xa80] sm:$0xff] }
 0x26d   : > { %3725 = vmatpush1.bf16.xpose.msra.mxu0 %v8316_v19  ;;  %3768 = vmatpush1.bf16.xpose.msra.mxu1 %v8318_v20  ;;  %v9826_v19 = vpop.f32.mrf.mxu0  ;;  %v8398_v20 = vcombine.low %v681_v7, %v685_v8  ;;  %v644_v7 = vld [vmem:[%s9467_s27 + $0xaa0] sm:$0xff]  ;;  %v641_v8 = vld [vmem:[%s9467_s27 + $0xa88] sm:$0xff] }
 0x26e   : > { %3726 = vmatprep.subr.bf16.mxu0 %v8309_v21  ;;  %3769 = vmatprep.subr.bf16.mxu1 %v8311_v23  ;;  %v8389_v21 = vcombine.high %v672_v14, %v676_v15  ;;  %v9828_v23 = vpop.f32.mrf.mxu1 }
 0x275   : > { %3727 = vmatpush1.bf16.xpose.msra.mxu0 %v8308_v29  ;;  %3770 = vmatpush1.bf16.xpose.msra.mxu1 %v8310_v31 }
 0x276   : > { %3728 = vmatprep.subr.bf16.mxu0 %v8301_v32  ;;  %3771 = vmatprep.subr.bf16.mxu1 %v8303_v37  ;;  %v664_v32 = vld [vmem:[%s9467_s27 + $0xb40] sm:$0xff] }
 0x277   : > { %v668_v37 = vld [vmem:[%s9467_s27 + $0xb60] sm:$0xff] }
 0x27d   : > { %3729 = vmatpush1.bf16.xpose.msra.mxu0 %v8300_v45  ;;  %3772 = vmatpush1.bf16.xpose.msra.mxu1 %v8302_v46  ;;  %v8388_v45 = vcombine.low %v672_v14, %v676_v15  ;;  %v632_v15 = vld [vmem:[%s9467_s27 + $0xa40] sm:$0xff] }
 0x27e   : > { %3730 = vmatprep.subr.bf16.mxu0 %v8293_v48  ;;  %3773 = vmatprep.subr.bf16.mxu1 %v8295_v49  ;;  %v8390_v48 = vcombine.low %v673_v16, %v677_v17  ;;  %v8381_v49 = vcombine.high %v664_v32, %v668_v37  ;;  %v636_v16 = vld [vmem:[%s9467_s27 + $0xa60] sm:$0xff]  ;;  %v633_v17 = vld [vmem:[%s9467_s27 + $0xa48] sm:$0xff] }
 0x285   : > { %3731 = vmatpush1.bf16.xpose.msra.mxu0 %v8292_v54  ;;  %3774 = vmatpush1.bf16.xpose.msra.mxu1 %v8294_v55  ;;  %v661_v54 = vld [vmem:[%s9467_s27 + $0xb28] sm:$0xff]  ;;  %v8380_v55 = vcombine.low %v664_v32, %v668_v37  ;;  %v628_v32 = vld [vmem:[%s9467_s27 + $0xa20] sm:$0xff] }
 0x286   : > { %3732 = vmatprep.subr.bf16.mxu0 %v8285_v56  ;;  %3775 = vmatprep.subr.bf16.mxu1 %v8287_v57  ;;  %v8382_v56 = vcombine.low %v665_v39, %v669_v41  ;;  %v8373_v57 = vcombine.high %v656_v52, %v660_v1  ;;  %v8375_v58 = vcombine.high %v657_v53, %v661_v54  ;;  %v625_v37 = vld [vmem:[%s9467_s27 + $0xa08] sm:$0xff] }
 0x287   : > { %v8348_v39 = vcombine.low %v632_v15, %v636_v16 }
 0x28d   : > { %3733 = vmatpush1.bf16.xpose.msra.mxu0 %v8284_v62  ;;  %3776 = vmatpush1.bf16.xpose.msra.mxu1 %v8286_v63  ;;  %v653_v62 = vld [vmem:[%s9467_s27 + $0xae8] sm:$0xff]  ;;  %v8372_v63 = vcombine.low %v656_v52, %v660_v1  ;;  %v623_v52 = vld [vmem:[%s9467_s27 + $0x9f8] sm:$0xff] }
 0x28e   : > { %3734 = vmatprep.subr.bf16.mxu0 %v8277_v0  ;;  %3777 = vmatprep.subr.bf16.mxu1 %v8279_v4  ;;  %v8374_v0 = vcombine.low %v657_v53, %v661_v54  ;;  %v8365_v4 = vcombine.high %v648_v59, %v652_v11  ;;  %v8367_v5 = vcombine.high %v649_v61, %v653_v62 }
 0x295   : > { %3735 = vmatpush1.bf16.xpose.msra.mxu0 %v8276_v9  ;;  %3778 = vmatpush1.bf16.xpose.msra.mxu1 %v8278_v10  ;;  %v645_v9 = vld [vmem:[%s9467_s27 + $0xaa8] sm:$0xff]  ;;  %v8364_v10 = vcombine.low %v648_v59, %v652_v11  ;;  %v615_v59 = vld [vmem:[%s9467_s27 + $0x9b8] sm:$0xff] }
 0x296   : > { %3736 = vmatprep.subr.bf16.mxu0 %v8397_v12  ;;  %3779 = vmatprep.subr.bf16.mxu1 %v8399_v13  ;;  %v8366_v12 = vcombine.low %v649_v61, %v653_v62  ;;  %v8357_v13 = vcombine.high %v640_v6, %v644_v7  ;;  %v8359_v14 = vcombine.high %v641_v8, %v645_v9 }
 0x29c   : > { %v3582_v25 = vpop.f32.mrf.mxu0  ;;  %v3625_v27 = vpop.f32.mrf.mxu1 }
 0x29d   : > { %3737 = vmatpush2.bf16.xpose.msra.mxu0 %v8396_v18  ;;  %v9830_v28 = vadd.f32 %v3625_v27, %v3582_v25  ;;  %3780 = vmatpush2.bf16.xpose.msra.mxu1 %v8398_v20  ;;  %v637_v18 = vld [vmem:[%s9467_s27 + $0xa68] sm:$0xff]  ;;  %v8356_v20 = vcombine.low %v640_v6, %v644_v7  ;;  %v624_v27 = vld [vmem:[%s9467_s27 + $0xa00] sm:$0xff]  ;;  %v607_v6 = vld [vmem:[%s9467_s27 + $0x978] sm:$0xff] }
 0x29e   : > { %v9832_v29 = vpop.f32.mrf.mxu0  ;;  %3738 = vmatprep.subr.bf16.mxu0 %v8389_v21  ;;  %v9834_v31 = vpop.f32.mrf.mxu1  ;;  %3781 = vmatprep.subr.bf16.mxu1 %v8391_v24  ;;  %v8358_v21 = vcombine.low %v641_v8, %v645_v9  ;;  %v8349_v24 = vcombine.high %v632_v15, %v636_v16  ;;  %v8351_v25 = vcombine.high %v633_v17, %v637_v18  ;;  %v599_v15 = vld [vmem:[%s9467_s27 + $0x938] sm:$0xff] }
 0x29f   : > { %v8350_v41 = vcombine.low %v633_v17, %v637_v18  ;;  %v8340_v1 = vcombine.low %v624_v27, %v628_v32 }
 0x2a0   : > { %v3586_v38 = vpop.f32.mrf.mxu0  ;;  %v3629_v43 = vpop.f32.mrf.mxu1 }
 0x2a1   : > { %v9840_v46 = vadd.f32 %v3629_v43, %v3586_v38  ;;  %v629_v38 = vld [vmem:[%s9467_s27 + $0xa28] sm:$0xff]  ;;  %v8341_v43 = vcombine.high %v624_v27, %v628_v32  ;;  %v591_v27 = vld [vmem:[%s9467_s27 + $0x8f8] sm:$0xff] }
 0x2a2   : > { %v8342_v53 = vcombine.low %v625_v37, %v629_v38 }
 0x2a5   : > { %3739 = vmatpush2.bf16.xpose.msra.mxu0 %v8388_v45  ;;  %3782 = vmatpush2.bf16.xpose.msra.mxu1 %v8390_v48  ;;  %v8343_v45 = vcombine.high %v625_v37, %v629_v38  ;;  %v618_v48 = vld [vmem:[%s9467_s27 + $0x9d0] sm:$0xff] }
 0x2a6   : > { %3740 = vmatprep.subr.bf16.mxu0 %v8381_v49  ;;  %3783 = vmatprep.subr.bf16.mxu1 %v8383_v51  ;;  %v622_v49 = vld [vmem:[%s9467_s27 + $0x9f0] sm:$0xff]  ;;  %v619_v51 = vld [vmem:[%s9467_s27 + $0x9d8] sm:$0xff] }
 0x2a7   : > { %v8337_v54 = vcombine.high %v618_v48, %v622_v49  ;;  %v8336_v11 = vcombine.low %v618_v48, %v622_v49  ;;  %v8338_v61 = vcombine.low %v619_v51, %v623_v52  ;;  %v583_v48 = vld [vmem:[%s9467_s27 + $0x8b8] sm:$0xff] }
 0x2ad   : > { %3741 = vmatpush2.bf16.xpose.msra.mxu0 %v8380_v55  ;;  %3784 = vmatpush2.bf16.xpose.msra.mxu1 %v8382_v56  ;;  %v8339_v55 = vcombine.high %v619_v51, %v623_v52  ;;  %v610_v56 = vld [vmem:[%s9467_s27 + $0x990] sm:$0xff] }
 0x2ae   : > { %3742 = vmatprep.subr.bf16.mxu0 %v8373_v57  ;;  %3785 = vmatprep.subr.bf16.mxu1 %v8375_v58  ;;  %v614_v57 = vld [vmem:[%s9467_s27 + $0x9b0] sm:$0xff]  ;;  %v611_v58 = vld [vmem:[%s9467_s27 + $0x998] sm:$0xff] }
 0x2af   : > { %v8329_v62 = vcombine.high %v610_v56, %v614_v57  ;;  %v8328_v7 = vcombine.low %v610_v56, %v614_v57  ;;  %v8330_v8 = vcombine.low %v611_v58, %v615_v59  ;;  %v575_v56 = vld [vmem:[%s9467_s27 + $0x878] sm:$0xff] }
 0x2b5   : > { %3743 = vmatpush2.bf16.xpose.msra.mxu0 %v8372_v63  ;;  %3786 = vmatpush2.bf16.xpose.msra.mxu1 %v8374_v0  ;;  %v8331_v63 = vcombine.high %v611_v58, %v615_v59  ;;  %v602_v0 = vld [vmem:[%s9467_s27 + $0x950] sm:$0xff] }
 0x2b6   : > { %3744 = vmatprep.subr.bf16.mxu0 %v8365_v4  ;;  %3787 = vmatprep.subr.bf16.mxu1 %v8367_v5  ;;  %v606_v4 = vld [vmem:[%s9467_s27 + $0x970] sm:$0xff]  ;;  %v603_v5 = vld [vmem:[%s9467_s27 + $0x958] sm:$0xff] }
 0x2b7   : > { %v8321_v9 = vcombine.high %v602_v0, %v606_v4  ;;  %v8320_v16 = vcombine.low %v602_v0, %v606_v4  ;;  %v8322_v17 = vcombine.low %v603_v5, %v607_v6  ;;  %v567_v0 = vld [vmem:[%s9467_s27 + $0x838] sm:$0xff] }
 0x2bd   : > { %3745 = vmatpush2.bf16.xpose.msra.mxu0 %v8364_v10  ;;  %3788 = vmatpush2.bf16.xpose.msra.mxu1 %v8366_v12  ;;  %v8323_v10 = vcombine.high %v603_v5, %v607_v6  ;;  %v594_v12 = vld [vmem:[%s9467_s27 + $0x910] sm:$0xff] }
 0x2be   : > { %3746 = vmatprep.subr.bf16.mxu0 %v8357_v13  ;;  %3789 = vmatprep.subr.bf16.mxu1 %v8359_v14  ;;  %v598_v13 = vld [vmem:[%s9467_s27 + $0x930] sm:$0xff]  ;;  %v595_v14 = vld [vmem:[%s9467_s27 + $0x918] sm:$0xff] }
 0x2bf   : > { %v8313_v18 = vcombine.high %v594_v12, %v598_v13  ;;  %v8312_v32 = vcombine.low %v594_v12, %v598_v13  ;;  %v8314_v37 = vcombine.low %v595_v14, %v599_v15  ;;  %v687_v12 = vld [vmem:[%s9467_s27 + $0xbf8] sm:$0xff] }
 0x2c5   : > { %3747 = vmatpush2.bf16.xpose.msra.mxu0 %v8356_v20  ;;  %3790 = vmatpush2.bf16.xpose.msra.mxu1 %v8358_v21  ;;  %v8315_v20 = vcombine.high %v595_v14, %v599_v15  ;;  %v586_v21 = vld [vmem:[%s9467_s27 + $0x8d0] sm:$0xff] }
 0x2c6   : > { %3748 = vmatprep.subr.bf16.mxu0 %v8349_v24  ;;  %3791 = vmatprep.subr.bf16.mxu1 %v8351_v25  ;;  %v590_v24 = vld [vmem:[%s9467_s27 + $0x8f0] sm:$0xff]  ;;  %v587_v25 = vld [vmem:[%s9467_s27 + $0x8d8] sm:$0xff] }
 0x2c7   : > { %v8305_v38 = vcombine.high %v586_v21, %v590_v24  ;;  %v8304_v49 = vcombine.low %v586_v21, %v590_v24  ;;  %v8306_v51 = vcombine.low %v587_v25, %v591_v27  ;;  %v679_v21 = vld [vmem:[%s9467_s27 + $0xbb8] sm:$0xff] }
 0x2cd   : > { %3749 = vmatpush2.bf16.xpose.msra.mxu0 %v8348_v39  ;;  %3792 = vmatpush2.bf16.xpose.msra.mxu1 %v8350_v41  ;;  %v8307_v39 = vcombine.high %v587_v25, %v591_v27  ;;  %v578_v41 = vld [vmem:[%s9467_s27 + $0x890] sm:$0xff]  ;;  %v9906_v25 = vpop.f32.mrf.mxu0 }
 0x2ce   : > { %3750 = vmatprep.subr.bf16.mxu0 %v8341_v43  ;;  %3793 = vmatprep.subr.bf16.mxu1 %v8343_v45  ;;  %v582_v43 = vld [vmem:[%s9467_s27 + $0x8b0] sm:$0xff]  ;;  %v579_v45 = vld [vmem:[%s9467_s27 + $0x898] sm:$0xff] }
 0x2cf   : > { %v8297_v52 = vcombine.high %v578_v41, %v582_v43  ;;  %v8296_v57 = vcombine.low %v578_v41, %v582_v43  ;;  %v8298_v58 = vcombine.low %v579_v45, %v583_v48 }
 0x2d5   : > { %3751 = vmatpush2.bf16.xpose.msra.mxu0 %v8340_v1  ;;  %3794 = vmatpush2.bf16.xpose.msra.mxu1 %v8342_v53  ;;  %v8299_v1 = vcombine.high %v579_v45, %v583_v48  ;;  %v570_v53 = vld [vmem:[%s9467_s27 + $0x850] sm:$0xff] }
 0x2d6   : > { %3806 = vmatprep.subr.bf16.mxu0 %v8337_v54  ;;  %3849 = vmatprep.subr.bf16.mxu1 %v8339_v55  ;;  %v574_v54 = vld [vmem:[%s9467_s27 + $0x870] sm:$0xff]  ;;  %v571_v55 = vld [vmem:[%s9467_s27 + $0x858] sm:$0xff] }
 0x2d7   : > { %v8289_v59 = vcombine.high %v570_v53, %v574_v54  ;;  %v8288_v4 = vcombine.low %v570_v53, %v574_v54  ;;  %v8290_v5 = vcombine.low %v571_v55, %v575_v56  ;;  %v667_v53 = vld [vmem:[%s9467_s27 + $0xb58] sm:$0xff] }
 0x2d8   : > { %v671_v54 = vld [vmem:[%s9467_s27 + $0xb78] sm:$0xff] }
 0x2dc   : > { %3753 = vmatmul.mubr.bf16.vlgmr.msra.gmra.mxu0 %v9553_v22  ;;  %3796 = vmatmul.mubr.bf16.vlgmr.msra.gmra.mxu1 %v9556_v26 }
 0x2dd   : > { %3807 = vmatpush1.bf16.xpose.msra.mxu0 %v8336_v11  ;;  %3850 = vmatpush1.bf16.xpose.msra.mxu1 %v8338_v61  ;;  %v8291_v11 = vcombine.high %v571_v55, %v575_v56  ;;  %v562_v61 = vld [vmem:[%s9467_s27 + $0x810] sm:$0xff] }
 0x2de   : > { %3808 = vmatprep.subr.bf16.mxu0 %v8329_v62  ;;  %3851 = vmatprep.subr.bf16.mxu1 %v8331_v63  ;;  %v566_v62 = vld [vmem:[%s9467_s27 + $0x830] sm:$0xff]  ;;  %v563_v63 = vld [vmem:[%s9467_s27 + $0x818] sm:$0xff] }
 0x2df   : > { %3838 = vmatprep.mubr.bf16.mxu0 %v9558_v33  ;;  %3881 = vmatprep.mubr.bf16.mxu1 %v9561_v34  ;;  %v8281_v6 = vcombine.high %v562_v61, %v566_v62  ;;  %v8280_v13 = vcombine.low %v562_v61, %v566_v62  ;;  %v8282_v14 = vcombine.low %v563_v63, %v567_v0 }
 0x2e5   : > { %3809 = vmatpush1.bf16.xpose.msra.mxu0 %v8328_v7  ;;  %3852 = vmatpush1.bf16.xpose.msra.mxu1 %v8330_v8  ;;  %v8283_v7 = vcombine.high %v563_v63, %v567_v0  ;;  %v682_v8 = vld [vmem:[%s9467_s27 + $0xbd0] sm:$0xff] }
 0x2e6   : > { %3810 = vmatprep.subr.bf16.mxu0 %v8321_v9  ;;  %3853 = vmatprep.subr.bf16.mxu1 %v8323_v10  ;;  %v686_v9 = vld [vmem:[%s9467_s27 + $0xbf0] sm:$0xff]  ;;  %v683_v10 = vld [vmem:[%s9467_s27 + $0xbd8] sm:$0xff] }
 0x2e7   : > { %v8401_v15 = vcombine.high %v682_v8, %v686_v9  ;;  %v8400_v24 = vcombine.low %v682_v8, %v686_v9  ;;  %v8402_v27 = vcombine.low %v683_v10, %v687_v12  ;;  %v662_v0 = vld [vmem:[%s9467_s27 + $0xb30] sm:$0xff] }
 0x2ed   : > { %3811 = vmatpush1.bf16.xpose.msra.mxu0 %v8320_v16  ;;  %3854 = vmatpush1.bf16.xpose.msra.mxu1 %v8322_v17  ;;  %v8403_v16 = vcombine.high %v683_v10, %v687_v12  ;;  %v674_v17 = vld [vmem:[%s9467_s27 + $0xb90] sm:$0xff] }
 0x2ee   : > { %3812 = vmatprep.subr.bf16.mxu0 %v8313_v18  ;;  %3855 = vmatprep.subr.bf16.mxu1 %v8315_v20  ;;  %v678_v18 = vld [vmem:[%s9467_s27 + $0xbb0] sm:$0xff]  ;;  %v675_v20 = vld [vmem:[%s9467_s27 + $0xb98] sm:$0xff] }
 0x2ef   : > { %v650_v10 = vld [vmem:[%s9467_s27 + $0xad0] sm:$0xff] }
 0x2f0   : > { %v654_v12 = vld [vmem:[%s9467_s27 + $0xaf0] sm:$0xff] }
 0x2f5   : > { %3813 = vmatpush1.bf16.xpose.msra.mxu0 %v8312_v32  ;;  %3856 = vmatpush1.bf16.xpose.msra.mxu1 %v8314_v37  ;;  %v8393_v32 = vcombine.high %v674_v17, %v678_v18  ;;  %v9908_v37 = vpop.f32.mrf.mxu1 }
 0x2f6   : > { %3814 = vmatprep.subr.bf16.mxu0 %v8305_v38  ;;  %3857 = vmatprep.subr.bf16.mxu1 %v8307_v39  ;;  %v8395_v38 = vcombine.high %v675_v20, %v679_v21 }
 0x2fd   : > { %3815 = vmatpush1.bf16.xpose.msra.mxu0 %v8304_v49  ;;  %3858 = vmatpush1.bf16.xpose.msra.mxu1 %v8306_v51  ;;  %v666_v51 = vld [vmem:[%s9467_s27 + $0xb50] sm:$0xff] }
 0x2fe   : > { %3816 = vmatprep.subr.bf16.mxu0 %v8297_v52  ;;  %3859 = vmatprep.subr.bf16.mxu1 %v8299_v1  ;;  %v670_v52 = vld [vmem:[%s9467_s27 + $0xb70] sm:$0xff] }
 0x305   : > { %3817 = vmatpush1.bf16.xpose.msra.mxu0 %v8296_v57  ;;  %3860 = vmatpush1.bf16.xpose.msra.mxu1 %v8298_v58  ;;  %v8394_v57 = vcombine.low %v675_v20, %v679_v21  ;;  %v8385_v58 = vcombine.high %v666_v51, %v670_v52  ;;  %v642_v20 = vld [vmem:[%s9467_s27 + $0xa90] sm:$0xff] }
 0x306   : > { %3818 = vmatprep.subr.bf16.mxu0 %v8289_v59  ;;  %3861 = vmatprep.subr.bf16.mxu1 %v8291_v11  ;;  %v8387_v11 = vcombine.high %v667_v53, %v671_v54  ;;  %v646_v21 = vld [vmem:[%s9467_s27 + $0xab0] sm:$0xff] }
 0x30d   : > { %3819 = vmatpush1.bf16.xpose.msra.mxu0 %v8288_v4  ;;  %3862 = vmatpush1.bf16.xpose.msra.mxu1 %v8290_v5  ;;  %v659_v4 = vld [vmem:[%s9467_s27 + $0xb18] sm:$0xff] }
 0x30e   : > { %3820 = vmatprep.subr.bf16.mxu0 %v8281_v6  ;;  %3863 = vmatprep.subr.bf16.mxu1 %v8283_v7  ;;  %v663_v5 = vld [vmem:[%s9467_s27 + $0xb38] sm:$0xff]  ;;  %v8384_v6 = vcombine.low %v666_v51, %v670_v52  ;;  %v8386_v7 = vcombine.low %v667_v53, %v671_v54 }
 0x30f   : > { %v8379_v9 = vcombine.high %v659_v4, %v663_v5  ;;  %v635_v51 = vld [vmem:[%s9467_s27 + $0xa58] sm:$0xff] }
 0x310   : > { %v639_v52 = vld [vmem:[%s9467_s27 + $0xa78] sm:$0xff] }
 0x315   : > { %3821 = vmatpush1.bf16.xpose.msra.mxu0 %v8280_v13  ;;  %3864 = vmatpush1.bf16.xpose.msra.mxu1 %v8282_v14  ;;  %v651_v13 = vld [vmem:[%s9467_s27 + $0xad8] sm:$0xff] }
 0x316   : > { %3822 = vmatprep.subr.bf16.mxu0 %v8401_v15  ;;  %3865 = vmatprep.subr.bf16.mxu1 %v8403_v16  ;;  %v655_v14 = vld [vmem:[%s9467_s27 + $0xaf8] sm:$0xff]  ;;  %v8378_v16 = vcombine.low %v659_v4, %v663_v5  ;;  %v745_v4 = vld [vmem:[%s9467_s27 + $0xdc8] sm:$0xff] }
 0x317   : > { %v749_v5 = vld [vmem:[%s9467_s27 + $0xde8] sm:$0xff] }
 0x31c   : > { %v3668_v39 = vpop.f32.mrf.mxu0  ;;  %v3711_v43 = vpop.f32.mrf.mxu1 }
 0x31d   : > { %v3669_v41 = vadd.f32 %v3668_v39, %v9830_v28  ;;  %3823 = vmatpush2.bf16.xpose.msra.mxu0 %v8400_v24  ;;  %3866 = vmatpush2.bf16.xpose.msra.mxu1 %v8402_v27  ;;  %v8392_v28 = vcombine.low %v674_v17, %v678_v18  ;;  %v8369_v17 = vcombine.high %v650_v10, %v654_v12  ;;  %v643_v24 = vld [vmem:[%s9467_s27 + $0xa98] sm:$0xff] }
 0x31e   : > { %v9911_v45 = vpop.f32.mrf.mxu0  ;;  %3824 = vmatprep.subr.bf16.mxu0 %v8393_v32  ;;  %v9913_v49 = vpop.f32.mrf.mxu1  ;;  %3867 = vmatprep.subr.bf16.mxu1 %v8395_v38  ;;  %v8371_v18 = vcombine.high %v651_v13, %v655_v14  ;;  %v647_v27 = vld [vmem:[%s9467_s27 + $0xab8] sm:$0xff]  ;;  %v8368_v32 = vcombine.low %v650_v10, %v654_v12  ;;  %v8370_v38 = vcombine.low %v651_v13, %v655_v14  ;;  %v736_v10 = vld [vmem:[%s9467_s27 + $0xd80] sm:$0xff]  ;;  %v737_v13 = vld [vmem:[%s9467_s27 + $0xd88] sm:$0xff] }
 0x31f   : > { %v3712_v48 = vadd.f32 %v3711_v43, %v3669_v41  ;;  %v8361_v39 = vcombine.high %v642_v20, %v646_v21  ;;  %v8363_v41 = vcombine.high %v643_v24, %v647_v27  ;;  %v634_v43 = vld [vmem:[%s9467_s27 + $0xa50] sm:$0xff]  ;;  %v8362_v53 = vcombine.low %v643_v24, %v647_v27  ;;  %v740_v12 = vld [vmem:[%s9467_s27 + $0xda0] sm:$0xff]  ;;  %v741_v14 = vld [vmem:[%s9467_s27 + $0xda8] sm:$0xff] }
 0x320   : > { %v3672_v1 = vpop.f32.mrf.mxu0  ;;  %v3715_v56 = vpop.f32.mrf.mxu1  ;;  %v729_v24 = vld [vmem:[%s9467_s27 + $0xd48] sm:$0xff] }
 0x321   : > { %v3673_v55 = vadd.f32 %v3672_v1, %v9840_v46  ;;  %v4066_v61 = vmax.f32 %v3712_v48, 0.0  ;;  %v658_v46 = vld [vmem:[%s9467_s27 + $0xb10] sm:$0xff]  ;;  %v8360_v1 = vcombine.low %v642_v20, %v646_v21  ;;  %v728_v20 = vld [vmem:[%s9467_s27 + $0xd40] sm:$0xff]  ;;  %v733_v27 = vld [vmem:[%s9467_s27 + $0xd68] sm:$0xff] }
 0x322   : > { %v8377_v8 = vcombine.high %v658_v46, %v662_v0  ;;  %v8376_v15 = vcombine.low %v658_v46, %v662_v0  ;;  %v638_v48 = vld [vmem:[%s9467_s27 + $0xa70] sm:$0xff]  ;;  %v744_v46 = vld [vmem:[%s9467_s27 + $0xdc0] sm:$0xff] }
 0x323   : > { %v3716_v59 = vadd.f32 %v3715_v56, %v3673_v55  ;;  %v8353_v54 = vcombine.high %v634_v43, %v638_v48  ;;  %v8355_v55 = vcombine.high %v635_v51, %v639_v52  ;;  %v630_v56 = vld [vmem:[%s9467_s27 + $0xa30] sm:$0xff]  ;;  %v748_v0 = vld [vmem:[%s9467_s27 + $0xde0] sm:$0xff] }
 0x324   : > { %v732_v21 = vld [vmem:[%s9467_s27 + $0xd60] sm:$0xff] }
 0x325   : > { %v4074_v62 = vmax.f32 %v3716_v59, 0.0  ;;  %3825 = vmatpush2.bf16.xpose.msra.mxu0 %v8392_v28  ;;  %3868 = vmatpush2.bf16.xpose.msra.mxu1 %v8394_v57  ;;  %v626_v28 = vld [vmem:[%s9467_s27 + $0xa10] sm:$0xff]  ;;  %v627_v57 = vld [vmem:[%s9467_s27 + $0xa18] sm:$0xff]  ;;  %v8352_v59 = vcombine.low %v634_v43, %v638_v48  ;;  %v720_v43 = vld [vmem:[%s9467_s27 + $0xd00] sm:$0xff] }
 0x326   : > { %3826 = vmatprep.subr.bf16.mxu0 %v8385_v58  ;;  %3869 = vmatprep.subr.bf16.mxu1 %v8387_v11  ;;  %v631_v58 = vld [vmem:[%s9467_s27 + $0xa38] sm:$0xff]  ;;  %v8354_v11 = vcombine.low %v635_v51, %v639_v52  ;;  %v724_v48 = vld [vmem:[%s9467_s27 + $0xd20] sm:$0xff]  ;;  %v721_v51 = vld [vmem:[%s9467_s27 + $0xd08] sm:$0xff]  ;;  %v8444_v52 = vcombine.low %v728_v20, %v732_v21 }
 0x327   : > { %v9920_v63 = vpack.c.bf16 %v4074_v62, %v4066_v61  ;;  %v8345_v61 = vcombine.high %v626_v28, %v630_v56  ;;  %v8347_v62 = vcombine.high %v627_v57, %v631_v58 }
 0x32d   : > { %3827 = vmatpush2.bf16.xpose.msra.mxu0 %v8384_v6  ;;  %3870 = vmatpush2.bf16.xpose.msra.mxu1 %v8386_v7  ;;  %v8344_v6 = vcombine.low %v626_v28, %v630_v56  ;;  %v8346_v7 = vcombine.low %v627_v57, %v631_v58  ;;  %v713_v28 = vld [vmem:[%s9467_s27 + $0xcc8] sm:$0xff]  ;;  %v8436_v57 = vcombine.low %v720_v43, %v724_v48 }
 0x32e   : > { %3828 = vmatprep.subr.bf16.mxu0 %v8377_v8  ;;  %3871 = vmatprep.subr.bf16.mxu1 %v8379_v9  ;;  %v8461_v8 = vcombine.high %v744_v46, %v748_v0  ;;  %v8463_v9 = vcombine.high %v745_v4, %v749_v5  ;;  %v717_v56 = vld [vmem:[%s9467_s27 + $0xce8] sm:$0xff] }
 0x335   : > { %3829 = vmatpush2.bf16.xpose.msra.mxu0 %v8376_v15  ;;  %3872 = vmatpush2.bf16.xpose.msra.mxu1 %v8378_v16  ;;  %v8460_v15 = vcombine.low %v744_v46, %v748_v0  ;;  %v8462_v16 = vcombine.low %v745_v4, %v749_v5  ;;  %v705_v46 = vld [vmem:[%s9467_s27 + $0xc88] sm:$0xff]  ;;  %v8430_v5 = vcombine.low %v713_v28, %v717_v56 }
 0x336   : > { %3830 = vmatprep.subr.bf16.mxu0 %v8369_v17  ;;  %3873 = vmatprep.subr.bf16.mxu1 %v8371_v18  ;;  %v8453_v17 = vcombine.high %v736_v10, %v740_v12  ;;  %v8455_v18 = vcombine.high %v737_v13, %v741_v14  ;;  %v709_v0 = vld [vmem:[%s9467_s27 + $0xca8] sm:$0xff] }
 0x33d   : > { %3831 = vmatpush2.bf16.xpose.msra.mxu0 %v8368_v32  ;;  %3874 = vmatpush2.bf16.xpose.msra.mxu1 %v8370_v38  ;;  %v8452_v32 = vcombine.low %v736_v10, %v740_v12  ;;  %v8454_v38 = vcombine.low %v737_v13, %v741_v14  ;;  %v697_v10 = vld [vmem:[%s9467_s27 + $0xc48] sm:$0xff]  ;;  %v8422_v14 = vcombine.low %v705_v46, %v709_v0 }
 0x33e   : > { %3832 = vmatprep.subr.bf16.mxu0 %v8361_v39  ;;  %3875 = vmatprep.subr.bf16.mxu1 %v8363_v41  ;;  %v8445_v39 = vcombine.high %v728_v20, %v732_v21  ;;  %v8447_v41 = vcombine.high %v729_v24, %v733_v27  ;;  %v701_v12 = vld [vmem:[%s9467_s27 + $0xc68] sm:$0xff] }
 0x33f   : > { %v689_v20 = vld [vmem:[%s9467_s27 + $0xc08] sm:$0xff] }
 0x340   : > { %v693_v21 = vld [vmem:[%s9467_s27 + $0xc28] sm:$0xff] }
 0x345   : > { %3833 = vmatpush2.bf16.xpose.msra.mxu0 %v8360_v1  ;;  %3876 = vmatpush2.bf16.xpose.msra.mxu1 %v8362_v53  ;;  %v8446_v1 = vcombine.low %v729_v24, %v733_v27  ;;  %v8437_v53 = vcombine.high %v720_v43, %v724_v48  ;;  %v8414_v27 = vcombine.low %v697_v10, %v701_v12  ;;  %v809_v43 = vld [vmem:[%s9467_s27 + $0xfc8] sm:$0xff] }
 0x346   : > { %3834 = vmatprep.subr.bf16.mxu0 %v8353_v54  ;;  %3877 = vmatprep.subr.bf16.mxu1 %v8355_v55  ;;  %v712_v54 = vld [vmem:[%s9467_s27 + $0xcc0] sm:$0xff]  ;;  %v813_v48 = vld [vmem:[%s9467_s27 + $0xfe8] sm:$0xff] }
 0x347   : > { %v716_v55 = vld [vmem:[%s9467_s27 + $0xce0] sm:$0xff] }
 0x348   : > { %v8428_v4 = vcombine.low %v712_v54, %v716_v55 }
 0x34d   : > { %3835 = vmatpush2.bf16.xpose.msra.mxu0 %v8352_v59  ;;  %3878 = vmatpush2.bf16.xpose.msra.mxu1 %v8354_v11  ;;  %v8429_v59 = vcombine.high %v712_v54, %v716_v55  ;;  %v8431_v11 = vcombine.high %v713_v28, %v717_v56  ;;  %v801_v54 = vld [vmem:[%s9467_s27 + $0xf88] sm:$0xff]  ;;  %v9986_v56 = vpop.f32.mrf.mxu0 }
 0x34e   : > { %3836 = vmatprep.subr.bf16.mxu0 %v8345_v61  ;;  %3879 = vmatprep.subr.bf16.mxu1 %v8347_v62  ;;  %v704_v61 = vld [vmem:[%s9467_s27 + $0xc80] sm:$0xff]  ;;  %v805_v55 = vld [vmem:[%s9467_s27 + $0xfa8] sm:$0xff] }
 0x34f   : > { %v708_v62 = vld [vmem:[%s9467_s27 + $0xca0] sm:$0xff] }
 0x350   : > { %v8420_v13 = vcombine.low %v704_v61, %v708_v62 }
 0x355   : > { %3837 = vmatpush2.bf16.xpose.msra.mxu0 %v8344_v6  ;;  %3880 = vmatpush2.bf16.xpose.msra.mxu1 %v8346_v7  ;;  %v8421_v6 = vcombine.high %v704_v61, %v708_v62  ;;  %v8423_v7 = vcombine.high %v705_v46, %v709_v0 }
 0x356   : > { %3892 = vmatprep.subr.bf16.mxu0 %v8461_v8  ;;  %3935 = vmatprep.subr.bf16.mxu1 %v8463_v9  ;;  %v696_v8 = vld [vmem:[%s9467_s27 + $0xc40] sm:$0xff] }
 0x357   : > { %v700_v9 = vld [vmem:[%s9467_s27 + $0xc60] sm:$0xff] }
 0x358   : > { %v8412_v24 = vcombine.low %v696_v8, %v700_v9 }
 0x35c   : > { %3839 = vmatmul.mubr.bf16.vlgmr.msra.gmra.mxu0 %v9628_v47  ;;  %3882 = vmatmul.mubr.bf16.vlgmr.msra.gmra.mxu1 %v9632_v50 }
 0x35d   : > { %3893 = vmatpush1.bf16.xpose.msra.mxu0 %v8460_v15  ;;  %3936 = vmatpush1.bf16.xpose.msra.mxu1 %v8462_v16  ;;  %v8413_v15 = vcombine.high %v696_v8, %v700_v9  ;;  %v8415_v16 = vcombine.high %v697_v10, %v701_v12  ;;  %v793_v8 = vld [vmem:[%s9467_s27 + $0xf48] sm:$0xff] }
 0x35e   : > { %3894 = vmatprep.subr.bf16.mxu0 %v8453_v17  ;;  %3937 = vmatprep.subr.bf16.mxu1 %v8455_v18  ;;  %v688_v17 = vld [vmem:[%s9467_s27 + $0xc00] sm:$0xff]  ;;  %v797_v9 = vld [vmem:[%s9467_s27 + $0xf68] sm:$0xff] }
 0x35f   : > { %3924 = vmatprep.mubr.bf16.mxu0 %v9494_v35  ;;  %3967 = vmatprep.mubr.bf16.mxu1 %v9498_v40  ;;  %v725_v35 = vld [vmem:[%s9467_s27 + $0xd28] sm:$0xff]  ;;  %v692_v18 = vld [vmem:[%s9467_s27 + $0xc20] sm:$0xff] }
 0x360   : > { %v8439_v40 = vcombine.high %v721_v51, %v725_v35  ;;  %v8438_v58 = vcombine.low %v721_v51, %v725_v35  ;;  %v8404_v51 = vcombine.low %v688_v17, %v692_v18  ;;  %v8406_v35 = vcombine.low %v689_v20, %v693_v21 }
 0x365   : > { %3895 = vmatpush1.bf16.xpose.msra.mxu0 %v8452_v32  ;;  %3938 = vmatpush1.bf16.xpose.msra.mxu1 %v8454_v38  ;;  %v8405_v32 = vcombine.high %v688_v17, %v692_v18  ;;  %v8407_v38 = vcombine.high %v689_v20, %v693_v21  ;;  %v784_v17 = vld [vmem:[%s9467_s27 + $0xf00] sm:$0xff]  ;;  %v785_v20 = vld [vmem:[%s9467_s27 + $0xf08] sm:$0xff] }
 0x366   : > { %3896 = vmatprep.subr.bf16.mxu0 %v8445_v39  ;;  %3939 = vmatprep.subr.bf16.mxu1 %v8447_v41  ;;  %v808_v39 = vld [vmem:[%s9467_s27 + $0xfc0] sm:$0xff]  ;;  %v789_v21 = vld [vmem:[%s9467_s27 + $0xf28] sm:$0xff] }
 0x367   : > { %v812_v41 = vld [vmem:[%s9467_s27 + $0xfe0] sm:$0xff] }
 0x368   : > { %v8524_v28 = vcombine.low %v808_v39, %v812_v41  ;;  %v788_v18 = vld [vmem:[%s9467_s27 + $0xf20] sm:$0xff] }
 0x36d   : > { %3897 = vmatpush1.bf16.xpose.msra.mxu0 %v8444_v52  ;;  %3940 = vmatpush1.bf16.xpose.msra.mxu1 %v8446_v1  ;;  %v8525_v52 = vcombine.high %v808_v39, %v812_v41  ;;  %v8527_v1 = vcombine.high %v809_v43, %v813_v48  ;;  %v776_v39 = vld [vmem:[%s9467_s27 + $0xec0] sm:$0xff] }
 0x36e   : > { %3898 = vmatprep.subr.bf16.mxu0 %v8437_v53  ;;  %3941 = vmatprep.subr.bf16.mxu1 %v8439_v40  ;;  %v800_v53 = vld [vmem:[%s9467_s27 + $0xf80] sm:$0xff] }
 0x36f   : > { %v804_v40 = vld [vmem:[%s9467_s27 + $0xfa0] sm:$0xff] }
 0x370   : > { %v8516_v12 = vcombine.low %v800_v53, %v804_v40  ;;  %v780_v41 = vld [vmem:[%s9467_s27 + $0xee0] sm:$0xff] }
 0x375   : > { %3899 = vmatpush1.bf16.xpose.msra.mxu0 %v8436_v57  ;;  %3942 = vmatpush1.bf16.xpose.msra.mxu1 %v8438_v58  ;;  %v8526_v57 = vcombine.low %v809_v43, %v813_v48  ;;  %v8517_v58 = vcombine.high %v800_v53, %v804_v40  ;;  %v777_v43 = vld [vmem:[%s9467_s27 + $0xec8] sm:$0xff]  ;;  %v768_v53 = vld [vmem:[%s9467_s27 + $0xe80] sm:$0xff] }
 0x376   : > { %3900 = vmatprep.subr.bf16.mxu0 %v8429_v59  ;;  %3943 = vmatprep.subr.bf16.mxu1 %v8431_v11  ;;  %v9988_v59 = vpop.f32.mrf.mxu1  ;;  %v8519_v11 = vcombine.high %v801_v54, %v805_v55  ;;  %v781_v48 = vld [vmem:[%s9467_s27 + $0xee8] sm:$0xff]  ;;  %v772_v40 = vld [vmem:[%s9467_s27 + $0xea0] sm:$0xff] }
 0x37d   : > { %3901 = vmatpush1.bf16.xpose.msra.mxu0 %v8428_v4  ;;  %3944 = vmatpush1.bf16.xpose.msra.mxu1 %v8430_v5  ;;  %v792_v5 = vld [vmem:[%s9467_s27 + $0xf40] sm:$0xff] }
 0x37e   : > { %3902 = vmatprep.subr.bf16.mxu0 %v8421_v6  ;;  %3945 = vmatprep.subr.bf16.mxu1 %v8423_v7  ;;  %v796_v6 = vld [vmem:[%s9467_s27 + $0xf60] sm:$0xff] }
 0x385   : > { %3903 = vmatpush1.bf16.xpose.msra.mxu0 %v8420_v13  ;;  %3946 = vmatpush1.bf16.xpose.msra.mxu1 %v8422_v14  ;;  %v8518_v14 = vcombine.low %v801_v54, %v805_v55  ;;  %v769_v54 = vld [vmem:[%s9467_s27 + $0xe88] sm:$0xff] }
 0x386   : > { %3904 = vmatprep.subr.bf16.mxu0 %v8413_v15  ;;  %3947 = vmatprep.subr.bf16.mxu1 %v8415_v16  ;;  %v8509_v15 = vcombine.high %v792_v5, %v796_v6  ;;  %v8511_v16 = vcombine.high %v793_v8, %v797_v9  ;;  %v773_v55 = vld [vmem:[%s9467_s27 + $0xea8] sm:$0xff] }
 0x38d   : > { %3905 = vmatpush1.bf16.xpose.msra.mxu0 %v8412_v24  ;;  %3948 = vmatpush1.bf16.xpose.msra.mxu1 %v8414_v27  ;;  %v8508_v24 = vcombine.low %v792_v5, %v796_v6  ;;  %v8510_v27 = vcombine.low %v793_v8, %v797_v9  ;;  %v761_v5 = vld [vmem:[%s9467_s27 + $0xe48] sm:$0xff]  ;;  %v8486_v8 = vcombine.low %v769_v54, %v773_v55 }
 0x38e   : > { %3906 = vmatprep.subr.bf16.mxu0 %v8405_v32  ;;  %3949 = vmatprep.subr.bf16.mxu1 %v8407_v38  ;;  %v8501_v32 = vcombine.high %v784_v17, %v788_v18  ;;  %v8503_v38 = vcombine.high %v785_v20, %v789_v21  ;;  %v765_v6 = vld [vmem:[%s9467_s27 + $0xe68] sm:$0xff] }
 0x395   : > { %3907 = vmatpush1.bf16.xpose.msra.mxu0 %v8404_v51  ;;  %3950 = vmatpush1.bf16.xpose.msra.mxu1 %v8406_v35  ;;  %v8500_v51 = vcombine.low %v784_v17, %v788_v18  ;;  %v8502_v35 = vcombine.low %v785_v20, %v789_v21  ;;  %v8478_v18 = vcombine.low %v761_v5, %v765_v6 }
 0x396   : > { %3908 = vmatprep.subr.bf16.mxu0 %v8525_v52  ;;  %3951 = vmatprep.subr.bf16.mxu1 %v8527_v1  ;;  %v8493_v52 = vcombine.high %v776_v39, %v780_v41  ;;  %v8495_v1 = vcombine.high %v777_v43, %v781_v48 }
 0x39c   : > { %v3754_v61 = vpop.f32.mrf.mxu0  ;;  %v3797_v62 = vpop.f32.mrf.mxu1 }
 0x39d   : > { %3909 = vmatpush2.bf16.xpose.msra.mxu0 %v8524_v28  ;;  %v9990_v46 = vadd.f32 %v3797_v62, %v3754_v61  ;;  %3952 = vmatpush2.bf16.xpose.msra.mxu1 %v8526_v57  ;;  %v8492_v28 = vcombine.low %v776_v39, %v780_v41  ;;  %v8494_v57 = vcombine.low %v777_v43, %v781_v48  ;;  %v760_v61 = vld [vmem:[%s9467_s27 + $0xe40] sm:$0xff] }
 0x39e   : > { %v9992_v0 = vpop.f32.mrf.mxu0  ;;  %3910 = vmatprep.subr.bf16.mxu0 %v8517_v58  ;;  %v9994_v4 = vpop.f32.mrf.mxu1  ;;  %3953 = vmatprep.subr.bf16.mxu1 %v8519_v11  ;;  %v8485_v58 = vcombine.high %v768_v53, %v772_v40  ;;  %v8487_v11 = vcombine.high %v769_v54, %v773_v55  ;;  %v764_v62 = vld [vmem:[%s9467_s27 + $0xe60] sm:$0xff] }
 0x39f   : > { %v8477_v9 = vcombine.high %v760_v61, %v764_v62  ;;  %v8476_v17 = vcombine.low %v760_v61, %v764_v62 }
 0x3a0   : > { %v3758_v7 = vpop.f32.mrf.mxu0  ;;  %v3801_v10 = vpop.f32.mrf.mxu1 }
 0x3a1   : > { %v10000_v13 = vadd.f32 %v3801_v10, %v3758_v7  ;;  %v8484_v7 = vcombine.low %v768_v53, %v772_v40  ;;  %v8479_v10 = vcombine.high %v761_v5, %v765_v6  ;;  %v722_v5 = vld [vmem:[%s9467_s27 + $0xd10] sm:$0xff] }
 0x3a2   : > { %v726_v6 = vld [vmem:[%s9467_s27 + $0xd30] sm:$0xff] }
 0x3a5   : > { %3911 = vmatpush2.bf16.xpose.msra.mxu0 %v8516_v12  ;;  %3954 = vmatpush2.bf16.xpose.msra.mxu1 %v8518_v14  ;;  %v752_v12 = vld [vmem:[%s9467_s27 + $0xe00] sm:$0xff] }
 0x3a6   : > { %3912 = vmatprep.subr.bf16.mxu0 %v8509_v15  ;;  %3955 = vmatprep.subr.bf16.mxu1 %v8511_v16  ;;  %v756_v14 = vld [vmem:[%s9467_s27 + $0xe20] sm:$0xff]  ;;  %v753_v15 = vld [vmem:[%s9467_s27 + $0xe08] sm:$0xff] }
 0x3a7   : > { %v757_v16 = vld [vmem:[%s9467_s27 + $0xe28] sm:$0xff]  ;;  %v8469_v20 = vcombine.high %v752_v12, %v756_v14  ;;  %v8468_v39 = vcombine.low %v752_v12, %v756_v14  ;;  %v714_v12 = vld [vmem:[%s9467_s27 + $0xcd0] sm:$0xff] }
 0x3a8   : > { %v8471_v21 = vcombine.high %v753_v15, %v757_v16  ;;  %v8470_v41 = vcombine.low %v753_v15, %v757_v16  ;;  %v718_v14 = vld [vmem:[%s9467_s27 + $0xcf0] sm:$0xff]  ;;  %v715_v15 = vld [vmem:[%s9467_s27 + $0xcd8] sm:$0xff] }
 0x3a9   : > { %v719_v16 = vld [vmem:[%s9467_s27 + $0xcf8] sm:$0xff] }
 0x3ad   : > { %3913 = vmatpush2.bf16.xpose.msra.mxu0 %v8508_v24  ;;  %3956 = vmatpush2.bf16.xpose.msra.mxu1 %v8510_v27  ;;  %v746_v24 = vld [vmem:[%s9467_s27 + $0xdd0] sm:$0xff] }
 0x3ae   : > { %3914 = vmatprep.subr.bf16.mxu0 %v8501_v32  ;;  %3957 = vmatprep.subr.bf16.mxu1 %v8503_v38  ;;  %v750_v27 = vld [vmem:[%s9467_s27 + $0xdf0] sm:$0xff]  ;;  %v747_v32 = vld [vmem:[%s9467_s27 + $0xdd8] sm:$0xff] }
 0x3af   : > { %v751_v38 = vld [vmem:[%s9467_s27 + $0xdf8] sm:$0xff]  ;;  %v8465_v43 = vcombine.high %v746_v24, %v750_v27  ;;  %v8464_v53 = vcombine.low %v746_v24, %v750_v27  ;;  %v706_v24 = vld [vmem:[%s9467_s27 + $0xc90] sm:$0xff] }
 0x3b0   : > { %v8467_v48 = vcombine.high %v747_v32, %v751_v38  ;;  %v8466_v40 = vcombine.low %v747_v32, %v751_v38  ;;  %v710_v27 = vld [vmem:[%s9467_s27 + $0xcb0] sm:$0xff]  ;;  %v707_v32 = vld [vmem:[%s9467_s27 + $0xc98] sm:$0xff] }
 0x3b1   : > { %v711_v38 = vld [vmem:[%s9467_s27 + $0xcb8] sm:$0xff] }
 0x3b5   : > { %3915 = vmatpush2.bf16.xpose.msra.mxu0 %v8500_v51  ;;  %3958 = vmatpush2.bf16.xpose.msra.mxu1 %v8502_v35  ;;  %v738_v51 = vld [vmem:[%s9467_s27 + $0xd90] sm:$0xff] }
 0x3b6   : > { %3916 = vmatprep.subr.bf16.mxu0 %v8493_v52  ;;  %3959 = vmatprep.subr.bf16.mxu1 %v8495_v1  ;;  %v742_v35 = vld [vmem:[%s9467_s27 + $0xdb0] sm:$0xff]  ;;  %v739_v52 = vld [vmem:[%s9467_s27 + $0xd98] sm:$0xff] }
 0x3b7   : > { %v743_v1 = vld [vmem:[%s9467_s27 + $0xdb8] sm:$0xff]  ;;  %v8457_v54 = vcombine.high %v738_v51, %v742_v35  ;;  %v8456_v61 = vcombine.low %v738_v51, %v742_v35  ;;  %v698_v51 = vld [vmem:[%s9467_s27 + $0xc50] sm:$0xff] }
 0x3b8   : > { %v8459_v55 = vcombine.high %v739_v52, %v743_v1  ;;  %v702_v35 = vld [vmem:[%s9467_s27 + $0xc70] sm:$0xff] }
 0x3bd   : > { %3917 = vmatpush2.bf16.xpose.msra.mxu0 %v8492_v28  ;;  %3960 = vmatpush2.bf16.xpose.msra.mxu1 %v8494_v57  ;;  %v730_v28 = vld [vmem:[%s9467_s27 + $0xd50] sm:$0xff] }
 0x3be   : > { %3918 = vmatprep.subr.bf16.mxu0 %v8485_v58  ;;  %3961 = vmatprep.subr.bf16.mxu1 %v8487_v11  ;;  %v734_v57 = vld [vmem:[%s9467_s27 + $0xd70] sm:$0xff]  ;;  %v731_v58 = vld [vmem:[%s9467_s27 + $0xd58] sm:$0xff] }
 0x3bf   : > { %v735_v11 = vld [vmem:[%s9467_s27 + $0xd78] sm:$0xff]  ;;  %v8449_v62 = vcombine.high %v730_v28, %v734_v57 }
 0x3c5   : > { %3919 = vmatpush2.bf16.xpose.msra.mxu0 %v8484_v7  ;;  %3962 = vmatpush2.bf16.xpose.msra.mxu1 %v8486_v8  ;;  %v723_v7 = vld [vmem:[%s9467_s27 + $0xd18] sm:$0xff]  ;;  %v8448_v8 = vcombine.low %v730_v28, %v734_v57  ;;  %v690_v28 = vld [vmem:[%s9467_s27 + $0xc10] sm:$0xff] }
 0x3c6   : > { %3920 = vmatprep.subr.bf16.mxu0 %v8477_v9  ;;  %3963 = vmatprep.subr.bf16.mxu1 %v8479_v10  ;;  %v8450_v9 = vcombine.low %v731_v58, %v735_v11  ;;  %v8441_v10 = vcombine.high %v722_v5, %v726_v6  ;;  %v694_v57 = vld [vmem:[%s9467_s27 + $0xc30] sm:$0xff] }
 0x3cd   : > { %3921 = vmatpush2.bf16.xpose.msra.mxu0 %v8476_v17  ;;  %3964 = vmatpush2.bf16.xpose.msra.mxu1 %v8478_v18  ;;  %v8440_v17 = vcombine.low %v722_v5, %v726_v6  ;;  %v810_v5 = vld [vmem:[%s9467_s27 + $0xfd0] sm:$0xff] }
 0x3ce   : > { %3922 = vmatprep.subr.bf16.mxu0 %v8469_v20  ;;  %3965 = vmatprep.subr.bf16.mxu1 %v8471_v21  ;;  %v8433_v20 = vcombine.high %v714_v12, %v718_v14  ;;  %v8435_v21 = vcombine.high %v715_v15, %v719_v16  ;;  %v814_v6 = vld [vmem:[%s9467_s27 + $0xff0] sm:$0xff] }
 0x3d5   : > { %3923 = vmatpush2.bf16.xpose.msra.mxu0 %v8468_v39  ;;  %3966 = vmatpush2.bf16.xpose.msra.mxu1 %v8470_v41  ;;  %v8432_v39 = vcombine.low %v714_v12, %v718_v14  ;;  %v8434_v41 = vcombine.low %v715_v15, %v719_v16  ;;  %v802_v12 = vld [vmem:[%s9467_s27 + $0xf90] sm:$0xff]  ;;  %v803_v15 = vld [vmem:[%s9467_s27 + $0xf98] sm:$0xff] }
 0x3d6   : > { %3978 = vmatprep.subr.bf16.mxu0 %v8465_v43  ;;  %4021 = vmatprep.subr.bf16.mxu1 %v8467_v48  ;;  %v8425_v43 = vcombine.high %v706_v24, %v710_v27  ;;  %v8427_v48 = vcombine.high %v707_v32, %v711_v38  ;;  %v806_v14 = vld [vmem:[%s9467_s27 + $0xfb0] sm:$0xff]  ;;  %v807_v16 = vld [vmem:[%s9467_s27 + $0xfb8] sm:$0xff] }
 0x3dc   : > { %3925 = vmatmul.mubr.bf16.vlgmr.msra.gmra.mxu0 %v9553_v22  ;;  %3968 = vmatmul.mubr.bf16.vlgmr.msra.gmra.mxu1 %v9556_v26  ;;  %v8458_v22 = vcombine.low %v739_v52, %v743_v1  ;;  %v8451_v26 = vcombine.high %v731_v58, %v735_v11  ;;  %v699_v52 = vld [vmem:[%s9467_s27 + $0xc58] sm:$0xff] }
 0x3dd   : > { %3979 = vmatpush1.bf16.xpose.msra.mxu0 %v8464_v53  ;;  %4022 = vmatpush1.bf16.xpose.msra.mxu1 %v8466_v40  ;;  %v703_v1 = vld [vmem:[%s9467_s27 + $0xc78] sm:$0xff]  ;;  %v8424_v53 = vcombine.low %v706_v24, %v710_v27  ;;  %v8426_v40 = vcombine.low %v707_v32, %v711_v38  ;;  %v10068_v24 = vpop.f32.mrf.mxu1  ;;  %v8523_v27 = vcombine.high %v803_v15, %v807_v16 }
 0x3de   : > { %3980 = vmatprep.subr.bf16.mxu0 %v8457_v54  ;;  %4023 = vmatprep.subr.bf16.mxu1 %v8459_v55  ;;  %v8417_v54 = vcombine.high %v698_v51, %v702_v35  ;;  %v8419_v55 = vcombine.high %v699_v52, %v703_v1  ;;  %v691_v58 = vld [vmem:[%s9467_s27 + $0xc18] sm:$0xff] }
 0x3df   : > { %4010 = vmatprep.mubr.bf16.mxu0 %v9558_v33  ;;  %4053 = vmatprep.mubr.bf16.mxu1 %v9561_v34  ;;  %v727_v33 = vld [vmem:[%s9467_s27 + $0xd38] sm:$0xff] }
 0x3e0   : > { %v8443_v34 = vcombine.high %v723_v7, %v727_v33  ;;  %v8442_v18 = vcombine.low %v723_v7, %v727_v33  ;;  %v695_v11 = vld [vmem:[%s9467_s27 + $0xc38] sm:$0xff] }
 0x3e1   : > { %v811_v7 = vld [vmem:[%s9467_s27 + $0xfd8] sm:$0xff] }
 0x3e2   : > { %v815_v33 = vld [vmem:[%s9467_s27 + $0xff8] sm:$0xff] }
 0x3e5   : > { %3981 = vmatpush1.bf16.xpose.msra.mxu0 %v8456_v61  ;;  %4024 = vmatpush1.bf16.xpose.msra.mxu1 %v8458_v22  ;;  %v8416_v61 = vcombine.low %v698_v51, %v702_v35  ;;  %v8418_v22 = vcombine.low %v699_v52, %v703_v1  ;;  %v794_v51 = vld [vmem:[%s9467_s27 + $0xf50] sm:$0xff]  ;;  %v795_v1 = vld [vmem:[%s9467_s27 + $0xf58] sm:$0xff] }
 0x3e6   : > { %3982 = vmatprep.subr.bf16.mxu0 %v8449_v62  ;;  %4025 = vmatprep.subr.bf16.mxu1 %v8451_v26  ;;  %v8409_v62 = vcombine.high %v690_v28, %v694_v57  ;;  %v8411_v26 = vcombine.high %v691_v58, %v695_v11  ;;  %v798_v35 = vld [vmem:[%s9467_s27 + $0xf70] sm:$0xff] }
 0x3ed   : > { %3983 = vmatpush1.bf16.xpose.msra.mxu0 %v8448_v8  ;;  %4026 = vmatpush1.bf16.xpose.msra.mxu1 %v8450_v9  ;;  %v8408_v8 = vcombine.low %v690_v28, %v694_v57  ;;  %v8410_v9 = vcombine.low %v691_v58, %v695_v11  ;;  %v8513_v28 = vcombine.high %v794_v51, %v798_v35 }
 0x3ee   : > { %3984 = vmatprep.subr.bf16.mxu0 %v8441_v10  ;;  %4027 = vmatprep.subr.bf16.mxu1 %v8443_v34  ;;  %v8529_v10 = vcombine.high %v810_v5, %v814_v6  ;;  %v8531_v34 = vcombine.high %v811_v7, %v815_v33 }
 0x3f5   : > { %3985 = vmatpush1.bf16.xpose.msra.mxu0 %v8440_v17  ;;  %4028 = vmatpush1.bf16.xpose.msra.mxu1 %v8442_v18  ;;  %v8528_v17 = vcombine.low %v810_v5, %v814_v6  ;;  %v10066_v18 = vpop.f32.mrf.mxu0  ;;  %v791_v5 = vld [vmem:[%s9467_s27 + $0xf38] sm:$0xff]  ;;  %v8512_v6 = vcombine.low %v794_v51, %v798_v35  ;;  %v762_v35 = vld [vmem:[%s9467_s27 + $0xe50] sm:$0xff] }
 0x3f6   : > { %3986 = vmatprep.subr.bf16.mxu0 %v8433_v20  ;;  %4029 = vmatprep.subr.bf16.mxu1 %v8435_v21  ;;  %v8530_v20 = vcombine.low %v811_v7, %v815_v33  ;;  %v8521_v21 = vcombine.high %v802_v12, %v806_v14 }
 0x3fd   : > { %3987 = vmatpush1.bf16.xpose.msra.mxu0 %v8432_v39  ;;  %4030 = vmatpush1.bf16.xpose.msra.mxu1 %v8434_v41 }
 0x3fe   : > { %3988 = vmatprep.subr.bf16.mxu0 %v8425_v43  ;;  %4031 = vmatprep.subr.bf16.mxu1 %v8427_v48 }
 0x405   : > { %3989 = vmatpush1.bf16.xpose.msra.mxu0 %v8424_v53  ;;  %4032 = vmatpush1.bf16.xpose.msra.mxu1 %v8426_v40  ;;  %v799_v53 = vld [vmem:[%s9467_s27 + $0xf78] sm:$0xff] }
 0x406   : > { %3990 = vmatprep.subr.bf16.mxu0 %v8417_v54  ;;  %4033 = vmatprep.subr.bf16.mxu1 %v8419_v55  ;;  %v8522_v55 = vcombine.low %v803_v15, %v807_v16  ;;  %v8515_v58 = vcombine.high %v795_v1, %v799_v53  ;;  %v8514_v7 = vcombine.low %v795_v1, %v799_v53  ;;  %v763_v1 = vld [vmem:[%s9467_s27 + $0xe58] sm:$0xff] }
 0x407   : > { %v767_v53 = vld [vmem:[%s9467_s27 + $0xe78] sm:$0xff] }
 0x40d   : > { %3991 = vmatpush1.bf16.xpose.msra.mxu0 %v8416_v61  ;;  %4034 = vmatpush1.bf16.xpose.msra.mxu1 %v8418_v22 }
 0x40e   : > { %3992 = vmatprep.subr.bf16.mxu0 %v8409_v62  ;;  %4035 = vmatprep.subr.bf16.mxu1 %v8411_v26  ;;  %v790_v62 = vld [vmem:[%s9467_s27 + $0xf30] sm:$0xff]  ;;  %v787_v26 = vld [vmem:[%s9467_s27 + $0xf18] sm:$0xff] }
 0x40f   : > { %v8506_v15 = vcombine.low %v787_v26, %v791_v5 }
 0x415   : > { %3993 = vmatpush1.bf16.xpose.msra.mxu0 %v8408_v8  ;;  %4036 = vmatpush1.bf16.xpose.msra.mxu1 %v8410_v9  ;;  %v8507_v8 = vcombine.high %v787_v26, %v791_v5  ;;  %v778_v9 = vld [vmem:[%s9467_s27 + $0xed0] sm:$0xff]  ;;  %v3460_v5 = vadd.f32 %v9748_v36, %v9746_v30 }
 0x416   : > { %3994 = vmatprep.subr.bf16.mxu0 %v8529_v10  ;;  %4037 = vmatprep.subr.bf16.mxu1 %v8531_v34  ;;  %v782_v10 = vld [vmem:[%s9467_s27 + $0xef0] sm:$0xff]  ;;  %v779_v34 = vld [vmem:[%s9467_s27 + $0xed8] sm:$0xff] }
 0x417   : > { %v8497_v16 = vcombine.high %v778_v9, %v782_v10 }
 0x41c   : > { %v3840_v32 = vpop.f32.mrf.mxu0  ;;  %v3883_v39 = vpop.f32.mrf.mxu1 }
 0x41d   : > { %v3841_v38 = vadd.f32 %v3840_v32, %v9990_v46  ;;  %3995 = vmatpush2.bf16.xpose.msra.mxu0 %v8528_v17  ;;  %4038 = vmatpush2.bf16.xpose.msra.mxu1 %v8530_v20  ;;  %v8520_v46 = vcombine.low %v802_v12, %v806_v14  ;;  %v783_v12 = vld [vmem:[%s9467_s27 + $0xef8] sm:$0xff]  ;;  %v770_v20 = vld [vmem:[%s9467_s27 + $0xe90] sm:$0xff] }
 0x41e   : > { %v10071_v41 = vpop.f32.mrf.mxu0  ;;  %3996 = vmatprep.subr.bf16.mxu0 %v8521_v21  ;;  %v10073_v48 = vpop.f32.mrf.mxu1  ;;  %4039 = vmatprep.subr.bf16.mxu1 %v8523_v27  ;;  %v8499_v17 = vcombine.high %v779_v34, %v783_v12  ;;  %v774_v21 = vld [vmem:[%s9467_s27 + $0xeb0] sm:$0xff]  ;;  %v771_v27 = vld [vmem:[%s9467_s27 + $0xe98] sm:$0xff] }
 0x41f   : > { %v3884_v43 = vadd.f32 %v3883_v39, %v3841_v38  ;;  %v775_v32 = vld [vmem:[%s9467_s27 + $0xeb8] sm:$0xff]  ;;  %v8496_v38 = vcombine.low %v778_v9, %v782_v10  ;;  %v8498_v39 = vcombine.low %v779_v34, %v783_v12  ;;  %v3503_v9 = vadd.f32 %v9826_v19, %v3460_v5  ;;  %v4161_v10 = vld [vmem:[%s9473_s23 + $0x1c8] sm:$0xff] }
 0x420   : > { %v3844_v52 = vpop.f32.mrf.mxu0  ;;  %v3887_v54 = vpop.f32.mrf.mxu1  ;;  %v8491_v51 = vcombine.high %v771_v27, %v775_v32  ;;  %v4165_v34 = vld [vmem:[%s9473_s23 + $0x1e8] sm:$0xff]  ;;  %v3628_v12 = vadd.f32 %v9834_v31, %v9832_v29 }
 0x421   : > { %v3845_v40 = vadd.f32 %v3844_v52, %v10000_v13  ;;  %v4068_v11 = vmax.f32 %v3884_v43, 0.0  ;;  %v786_v13 = vld [vmem:[%s9467_s27 + $0xf10] sm:$0xff]  ;;  %v8489_v43 = vcombine.high %v770_v20, %v774_v21 }
 0x422   : > { %v8505_v33 = vcombine.high %v786_v13, %v790_v62  ;;  %v8504_v14 = vcombine.low %v786_v13, %v790_v62  ;;  %v766_v52 = vld [vmem:[%s9467_s27 + $0xe70] sm:$0xff]  ;;  %v8482_v13 = vcombine.low %v763_v1, %v767_v53 }
 0x423   : > { %v3888_v57 = vadd.f32 %v3887_v54, %v3845_v40  ;;  %v8488_v40 = vcombine.low %v770_v20, %v774_v21  ;;  %v8481_v54 = vcombine.high %v762_v35, %v766_v52  ;;  %v4157_v21 = vld [vmem:[%s9473_s23 + $0x1a8] sm:$0xff] }
 0x425   : > { %v4076_v61 = vmax.f32 %v3888_v57, 0.0  ;;  %3997 = vmatpush2.bf16.xpose.msra.mxu0 %v8520_v46  ;;  %4040 = vmatpush2.bf16.xpose.msra.mxu1 %v8522_v55  ;;  %v8490_v46 = vcombine.low %v771_v27, %v775_v32  ;;  %v8483_v55 = vcombine.high %v763_v1, %v767_v53  ;;  %v758_v57 = vld [vmem:[%s9467_s27 + $0xe30] sm:$0xff]  ;;  %v8590_v27 = vcombine.low %v4161_v10, %v4165_v34  ;;  %v4136_v53 = vld [vmem:[%s9473_s23 + $0x100] sm:$0xff] }
 0x426   : > { %3998 = vmatprep.subr.bf16.mxu0 %v8513_v28  ;;  %4041 = vmatprep.subr.bf16.mxu1 %v8515_v58  ;;  %v754_v28 = vld [vmem:[%s9467_s27 + $0xe10] sm:$0xff]  ;;  %v755_v58 = vld [vmem:[%s9467_s27 + $0xe18] sm:$0xff] }
 0x427   : > { %v10080_v22 = vpack.c.bf16 %v4076_v61, %v4068_v11  ;;  %v759_v11 = vld [vmem:[%s9467_s27 + $0xe38] sm:$0xff]  ;;  %v8480_v61 = vcombine.low %v762_v35, %v766_v52  ;;  %v8473_v62 = vcombine.high %v754_v28, %v758_v57  ;;  %v8472_v36 = vcombine.low %v754_v28, %v758_v57 }
 0x428   : > { %v8475_v26 = vcombine.high %v755_v58, %v759_v11 }
 0x42d   : > { %3999 = vmatpush2.bf16.xpose.msra.mxu0 %v8512_v6  ;;  %4042 = vmatpush2.bf16.xpose.msra.mxu1 %v8514_v7  ;;  %v3632_v6 = vadd.f32 %v9908_v37, %v9906_v25  ;;  %v4160_v7 = vld [vmem:[%s9473_s23 + $0x1c0] sm:$0xff]  ;;  %v8474_v37 = vcombine.low %v755_v58, %v759_v11 }
 0x42e   : > { %4000 = vmatprep.subr.bf16.mxu0 %v8505_v33  ;;  %4043 = vmatprep.subr.bf16.mxu1 %v8507_v8  ;;  %v4164_v33 = vld [vmem:[%s9473_s23 + $0x1e0] sm:$0xff]  ;;  %v3456_v8 = vadd.f32 %v9674_v3, %v9672_v2  ;;  %v8591_v2 = vcombine.high %v4161_v10, %v4165_v34  ;;  %v3546_v3 = vadd.f32 %v9828_v23, %v3503_v9  ;;  %v4121_v9 = vld [vmem:[%s9473_s23 + $0x88] sm:$0xff] }
 0x42f   : > { %v3675_v30 = vadd.f32 %v9986_v56, %v3632_v6  ;;  %v4152_v56 = vld [vmem:[%s9473_s23 + $0x180] sm:$0xff]  ;;  %v8588_v20 = vcombine.low %v4160_v7, %v4164_v33  ;;  %v4125_v10 = vld [vmem:[%s9473_s23 + $0xa8] sm:$0xff] }
 0x430   : > { %v3499_v25 = vadd.f32 %v9751_v42, %v3456_v8  ;;  %v4073_v42 = vmax.f32 %v3546_v3, 0.0  ;;  %v4128_v11 = vld [vmem:[%s9473_s23 + $0xc0] sm:$0xff]  ;;  %v8550_v3 = vcombine.low %v4121_v9, %v4125_v10 }
 0x431   : > { %v3718_v19 = vadd.f32 %v9988_v59, %v3675_v30  ;;  %v4124_v8 = vld [vmem:[%s9473_s23 + $0xa0] sm:$0xff] }
 0x432   : > { %v3542_v29 = vadd.f32 %v9753_v44, %v3499_v25  ;;  %v4112_v25 = vld [vmem:[%s9473_s23 + $0x40] sm:$0xff] }
 0x434   : > { %v4065_v23 = vmax.f32 %v3542_v29, 0.0 }
 0x435   : > { %4001 = vmatpush2.bf16.xpose.msra.mxu0 %v8504_v14  ;;  %4044 = vmatpush2.bf16.xpose.msra.mxu1 %v8506_v15  ;;  %v8589_v14 = vcombine.high %v4160_v7, %v4164_v33  ;;  %v3671_v15 = vadd.f32 %v9911_v45, %v3628_v12  ;;  %v4153_v45 = vld [vmem:[%s9473_s23 + $0x188] sm:$0xff]  ;;  %v4120_v33 = vld [vmem:[%s9473_s23 + $0x80] sm:$0xff] }
 0x436   : > { %4002 = vmatprep.subr.bf16.mxu0 %v8497_v16  ;;  %4045 = vmatprep.subr.bf16.mxu1 %v8499_v17  ;;  %v4156_v16 = vld [vmem:[%s9473_s23 + $0x1a0] sm:$0xff]  ;;  %v4075_v17 = vmax.f32 %v3718_v19, 0.0  ;;  %v10126_v32 = vpack.c.bf16 %v4073_v42, %v4065_v23  ;;  %v8582_v52 = vcombine.low %v4153_v45, %v4157_v21  ;;  %v8549_v30 = vcombine.high %v4120_v33, %v4124_v8 }
 0x437   : > { %v3714_v31 = vadd.f32 %v9913_v49, %v3671_v15  ;;  %v8581_v44 = vcombine.high %v4152_v56, %v4156_v16  ;;  %v8583_v49 = vcombine.high %v4153_v45, %v4157_v21  ;;  %v8580_v35 = vcombine.low %v4152_v56, %v4156_v16  ;;  %v4117_v15 = vld [vmem:[%s9473_s23 + $0x68] sm:$0xff]  ;;  %v4108_v42 = vld [vmem:[%s9473_s23 + $0x20] sm:$0xff] }
 0x438   : > { %v4105_v56 = vld [vmem:[%s9473_s23 + $0x8] sm:$0xff]  ;;  %v4224_v23 = vld [vmem:[%s9473_s23 + $0x3c0] sm:$0xff] }
 0x439   : > { %v4067_v59 = vmax.f32 %v3714_v31, 0.0  ;;  %v4104_v31 = vld [vmem:[%s9473_s23] sm:$0xff]  ;;  %v4109_v16 = vld [vmem:[%s9473_s23 + $0x28] sm:$0xff] }
 0x43a   : > { %v8533_v45 = vcombine.high %v4104_v31, %v4108_v42  ;;  %v8535_v21 = vcombine.high %v4105_v56, %v4109_v16 }
 0x43d   : > { %4003 = vmatpush2.bf16.xpose.msra.mxu0 %v8496_v38  ;;  %4046 = vmatpush2.bf16.xpose.msra.mxu1 %v8498_v39  ;;  %v10129_v38 = vpack.c.bf16 %v4075_v17, %v4067_v59  ;;  %v4144_v39 = vld [vmem:[%s9473_s23 + $0x140] sm:$0xff]  ;;  %v4225_v59 = vld [vmem:[%s9473_s23 + $0x3c8] sm:$0xff] }
 0x43e   : > { %4004 = vmatprep.subr.bf16.mxu0 %v8489_v43  ;;  %4047 = vmatprep.subr.bf16.mxu1 %v8491_v51  ;;  %v4148_v43 = vld [vmem:[%s9473_s23 + $0x160] sm:$0xff]  ;;  %v4149_v51 = vld [vmem:[%s9473_s23 + $0x168] sm:$0xff] }
 0x43f   : > { %v8573_v1 = vcombine.high %v4144_v39, %v4148_v43 }
 0x445   : > { %4005 = vmatpush2.bf16.xpose.msra.mxu0 %v8488_v40  ;;  %4048 = vmatpush2.bf16.xpose.msra.mxu1 %v8490_v46  ;;  %v4140_v40 = vld [vmem:[%s9473_s23 + $0x120] sm:$0xff]  ;;  %v4137_v46 = vld [vmem:[%s9473_s23 + $0x108] sm:$0xff] }
 0x446   : > { %4006 = vmatprep.subr.bf16.mxu0 %v8481_v54  ;;  %4049 = vmatprep.subr.bf16.mxu1 %v8483_v55  ;;  %v4141_v54 = vld [vmem:[%s9473_s23 + $0x128] sm:$0xff]  ;;  %v8572_v55 = vcombine.low %v4144_v39, %v4148_v43  ;;  %v8565_v57 = vcombine.high %v4136_v53, %v4140_v40  ;;  %v8534_v39 = vcombine.low %v4105_v56, %v4109_v16  ;;  %v4176_v16 = vld [vmem:[%s9473_s23 + $0x240] sm:$0xff] }
 0x447   : > { %v8567_v58 = vcombine.high %v4137_v46, %v4141_v54  ;;  %v8566_v5 = vcombine.low %v4137_v46, %v4141_v54  ;;  %v4208_v54 = vld [vmem:[%s9473_s23 + $0x340] sm:$0xff] }
 0x44d   : > { %4007 = vmatpush2.bf16.xpose.msra.mxu0 %v8480_v61  ;;  %4050 = vmatpush2.bf16.xpose.msra.mxu1 %v8482_v13  ;;  %v4132_v61 = vld [vmem:[%s9473_s23 + $0xe0] sm:$0xff]  ;;  %v4129_v13 = vld [vmem:[%s9473_s23 + $0xc8] sm:$0xff] }
 0x44e   : > { %4008 = vmatprep.subr.bf16.mxu0 %v8473_v62  ;;  %4051 = vmatprep.subr.bf16.mxu1 %v8475_v26  ;;  %v4133_v62 = vld [vmem:[%s9473_s23 + $0xe8] sm:$0xff]  ;;  %v8564_v26 = vcombine.low %v4136_v53, %v4140_v40  ;;  %v8557_v6 = vcombine.high %v4128_v11, %v4132_v61  ;;  %v8556_v34 = vcombine.low %v4128_v11, %v4132_v61 }
 0x44f   : > { %v8559_v7 = vcombine.high %v4129_v13, %v4133_v62  ;;  %v8558_v12 = vcombine.low %v4129_v13, %v4133_v62  ;;  %v4200_v62 = vld [vmem:[%s9473_s23 + $0x300] sm:$0xff] }
 0x455   : > { %4009 = vmatpush2.bf16.xpose.msra.mxu0 %v8472_v36  ;;  %4052 = vmatpush2.bf16.xpose.msra.mxu1 %v8474_v37  ;;  %v8551_v36 = vcombine.high %v4121_v9, %v4125_v10  ;;  %v4116_v37 = vld [vmem:[%s9473_s23 + $0x60] sm:$0xff] }
 0x456   : > { %7176 = vmatprep.subr.bf16.mxu0 %v8589_v14  ;;  %7219 = vmatprep.subr.bf16.mxu1 %v8591_v2  ;;  %v4113_v14 = vld [vmem:[%s9473_s23 + $0x48] sm:$0xff]  ;;  %v8548_v2 = vcombine.low %v4120_v33, %v4124_v8  ;;  %v8541_v19 = vcombine.high %v4112_v25, %v4116_v37  ;;  %v8540_v17 = vcombine.low %v4112_v25, %v4116_v37  ;;  %v4192_v10 = vld [vmem:[%s9473_s23 + $0x2c0] sm:$0xff] }
 0x457   : > { %v8543_v29 = vcombine.high %v4113_v14, %v4117_v15 }
 0x45c   : > { %4011 = vmatmul.mubr.bf16.vlgmr.msra.gmra.mxu0 %v9628_v47  ;;  %4054 = vmatmul.mubr.bf16.vlgmr.msra.gmra.mxu1 %v9632_v50  ;;  %v4145_v47 = vld [vmem:[%s9473_s23 + $0x148] sm:$0xff] }
 0x45d   : > { %7177 = vmatpush1.bf16.xpose.msra.mxu0 %v8588_v20  ;;  %7208 = vmatprep.mubr.bf16.mxu0 %v10126_v32  ;;  %v8575_v50 = vcombine.high %v4145_v47, %v4149_v51  ;;  %v8574_v28 = vcombine.low %v4145_v47, %v4149_v51  ;;  %v8542_v20 = vcombine.low %v4113_v14, %v4117_v15  ;;  %v4216_v51 = vld [vmem:[%s9473_s23 + $0x380] sm:$0xff] }
 0x45e   : > { %7220 = vmatpush1.bf16.xpose.msra.mxu1 %v8590_v27  ;;  %7251 = vmatprep.mubr.bf16.mxu1 %v10129_v38  ;;  %v4228_v27 = vld [vmem:[%s9473_s23 + $0x3e0] sm:$0xff] }
 0x45f   : > { %7178 = vmatprep.subr.bf16.mxu0 %v8581_v44  ;;  %7221 = vmatprep.subr.bf16.mxu1 %v8583_v49  ;;  %v4229_v44 = vld [vmem:[%s9473_s23 + $0x3e8] sm:$0xff]  ;;  %v8532_v49 = vcombine.low %v4104_v31, %v4108_v42  ;;  %v8653_v43 = vcombine.high %v4224_v23, %v4228_v27  ;;  %v4184_v15 = vld [vmem:[%s9473_s23 + $0x280] sm:$0xff] }
 0x460   : > { %v8655_v47 = vcombine.high %v4225_v59, %v4229_v44  ;;  %v8654_v53 = vcombine.low %v4225_v59, %v4229_v44  ;;  %v4168_v44 = vld [vmem:[%s9473_s23 + $0x200] sm:$0xff] }
 0x465   : > { %7179 = vmatpush1.bf16.xpose.msra.mxu0 %v8580_v35  ;;  %v4220_v35 = vld [vmem:[%s9473_s23 + $0x3a0] sm:$0xff] }
 0x466   : > { %7222 = vmatpush1.bf16.xpose.msra.mxu1 %v8582_v52  ;;  %7180 = vmatprep.subr.bf16.mxu0 %v8573_v1  ;;  %v4217_v52 = vld [vmem:[%s9473_s23 + $0x388] sm:$0xff]  ;;  %v8645_v40 = vcombine.high %v4216_v51, %v4220_v35 }
 0x467   : > { %7223 = vmatprep.subr.bf16.mxu1 %v8575_v50  ;;  %v4221_v1 = vld [vmem:[%s9473_s23 + $0x3a8] sm:$0xff]  ;;  %v8652_v50 = vcombine.low %v4224_v23, %v4228_v27 }
 0x468   : > { %v8647_v46 = vcombine.high %v4217_v52, %v4221_v1  ;;  %v8646_v11 = vcombine.low %v4217_v52, %v4221_v1  ;;  %v3846_v1 = vpop.f32.mrf.mxu0 }
 0x46d   : > { %7181 = vmatpush1.bf16.xpose.msra.mxu0 %v8572_v55  ;;  %v4212_v55 = vld [vmem:[%s9473_s23 + $0x360] sm:$0xff] }
 0x46e   : > { %7224 = vmatpush1.bf16.xpose.msra.mxu1 %v8574_v28  ;;  %7182 = vmatprep.subr.bf16.mxu0 %v8565_v57  ;;  %v4209_v28 = vld [vmem:[%s9473_s23 + $0x348] sm:$0xff]  ;;  %v8637_v61 = vcombine.high %v4208_v54, %v4212_v55 }
 0x46f   : > { %7225 = vmatprep.subr.bf16.mxu1 %v8567_v58  ;;  %v4213_v57 = vld [vmem:[%s9473_s23 + $0x368] sm:$0xff]  ;;  %v8644_v58 = vcombine.low %v4216_v51, %v4220_v35 }
 0x470   : > { %v8639_v13 = vcombine.high %v4209_v28, %v4213_v57  ;;  %v8638_v33 = vcombine.low %v4209_v28, %v4213_v57  ;;  %v4167_v28 = vld [vmem:[%s9473_s23 + $0x1f8] sm:$0xff] }
 0x475   : > { %7183 = vmatpush1.bf16.xpose.msra.mxu0 %v8564_v26  ;;  %v4204_v26 = vld [vmem:[%s9473_s23 + $0x320] sm:$0xff] }
 0x476   : > { %7226 = vmatpush1.bf16.xpose.msra.mxu1 %v8566_v5  ;;  %7184 = vmatprep.subr.bf16.mxu0 %v8557_v6  ;;  %v4201_v5 = vld [vmem:[%s9473_s23 + $0x308] sm:$0xff]  ;;  %v8629_v8 = vcombine.high %v4200_v62, %v4204_v26 }
 0x477   : > { %7227 = vmatprep.subr.bf16.mxu1 %v8559_v7  ;;  %v4205_v6 = vld [vmem:[%s9473_s23 + $0x328] sm:$0xff]  ;;  %v8636_v7 = vcombine.low %v4208_v54, %v4212_v55  ;;  %v4163_v55 = vld [vmem:[%s9473_s23 + $0x1d8] sm:$0xff] }
 0x478   : > { %v8631_v9 = vcombine.high %v4201_v5, %v4205_v6  ;;  %v8630_v25 = vcombine.low %v4201_v5, %v4205_v6  ;;  %v4155_v5 = vld [vmem:[%s9473_s23 + $0x198] sm:$0xff] }
 0x479   : > { %v4159_v6 = vld [vmem:[%s9473_s23 + $0x1b8] sm:$0xff] }
 0x47d   : > { %7185 = vmatpush1.bf16.xpose.msra.mxu0 %v8556_v34  ;;  %v4196_v34 = vld [vmem:[%s9473_s23 + $0x2e0] sm:$0xff] }
 0x47e   : > { %7228 = vmatpush1.bf16.xpose.msra.mxu1 %v8558_v12  ;;  %7186 = vmatprep.subr.bf16.mxu0 %v8549_v30  ;;  %v4193_v12 = vld [vmem:[%s9473_s23 + $0x2c8] sm:$0xff]  ;;  %v8621_v37 = vcombine.high %v4192_v10, %v4196_v34 }
 0x47f   : > { %7229 = vmatprep.subr.bf16.mxu1 %v8551_v36  ;;  %v4197_v30 = vld [vmem:[%s9473_s23 + $0x2e8] sm:$0xff]  ;;  %v8628_v36 = vcombine.low %v4200_v62, %v4204_v26  ;;  %v4158_v26 = vld [vmem:[%s9473_s23 + $0x1b0] sm:$0xff] }
 0x480   : > { %v8623_v14 = vcombine.high %v4193_v12, %v4197_v30  ;;  %v8622_v31 = vcombine.low %v4193_v12, %v4197_v30  ;;  %v4147_v12 = vld [vmem:[%s9473_s23 + $0x158] sm:$0xff] }
 0x481   : > { %v4151_v30 = vld [vmem:[%s9473_s23 + $0x178] sm:$0xff] }
 0x485   : > { %7187 = vmatpush1.bf16.xpose.msra.mxu0 %v8548_v2  ;;  %v4188_v2 = vld [vmem:[%s9473_s23 + $0x2a0] sm:$0xff] }
 0x486   : > { %7230 = vmatpush1.bf16.xpose.msra.mxu1 %v8550_v3  ;;  %7188 = vmatprep.subr.bf16.mxu0 %v8541_v19  ;;  %v4185_v3 = vld [vmem:[%s9473_s23 + $0x288] sm:$0xff]  ;;  %v8613_v42 = vcombine.high %v4184_v15, %v4188_v2 }
 0x487   : > { %7231 = vmatprep.subr.bf16.mxu1 %v8543_v29  ;;  %v4189_v19 = vld [vmem:[%s9473_s23 + $0x2a8] sm:$0xff]  ;;  %v8620_v29 = vcombine.low %v4192_v10, %v4196_v34  ;;  %v4150_v34 = vld [vmem:[%s9473_s23 + $0x170] sm:$0xff] }
 0x488   : > { %v8615_v56 = vcombine.high %v4185_v3, %v4189_v19  ;;  %v8614_v23 = vcombine.low %v4185_v3, %v4189_v19  ;;  %v4139_v3 = vld [vmem:[%s9473_s23 + $0x118] sm:$0xff] }
 0x489   : > { %v4143_v19 = vld [vmem:[%s9473_s23 + $0x138] sm:$0xff] }
 0x48d   : > { %7189 = vmatpush1.bf16.xpose.msra.mxu0 %v8540_v17  ;;  %v4180_v17 = vld [vmem:[%s9473_s23 + $0x260] sm:$0xff] }
 0x48e   : > { %7232 = vmatpush1.bf16.xpose.msra.mxu1 %v8542_v20  ;;  %7190 = vmatprep.subr.bf16.mxu0 %v8533_v45  ;;  %v4177_v20 = vld [vmem:[%s9473_s23 + $0x248] sm:$0xff]  ;;  %v8605_v27 = vcombine.high %v4176_v16, %v4180_v17 }
 0x48f   : > { %7233 = vmatprep.subr.bf16.mxu1 %v8535_v21  ;;  %v4181_v45 = vld [vmem:[%s9473_s23 + $0x268] sm:$0xff]  ;;  %v8612_v21 = vcombine.low %v4184_v15, %v4188_v2  ;;  %v4138_v15 = vld [vmem:[%s9473_s23 + $0x110] sm:$0xff] }
 0x490   : > { %v8607_v59 = vcombine.high %v4177_v20, %v4181_v45  ;;  %v8606_v51 = vcombine.low %v4177_v20, %v4181_v45  ;;  %v4142_v2 = vld [vmem:[%s9473_s23 + $0x130] sm:$0xff]  ;;  %v4131_v20 = vld [vmem:[%s9473_s23 + $0xd8] sm:$0xff] }
 0x491   : > { %v4135_v45 = vld [vmem:[%s9473_s23 + $0xf8] sm:$0xff] }
 0x495   : > { %7191 = vmatpush1.bf16.xpose.msra.mxu0 %v8532_v49  ;;  %v4172_v49 = vld [vmem:[%s9473_s23 + $0x220] sm:$0xff] }
 0x496   : > { %7234 = vmatpush1.bf16.xpose.msra.mxu1 %v8534_v39  ;;  %7192 = vmatprep.subr.bf16.mxu0 %v8653_v43  ;;  %v4169_v39 = vld [vmem:[%s9473_s23 + $0x208] sm:$0xff]  ;;  %v8597_v35 = vcombine.high %v4168_v44, %v4172_v49  ;;  %v8596_v57 = vcombine.low %v4168_v44, %v4172_v49  ;;  %v4122_v44 = vld [vmem:[%s9473_s23 + $0x90] sm:$0xff] }
 0x497   : > { %7235 = vmatprep.subr.bf16.mxu1 %v8655_v47  ;;  %v4173_v43 = vld [vmem:[%s9473_s23 + $0x228] sm:$0xff]  ;;  %v8604_v47 = vcombine.low %v4176_v16, %v4180_v17  ;;  %v4130_v16 = vld [vmem:[%s9473_s23 + $0xd0] sm:$0xff] }
 0x498   : > { %v8599_v52 = vcombine.high %v4169_v39, %v4173_v43  ;;  %v4134_v17 = vld [vmem:[%s9473_s23 + $0xf0] sm:$0xff] }
 0x499   : > { %v4126_v49 = vld [vmem:[%s9473_s23 + $0xb0] sm:$0xff] }
 0x49d   : > { %7193 = vmatpush2.bf16.xpose.msra.mxu0 %v8652_v50  ;;  %v3804_v50 = vadd.f32 %v10068_v24, %v10066_v18  ;;  %v3889_v24 = vpop.f32.mrf.mxu1 }
 0x49e   : > { %7236 = vmatpush2.bf16.xpose.msra.mxu1 %v8654_v53  ;;  %7194 = vmatprep.subr.bf16.mxu0 %v8645_v40  ;;  %v4162_v53 = vld [vmem:[%s9473_s23 + $0x1d0] sm:$0xff] }
 0x49f   : > { %7237 = vmatprep.subr.bf16.mxu1 %v8647_v46  ;;  %v4166_v40 = vld [vmem:[%s9473_s23 + $0x1f0] sm:$0xff]  ;;  %v3800_v46 = vadd.f32 %v9994_v4, %v9992_v0  ;;  %v3847_v54 = vadd.f32 %v3846_v1, %v3804_v50 }
 0x4a0   : > { %v8593_v18 = vcombine.high %v4162_v53, %v4166_v40  ;;  %v4154_v0 = vld [vmem:[%s9473_s23 + $0x190] sm:$0xff] }
 0x4a1   : > { %v4114_v1 = vld [vmem:[%s9473_s23 + $0x50] sm:$0xff] }
 0x4a2   : > { %v4118_v50 = vld [vmem:[%s9473_s23 + $0x70] sm:$0xff] }
 0x4a5   : > { %7195 = vmatpush2.bf16.xpose.msra.mxu0 %v8644_v58  ;;  %v3843_v58 = vadd.f32 %v10071_v41, %v3800_v46  ;;  %v8592_v41 = vcombine.low %v4162_v53, %v4166_v40  ;;  %v4115_v53 = vld [vmem:[%s9473_s23 + $0x58] sm:$0xff]  ;;  %v8552_v46 = vcombine.low %v4122_v44, %v4126_v49 }
 0x4a6   : > { %7238 = vmatpush2.bf16.xpose.msra.mxu1 %v8646_v11  ;;  %7196 = vmatprep.subr.bf16.mxu0 %v8637_v61  ;;  %v8598_v11 = vcombine.low %v4169_v39, %v4173_v43  ;;  %v8595_v61 = vcombine.high %v4163_v55, %v4167_v28  ;;  %v4123_v39 = vld [vmem:[%s9473_s23 + $0x98] sm:$0xff] }
 0x4a7   : > { %7239 = vmatprep.subr.bf16.mxu1 %v8639_v13  ;;  %v3890_v13 = vadd.f32 %v3889_v24, %v3847_v54  ;;  %v3886_v62 = vadd.f32 %v10073_v48, %v3843_v58  ;;  %v4146_v48 = vld [vmem:[%s9473_s23 + $0x150] sm:$0xff]  ;;  %v4127_v43 = vld [vmem:[%s9473_s23 + $0xb8] sm:$0xff]  ;;  %v8544_v24 = vcombine.low %v4114_v1, %v4118_v50 }
 0x4a8   : > { %v4119_v40 = vld [vmem:[%s9473_s23 + $0x78] sm:$0xff]  ;;  %v8554_v54 = vcombine.low %v4123_v39, %v4127_v43  ;;  %v4110_v58 = vld [vmem:[%s9473_s23 + $0x30] sm:$0xff] }
 0x4a9   : > { %v4077_v4 = vmax.f32 %v3890_v13, 0.0 }
 0x4ad   : > { %7197 = vmatpush2.bf16.xpose.msra.mxu0 %v8636_v7  ;;  %v4069_v7 = vmax.f32 %v3886_v62, 0.0 }
 0x4ae   : > { %7240 = vmatpush2.bf16.xpose.msra.mxu1 %v8638_v33  ;;  %7198 = vmatprep.subr.bf16.mxu0 %v8629_v8  ;;  %v8594_v33 = vcombine.low %v4163_v55, %v4167_v28  ;;  %v8585_v8 = vcombine.high %v4154_v0, %v4158_v26  ;;  %v8545_v55 = vcombine.high %v4114_v1, %v4118_v50 }
 0x4af   : > { %7241 = vmatprep.subr.bf16.mxu1 %v8631_v9  ;;  %v8587_v9 = vcombine.high %v4155_v5, %v4159_v6  ;;  %v10204_v10 = vpack.c.bf16 %v4077_v4, %v4069_v7  ;;  %v8547_v28 = vcombine.high %v4115_v53, %v4119_v40  ;;  %v10235_v4 = vpop.f32.mrf.mxu1 }
 0x4b5   : > { %7199 = vmatpush2.bf16.xpose.msra.mxu0 %v8628_v36  ;;  %v8584_v36 = vcombine.low %v4154_v0, %v4158_v26  ;;  %v10233_v0 = vpop.f32.mrf.mxu0  ;;  %v4226_v26 = vld [vmem:[%s9473_s23 + $0x3d0] sm:$0xff] }
 0x4b6   : > { %7242 = vmatpush2.bf16.xpose.msra.mxu1 %v8630_v25  ;;  %7200 = vmatprep.subr.bf16.mxu0 %v8621_v37  ;;  %v8586_v25 = vcombine.low %v4155_v5, %v4159_v6  ;;  %v8577_v37 = vcombine.high %v4146_v48, %v4150_v34  ;;  %v4230_v5 = vld [vmem:[%s9473_s23 + $0x3f0] sm:$0xff]  ;;  %v4227_v6 = vld [vmem:[%s9473_s23 + $0x3d8] sm:$0xff] }
 0x4b7   : > { %7243 = vmatprep.subr.bf16.mxu1 %v8623_v14  ;;  %v8579_v14 = vcombine.high %v4147_v12, %v4151_v30 }
 0x4bd   : > { %7201 = vmatpush2.bf16.xpose.msra.mxu0 %v8620_v29  ;;  %v8576_v29 = vcombine.low %v4146_v48, %v4150_v34  ;;  %v3971_v48 = vpop.f32.mrf.mxu1 }
 0x4be   : > { %7244 = vmatpush2.bf16.xpose.msra.mxu1 %v8622_v31  ;;  %7202 = vmatprep.subr.bf16.mxu0 %v8613_v42  ;;  %v8578_v31 = vcombine.low %v4147_v12, %v4151_v30  ;;  %v8569_v42 = vcombine.high %v4138_v15, %v4142_v2 }
 0x4bf   : > { %7245 = vmatprep.subr.bf16.mxu1 %v8615_v56  ;;  %v8571_v56 = vcombine.high %v4139_v3, %v4143_v19  ;;  %v10243_v30 = vpop.f32.mrf.mxu1 }
 0x4c5   : > { %7203 = vmatpush2.bf16.xpose.msra.mxu0 %v8612_v21  ;;  %v8568_v21 = vcombine.low %v4138_v15, %v4142_v2  ;;  %v8656_v15 = vcombine.low %v4226_v26, %v4230_v5 }
 0x4c6   : > { %7246 = vmatpush2.bf16.xpose.msra.mxu1 %v8614_v23  ;;  %7204 = vmatprep.subr.bf16.mxu0 %v8605_v27  ;;  %v8570_v23 = vcombine.low %v4139_v3, %v4143_v19  ;;  %v8561_v27 = vcombine.high %v4130_v16, %v4134_v17 }
 0x4c7   : > { %7247 = vmatprep.subr.bf16.mxu1 %v8607_v59  ;;  %v8563_v59 = vcombine.high %v4131_v20, %v4135_v45 }
 0x4cd   : > { %7205 = vmatpush2.bf16.xpose.msra.mxu0 %v8604_v47  ;;  %v8560_v47 = vcombine.low %v4130_v16, %v4134_v17 }
 0x4ce   : > { %7248 = vmatpush2.bf16.xpose.msra.mxu1 %v8606_v51  ;;  %7206 = vmatprep.subr.bf16.mxu0 %v8597_v35  ;;  %v8562_v51 = vcombine.low %v4131_v20, %v4135_v45  ;;  %v8553_v35 = vcombine.high %v4122_v44, %v4126_v49  ;;  %v4215_v44 = vld [vmem:[%s9473_s23 + $0x378] sm:$0xff] }
 0x4cf   : > { %7249 = vmatprep.subr.bf16.mxu1 %v8599_v52  ;;  %v8555_v52 = vcombine.high %v4123_v39, %v4127_v43 }
 0x4d5   : > { %7207 = vmatpush2.bf16.xpose.msra.mxu0 %v8596_v57  ;;  %v4106_v57 = vld [vmem:[%s9473_s23 + $0x10] sm:$0xff] }
 0x4d6   : > { %7250 = vmatpush2.bf16.xpose.msra.mxu1 %v8598_v11  ;;  %7262 = vmatprep.subr.bf16.mxu0 %v8593_v18  ;;  %v4107_v11 = vld [vmem:[%s9473_s23 + $0x18] sm:$0xff]  ;;  %v8537_v13 = vcombine.high %v4106_v57, %v4110_v58  ;;  %v8536_v7 = vcombine.low %v4106_v57, %v4110_v58 }
 0x4d7   : > { %7305 = vmatprep.subr.bf16.mxu1 %v8595_v61  ;;  %v4111_v18 = vld [vmem:[%s9473_s23 + $0x38] sm:$0xff]  ;;  %v8546_v61 = vcombine.low %v4115_v53, %v4119_v40 }
 0x4d8   : > { %v8539_v62 = vcombine.high %v4107_v11, %v4111_v18  ;;  %v4203_v57 = vld [vmem:[%s9473_s23 + $0x318] sm:$0xff] }
 0x4d9   : > { %v4207_v58 = vld [vmem:[%s9473_s23 + $0x338] sm:$0xff] }
 0x4dc   : > { %7209 = vmatmul.mubr.bf16.vlgmr.msra.gmra.mxu0 %v9760_v60 }
 0x4dd   : > { %7252 = vmatmul.mubr.bf16.vlgmr.msra.gmra.mxu1 %v9920_v63  ;;  %7263 = vmatpush1.bf16.xpose.msra.mxu0 %v8592_v41  ;;  %v4231_v41 = vld [vmem:[%s9473_s23 + $0x3f8] sm:$0xff] }
 0x4de   : > { %7294 = vmatprep.mubr.bf16.mxu0 %v10204_v10  ;;  %7306 = vmatpush1.bf16.xpose.msra.mxu1 %v8594_v33  ;;  %v3928_v33 = vpop.f32.mrf.mxu0  ;;  %v8659_v34 = vcombine.high %v4227_v6, %v4231_v41  ;;  %v8658_v3 = vcombine.low %v4227_v6, %v4231_v41  ;;  %v4199_v6 = vld [vmem:[%s9473_s23 + $0x2f8] sm:$0xff] }
 0x4df   : > { %7264 = vmatprep.subr.bf16.mxu0 %v8585_v8  ;;  %7307 = vmatprep.subr.bf16.mxu1 %v8587_v9  ;;  %v8538_v8 = vcombine.low %v4107_v11, %v4111_v18  ;;  %v8657_v9 = vcombine.high %v4226_v26, %v4230_v5  ;;  %v4198_v26 = vld [vmem:[%s9473_s23 + $0x2f0] sm:$0xff]  ;;  %v4195_v5 = vld [vmem:[%s9473_s23 + $0x2d8] sm:$0xff] }
 0x4e0   : > { %v10241_v12 = vpop.f32.mrf.mxu0 }
 0x4e2   : > { %v3932_v2 = vpop.f32.mrf.mxu0 }
 0x4e5   : > { %7265 = vmatpush1.bf16.xpose.msra.mxu0 %v8584_v36  ;;  %v4218_v36 = vld [vmem:[%s9473_s23 + $0x390] sm:$0xff] }
 0x4e6   : > { %7308 = vmatpush1.bf16.xpose.msra.mxu1 %v8586_v25  ;;  %7266 = vmatprep.subr.bf16.mxu0 %v8577_v37  ;;  %v4222_v25 = vld [vmem:[%s9473_s23 + $0x3b0] sm:$0xff]  ;;  %v4219_v37 = vld [vmem:[%s9473_s23 + $0x398] sm:$0xff] }
 0x4e7   : > { %7309 = vmatprep.subr.bf16.mxu1 %v8579_v14  ;;  %v4223_v14 = vld [vmem:[%s9473_s23 + $0x3b8] sm:$0xff]  ;;  %v8649_v19 = vcombine.high %v4218_v36, %v4222_v25  ;;  %v8648_v43 = vcombine.low %v4218_v36, %v4222_v25 }
 0x4e8   : > { %v4191_v36 = vld [vmem:[%s9473_s23 + $0x2b8] sm:$0xff] }
 0x4ed   : > { %7267 = vmatpush1.bf16.xpose.msra.mxu0 %v8576_v29  ;;  %v3975_v29 = vpop.f32.mrf.mxu1 }
 0x4ee   : > { %7310 = vmatpush1.bf16.xpose.msra.mxu1 %v8578_v31  ;;  %7268 = vmatprep.subr.bf16.mxu0 %v8569_v42  ;;  %v8651_v31 = vcombine.high %v4219_v37, %v4223_v14  ;;  %v3976_v49 = vadd.f32 %v3975_v29, %v3932_v2  ;;  %v4178_v2 = vld [vmem:[%s9473_s23 + $0x250] sm:$0xff]  ;;  %v4183_v29 = vld [vmem:[%s9473_s23 + $0x278] sm:$0xff] }
 0x4ef   : > { %7311 = vmatprep.subr.bf16.mxu1 %v8571_v56  ;;  %v3972_v56 = vadd.f32 %v3971_v48, %v3928_v33  ;;  %v4190_v48 = vld [vmem:[%s9473_s23 + $0x2b0] sm:$0xff] }
 0x4f5   : > { %7269 = vmatpush1.bf16.xpose.msra.mxu0 %v8568_v21  ;;  %v4210_v21 = vld [vmem:[%s9473_s23 + $0x350] sm:$0xff] }
 0x4f6   : > { %7312 = vmatpush1.bf16.xpose.msra.mxu1 %v8570_v23  ;;  %7270 = vmatprep.subr.bf16.mxu0 %v8561_v27  ;;  %v4214_v23 = vld [vmem:[%s9473_s23 + $0x370] sm:$0xff] }
 0x4f7   : > { %7313 = vmatprep.subr.bf16.mxu1 %v8563_v59  ;;  %v4211_v59 = vld [vmem:[%s9473_s23 + $0x358] sm:$0xff]  ;;  %v8640_v18 = vcombine.low %v4210_v21, %v4214_v23 }
 0x4f8   : > { %v8643_v50 = vcombine.high %v4211_v59, %v4215_v44 }
 0x4fd   : > { %7271 = vmatpush1.bf16.xpose.msra.mxu0 %v8560_v47 }
 0x4fe   : > { %7314 = vmatpush1.bf16.xpose.msra.mxu1 %v8562_v51  ;;  %7272 = vmatprep.subr.bf16.mxu0 %v8553_v35  ;;  %v8650_v51 = vcombine.low %v4219_v37, %v4223_v14  ;;  %v8641_v35 = vcombine.high %v4210_v21, %v4214_v23  ;;  %v8626_v37 = vcombine.low %v4195_v5, %v4199_v6  ;;  %v4174_v21 = vld [vmem:[%s9473_s23 + $0x230] sm:$0xff]  ;;  %v4171_v23 = vld [vmem:[%s9473_s23 + $0x218] sm:$0xff] }
 0x4ff   : > { %7315 = vmatprep.subr.bf16.mxu1 %v8555_v52 }
 0x505   : > { %7273 = vmatpush1.bf16.xpose.msra.mxu0 %v8552_v46 }
 0x506   : > { %7316 = vmatpush1.bf16.xpose.msra.mxu1 %v8554_v54  ;;  %7274 = vmatprep.subr.bf16.mxu0 %v8545_v55  ;;  %v4202_v55 = vld [vmem:[%s9473_s23 + $0x310] sm:$0xff] }
 0x507   : > { %7317 = vmatprep.subr.bf16.mxu1 %v8547_v28  ;;  %v4206_v28 = vld [vmem:[%s9473_s23 + $0x330] sm:$0xff] }
 0x508   : > { %v8632_v41 = vcombine.low %v4202_v55, %v4206_v28 }
 0x50d   : > { %7275 = vmatpush1.bf16.xpose.msra.mxu0 %v8544_v24  ;;  %v8642_v24 = vcombine.low %v4211_v59, %v4215_v44  ;;  %v4175_v59 = vld [vmem:[%s9473_s23 + $0x238] sm:$0xff] }
 0x50e   : > { %7318 = vmatpush1.bf16.xpose.msra.mxu1 %v8546_v61  ;;  %7276 = vmatprep.subr.bf16.mxu0 %v8537_v13  ;;  %v8633_v61 = vcombine.high %v4202_v55, %v4206_v28  ;;  %v8635_v13 = vcombine.high %v4203_v57, %v4207_v58 }
 0x50f   : > { %7319 = vmatprep.subr.bf16.mxu1 %v8539_v62  ;;  %v4194_v62 = vld [vmem:[%s9473_s23 + $0x2d0] sm:$0xff] }
 0x510   : > { %v8625_v33 = vcombine.high %v4194_v62, %v4198_v26  ;;  %v8624_v25 = vcombine.low %v4194_v62, %v4198_v26  ;;  %v4272_v62 = vld [vmem:[%s9473_s23 + $0x540] sm:$0xff] }
 0x511   : > { %v4276_v26 = vld [vmem:[%s9473_s23 + $0x560] sm:$0xff] }
 0x515   : > { %7277 = vmatpush1.bf16.xpose.msra.mxu0 %v8536_v7  ;;  %v8634_v7 = vcombine.low %v4203_v57, %v4207_v58  ;;  %v4284_v57 = vld [vmem:[%s9473_s23 + $0x5a0] sm:$0xff] }
 0x516   : > { %7320 = vmatpush1.bf16.xpose.msra.mxu1 %v8538_v8  ;;  %7278 = vmatprep.subr.bf16.mxu0 %v8657_v9  ;;  %v8627_v8 = vcombine.high %v4195_v5, %v4199_v6  ;;  %v4186_v9 = vld [vmem:[%s9473_s23 + $0x290] sm:$0xff]  ;;  %v4273_v5 = vld [vmem:[%s9473_s23 + $0x548] sm:$0xff] }
 0x517   : > { %7321 = vmatprep.subr.bf16.mxu1 %v8659_v34  ;;  %v4187_v34 = vld [vmem:[%s9473_s23 + $0x298] sm:$0xff]  ;;  %v8617_v14 = vcombine.high %v4186_v9, %v4190_v48  ;;  %v4277_v6 = vld [vmem:[%s9473_s23 + $0x568] sm:$0xff] }
 0x51c   : > { %v10249_v42 = vpop.f32.mrf.mxu0  ;;  %v10251_v16 = vpop.f32.mrf.mxu1 }
 0x51d   : > { %7279 = vmatpush2.bf16.xpose.msra.mxu0 %v8656_v15  ;;  %v8619_v15 = vcombine.high %v4187_v34, %v4191_v36 }
 0x51e   : > { %7322 = vmatpush2.bf16.xpose.msra.mxu1 %v8658_v3  ;;  %v4014_v17 = vpop.f32.mrf.mxu0  ;;  %7280 = vmatprep.subr.bf16.mxu0 %v8649_v19  ;;  %v4057_v45 = vpop.f32.mrf.mxu1  ;;  %v4182_v3 = vld [vmem:[%s9473_s23 + $0x270] sm:$0xff]  ;;  %v4179_v19 = vld [vmem:[%s9473_s23 + $0x258] sm:$0xff] }
 0x51f   : > { %v4015_v20 = vadd.f32 %v4014_v17, %v3972_v56  ;;  %7323 = vmatprep.subr.bf16.mxu1 %v8651_v31  ;;  %v8616_v31 = vcombine.low %v4186_v9, %v4190_v48  ;;  %v8618_v56 = vcombine.low %v4187_v34, %v4191_v36  ;;  %v8609_v17 = vcombine.high %v4178_v2, %v4182_v3  ;;  %v4264_v9 = vld [vmem:[%s9473_s23 + $0x500] sm:$0xff]  ;;  %v4265_v34 = vld [vmem:[%s9473_s23 + $0x508] sm:$0xff] }
 0x520   : > { %v10255_v27 = vpop.f32.mrf.mxu0  ;;  %v10259_v39 = vpop.f32.mrf.mxu1  ;;  %v8608_v44 = vcombine.low %v4178_v2, %v4182_v3  ;;  %v4268_v48 = vld [vmem:[%s9473_s23 + $0x520] sm:$0xff]  ;;  %v4269_v36 = vld [vmem:[%s9473_s23 + $0x528] sm:$0xff] }
 0x521   : > { %v4058_v52 = vadd.f32 %v4057_v45, %v4015_v20  ;;  %v8611_v20 = vcombine.high %v4179_v19, %v4183_v29  ;;  %v4170_v45 = vld [vmem:[%s9473_s23 + $0x210] sm:$0xff]  ;;  %v4256_v2 = vld [vmem:[%s9473_s23 + $0x4c0] sm:$0xff] }
 0x522   : > { %v4018_v47 = vpop.f32.mrf.mxu0  ;;  %v4061_v53 = vpop.f32.mrf.mxu1  ;;  %v4260_v3 = vld [vmem:[%s9473_s23 + $0x4e0] sm:$0xff] }
 0x523   : > { %v4019_v1 = vadd.f32 %v4018_v47, %v3976_v49  ;;  %v4071_v46 = vmax.f32 %v4058_v52, 0.0  ;;  %v8610_v49 = vcombine.low %v4179_v19, %v4183_v29  ;;  %v8603_v47 = vcombine.high %v4171_v23, %v4175_v59  ;;  %v4257_v19 = vld [vmem:[%s9473_s23 + $0x4c8] sm:$0xff] }
 0x524   : > { %v4261_v29 = vld [vmem:[%s9473_s23 + $0x4e8] sm:$0xff] }
 0x525   : > { %v4062_v40 = vadd.f32 %v4061_v53, %v4019_v1  ;;  %7281 = vmatpush2.bf16.xpose.msra.mxu0 %v8648_v43  ;;  %v8601_v43 = vcombine.high %v4170_v45, %v4174_v21  ;;  %v4288_v1 = vld [vmem:[%s9473_s23 + $0x5c0] sm:$0xff]  ;;  %v4289_v53 = vld [vmem:[%s9473_s23 + $0x5c8] sm:$0xff] }
 0x526   : > { %7324 = vmatpush2.bf16.xpose.msra.mxu1 %v8650_v51  ;;  %7282 = vmatprep.subr.bf16.mxu0 %v8641_v35  ;;  %v3974_v51 = vadd.f32 %v10243_v30, %v10241_v12  ;;  %v3970_v35 = vadd.f32 %v10235_v4, %v10233_v0  ;;  %v8602_v12 = vcombine.low %v4171_v23, %v4175_v59  ;;  %v4249_v23 = vld [vmem:[%s9473_s23 + $0x488] sm:$0xff] }
 0x527   : > { %v4079_v54 = vmax.f32 %v4062_v40, 0.0  ;;  %7325 = vmatprep.subr.bf16.mxu1 %v8643_v50  ;;  %v4292_v50 = vld [vmem:[%s9473_s23 + $0x5e0] sm:$0xff]  ;;  %v4293_v40 = vld [vmem:[%s9473_s23 + $0x5e8] sm:$0xff] }
 0x528   : > { %v4017_v52 = vadd.f32 %v10255_v27, %v3974_v51  ;;  %v8717_v30 = vcombine.high %v4288_v1, %v4292_v50  ;;  %v8719_v28 = vcombine.high %v4289_v53, %v4293_v40  ;;  %v4280_v27 = vld [vmem:[%s9473_s23 + $0x580] sm:$0xff]  ;;  %v4253_v59 = vld [vmem:[%s9473_s23 + $0x4a8] sm:$0xff] }
 0x529   : > { %v10265_v11 = vpack.c.bf16 %v4079_v54, %v4071_v46  ;;  %v4013_v46 = vadd.f32 %v10249_v42, %v3970_v35  ;;  %v8600_v54 = vcombine.low %v4170_v45, %v4174_v21  ;;  %v8716_v42 = vcombine.low %v4288_v1, %v4292_v50  ;;  %v4248_v45 = vld [vmem:[%s9473_s23 + $0x480] sm:$0xff]  ;;  %v4245_v1 = vld [vmem:[%s9473_s23 + $0x468] sm:$0xff] }
 0x52a   : > { %v4060_v55 = vadd.f32 %v10259_v39, %v4017_v52  ;;  %v4252_v21 = vld [vmem:[%s9473_s23 + $0x4a0] sm:$0xff]  ;;  %v4241_v52 = vld [vmem:[%s9473_s23 + $0x448] sm:$0xff] }
 0x52b   : > { %7337 = vmatprep.mubr.bf16.mxu1 %v10265_v11  ;;  %v4056_v0 = vadd.f32 %v10251_v16, %v4013_v46  ;;  %v4240_v51 = vld [vmem:[%s9473_s23 + $0x440] sm:$0xff]  ;;  %v8676_v50 = vcombine.low %v4248_v45, %v4252_v21  ;;  %v8671_v46 = vcombine.high %v4241_v52, %v4245_v1 }
 0x52c   : > { %v4078_v4 = vmax.f32 %v4060_v55, 0.0  ;;  %v4244_v35 = vld [vmem:[%s9473_s23 + $0x460] sm:$0xff]  ;;  %v4237_v55 = vld [vmem:[%s9473_s23 + $0x428] sm:$0xff] }
 0x52d   : > { %7283 = vmatpush2.bf16.xpose.msra.mxu0 %v8640_v18  ;;  %v4070_v58 = vmax.f32 %v4056_v0, 0.0  ;;  %v4281_v18 = vld [vmem:[%s9473_s23 + $0x588] sm:$0xff]  ;;  %v8670_v0 = vcombine.low %v4241_v52, %v4245_v1 }
 0x52e   : > { %7326 = vmatpush2.bf16.xpose.msra.mxu1 %v8642_v24  ;;  %7284 = vmatprep.subr.bf16.mxu0 %v8633_v61  ;;  %v4285_v24 = vld [vmem:[%s9473_s23 + $0x5a8] sm:$0xff]  ;;  %v8718_v61 = vcombine.low %v4289_v53, %v4293_v40  ;;  %v8678_v53 = vcombine.low %v4249_v23, %v4253_v59  ;;  %v8669_v40 = vcombine.high %v4240_v51, %v4244_v35 }
 0x52f   : > { %7327 = vmatprep.subr.bf16.mxu1 %v8635_v13  ;;  %v10300_v39 = vpack.c.bf16 %v4078_v4, %v4070_v58  ;;  %v8709_v13 = vcombine.high %v4280_v27, %v4284_v57  ;;  %v8711_v16 = vcombine.high %v4281_v18, %v4285_v24  ;;  %v4356_v58 = vld [vmem:[%s9473_s23 + $0x7e0] sm:$0xff]  ;;  %v4313_v52 = vld [vmem:[%s9473_s23 + $0x688] sm:$0xff] }
 0x530   : > { %v4317_v1 = vld [vmem:[%s9473_s23 + $0x6a8] sm:$0xff] }
 0x535   : > { %7285 = vmatpush2.bf16.xpose.msra.mxu0 %v8632_v41  ;;  %v8708_v41 = vcombine.low %v4280_v27, %v4284_v57  ;;  %v4352_v57 = vld [vmem:[%s9473_s23 + $0x7c0] sm:$0xff] }
 0x536   : > { %7328 = vmatpush2.bf16.xpose.msra.mxu1 %v8634_v7  ;;  %7286 = vmatprep.subr.bf16.mxu0 %v8625_v33  ;;  %v8710_v7 = vcombine.low %v4281_v18, %v4285_v24  ;;  %v8701_v33 = vcombine.high %v4272_v62, %v4276_v26  ;;  %v4357_v18 = vld [vmem:[%s9473_s23 + $0x7e8] sm:$0xff] }
 0x537   : > { %7329 = vmatprep.subr.bf16.mxu1 %v8627_v8  ;;  %v8703_v8 = vcombine.high %v4273_v5, %v4277_v6 }
 0x53d   : > { %7287 = vmatpush2.bf16.xpose.msra.mxu0 %v8624_v25  ;;  %v8700_v25 = vcombine.low %v4272_v62, %v4276_v26  ;;  %v4344_v62 = vld [vmem:[%s9473_s23 + $0x780] sm:$0xff] }
 0x53e   : > { %7330 = vmatpush2.bf16.xpose.msra.mxu1 %v8626_v37  ;;  %7288 = vmatprep.subr.bf16.mxu0 %v8617_v14  ;;  %v8702_v37 = vcombine.low %v4273_v5, %v4277_v6  ;;  %v8693_v14 = vcombine.high %v4264_v9, %v4268_v48  ;;  %v4348_v26 = vld [vmem:[%s9473_s23 + $0x7a0] sm:$0xff]  ;;  %v4345_v5 = vld [vmem:[%s9473_s23 + $0x788] sm:$0xff] }
 0x53f   : > { %7331 = vmatprep.subr.bf16.mxu1 %v8619_v15  ;;  %v8695_v15 = vcombine.high %v4265_v34, %v4269_v36  ;;  %v4349_v6 = vld [vmem:[%s9473_s23 + $0x7a8] sm:$0xff] }
 0x545   : > { %7289 = vmatpush2.bf16.xpose.msra.mxu0 %v8616_v31  ;;  %v8692_v31 = vcombine.low %v4264_v9, %v4268_v48  ;;  %v4336_v9 = vld [vmem:[%s9473_s23 + $0x740] sm:$0xff] }
 0x546   : > { %7332 = vmatpush2.bf16.xpose.msra.mxu1 %v8618_v56  ;;  %7290 = vmatprep.subr.bf16.mxu0 %v8609_v17  ;;  %v8694_v56 = vcombine.low %v4265_v34, %v4269_v36  ;;  %v8685_v17 = vcombine.high %v4256_v2, %v4260_v3  ;;  %v4340_v48 = vld [vmem:[%s9473_s23 + $0x760] sm:$0xff]  ;;  %v4337_v34 = vld [vmem:[%s9473_s23 + $0x748] sm:$0xff] }
 0x547   : > { %7333 = vmatprep.subr.bf16.mxu1 %v8611_v20  ;;  %v8687_v20 = vcombine.high %v4257_v19, %v4261_v29  ;;  %v4341_v36 = vld [vmem:[%s9473_s23 + $0x768] sm:$0xff] }
 0x54d   : > { %7291 = vmatpush2.bf16.xpose.msra.mxu0 %v8608_v44  ;;  %v8684_v44 = vcombine.low %v4256_v2, %v4260_v3  ;;  %v4328_v2 = vld [vmem:[%s9473_s23 + $0x700] sm:$0xff] }
 0x54e   : > { %7334 = vmatpush2.bf16.xpose.msra.mxu1 %v8610_v49  ;;  %7292 = vmatprep.subr.bf16.mxu0 %v8601_v43  ;;  %v8686_v49 = vcombine.low %v4257_v19, %v4261_v29  ;;  %v8677_v43 = vcombine.high %v4248_v45, %v4252_v21  ;;  %v4332_v3 = vld [vmem:[%s9473_s23 + $0x720] sm:$0xff]  ;;  %v4329_v19 = vld [vmem:[%s9473_s23 + $0x708] sm:$0xff] }
 0x54f   : > { %7335 = vmatprep.subr.bf16.mxu1 %v8603_v47  ;;  %v8679_v47 = vcombine.high %v4249_v23, %v4253_v59  ;;  %v4333_v29 = vld [vmem:[%s9473_s23 + $0x728] sm:$0xff]  ;;  %v4320_v45 = vld [vmem:[%s9473_s23 + $0x6c0] sm:$0xff] }
 0x550   : > { %v4324_v21 = vld [vmem:[%s9473_s23 + $0x6e0] sm:$0xff]  ;;  %v4321_v23 = vld [vmem:[%s9473_s23 + $0x6c8] sm:$0xff] }
 0x551   : > { %v4325_v59 = vld [vmem:[%s9473_s23 + $0x6e8] sm:$0xff] }
 0x555   : > { %7293 = vmatpush2.bf16.xpose.msra.mxu0 %v8600_v54  ;;  %v4232_v54 = vld [vmem:[%s9473_s23 + $0x400] sm:$0xff] }
 0x556   : > { %7336 = vmatpush2.bf16.xpose.msra.mxu1 %v8602_v12  ;;  %7348 = vmatprep.subr.bf16.mxu0 %v8717_v30  ;;  %v4236_v12 = vld [vmem:[%s9473_s23 + $0x420] sm:$0xff]  ;;  %v4233_v30 = vld [vmem:[%s9473_s23 + $0x408] sm:$0xff] }
 0x557   : > { %7391 = vmatprep.subr.bf16.mxu1 %v8719_v28  ;;  %v8668_v28 = vcombine.low %v4240_v51, %v4244_v35  ;;  %v8661_v4 = vcombine.high %v4232_v54, %v4236_v12  ;;  %v8663_v27 = vcombine.high %v4233_v30, %v4237_v55  ;;  %v8660_v24 = vcombine.low %v4232_v54, %v4236_v12  ;;  %v4312_v51 = vld [vmem:[%s9473_s23 + $0x680] sm:$0xff] }
 0x558   : > { %v4316_v35 = vld [vmem:[%s9473_s23 + $0x6a0] sm:$0xff] }
 0x559   : > { %v4304_v54 = vld [vmem:[%s9473_s23 + $0x640] sm:$0xff] }
 0x55a   : > { %v4308_v12 = vld [vmem:[%s9473_s23 + $0x660] sm:$0xff] }
 0x55c   : > { %7295 = vmatmul.mubr.bf16.vlgmr.msra.gmra.mxu0 %v10080_v22 }
 0x55d   : > { %7338 = vmatmul.mubr.bf16.vlgmr.msra.gmra.mxu1 %v10300_v39  ;;  %7349 = vmatpush1.bf16.xpose.msra.mxu0 %v8716_v42  ;;  %v4353_v42 = vld [vmem:[%s9473_s23 + $0x7c8] sm:$0xff] }
 0x55e   : > { %7380 = vmatprep.mubr.bf16.mxu0 %v10126_v32  ;;  %7392 = vmatpush1.bf16.xpose.msra.mxu1 %v8718_v61  ;;  %v8662_v61 = vcombine.low %v4233_v30, %v4237_v55  ;;  %v4305_v30 = vld [vmem:[%s9473_s23 + $0x648] sm:$0xff] }
 0x55f   : > { %7423 = vmatprep.mubr.bf16.mxu1 %v10129_v38  ;;  %7350 = vmatprep.subr.bf16.mxu0 %v8709_v13  ;;  %v8781_v13 = vcombine.high %v4352_v57, %v4356_v58  ;;  %v4309_v55 = vld [vmem:[%s9473_s23 + $0x668] sm:$0xff] }
 0x560   : > { %7393 = vmatprep.subr.bf16.mxu1 %v8711_v16  ;;  %v8783_v16 = vcombine.high %v4353_v42, %v4357_v18 }
 0x565   : > { %7351 = vmatpush1.bf16.xpose.msra.mxu0 %v8708_v41  ;;  %v8780_v41 = vcombine.low %v4352_v57, %v4356_v58  ;;  %v4296_v57 = vld [vmem:[%s9473_s23 + $0x600] sm:$0xff] }
 0x566   : > { %7394 = vmatpush1.bf16.xpose.msra.mxu1 %v8710_v7  ;;  %7352 = vmatprep.subr.bf16.mxu0 %v8701_v33  ;;  %v8782_v7 = vcombine.low %v4353_v42, %v4357_v18  ;;  %v8773_v33 = vcombine.high %v4344_v62, %v4348_v26  ;;  %v4300_v58 = vld [vmem:[%s9473_s23 + $0x620] sm:$0xff]  ;;  %v4297_v42 = vld [vmem:[%s9473_s23 + $0x608] sm:$0xff] }
 0x567   : > { %7395 = vmatprep.subr.bf16.mxu1 %v8703_v8  ;;  %v8775_v8 = vcombine.high %v4345_v5, %v4349_v6  ;;  %v4301_v18 = vld [vmem:[%s9473_s23 + $0x628] sm:$0xff] }
 0x56d   : > { %7353 = vmatpush1.bf16.xpose.msra.mxu0 %v8700_v25  ;;  %v8772_v25 = vcombine.low %v4344_v62, %v4348_v26  ;;  %v4290_v62 = vld [vmem:[%s9473_s23 + $0x5d0] sm:$0xff] }
 0x56e   : > { %7396 = vmatpush1.bf16.xpose.msra.mxu1 %v8702_v37  ;;  %7354 = vmatprep.subr.bf16.mxu0 %v8693_v14  ;;  %v8774_v37 = vcombine.low %v4345_v5, %v4349_v6  ;;  %v8765_v14 = vcombine.high %v4336_v9, %v4340_v48  ;;  %v4294_v26 = vld [vmem:[%s9473_s23 + $0x5f0] sm:$0xff]  ;;  %v4291_v5 = vld [vmem:[%s9473_s23 + $0x5d8] sm:$0xff] }
 0x56f   : > { %7397 = vmatprep.subr.bf16.mxu1 %v8695_v15  ;;  %v8767_v15 = vcombine.high %v4337_v34, %v4341_v36  ;;  %v4295_v6 = vld [vmem:[%s9473_s23 + $0x5f8] sm:$0xff] }
 0x575   : > { %7355 = vmatpush1.bf16.xpose.msra.mxu0 %v8692_v31  ;;  %v8764_v31 = vcombine.low %v4336_v9, %v4340_v48  ;;  %v4282_v9 = vld [vmem:[%s9473_s23 + $0x590] sm:$0xff] }
 0x576   : > { %7398 = vmatpush1.bf16.xpose.msra.mxu1 %v8694_v56  ;;  %7356 = vmatprep.subr.bf16.mxu0 %v8685_v17  ;;  %v8766_v56 = vcombine.low %v4337_v34, %v4341_v36  ;;  %v8757_v17 = vcombine.high %v4328_v2, %v4332_v3  ;;  %v4286_v48 = vld [vmem:[%s9473_s23 + $0x5b0] sm:$0xff]  ;;  %v8720_v34 = vcombine.low %v4290_v62, %v4294_v26  ;;  %v4283_v36 = vld [vmem:[%s9473_s23 + $0x598] sm:$0xff] }
 0x577   : > { %7399 = vmatprep.subr.bf16.mxu1 %v8687_v20  ;;  %v8759_v20 = vcombine.high %v4329_v19, %v4333_v29 }
 0x57d   : > { %7357 = vmatpush1.bf16.xpose.msra.mxu0 %v8684_v44  ;;  %v8756_v44 = vcombine.low %v4328_v2, %v4332_v3  ;;  %v4274_v2 = vld [vmem:[%s9473_s23 + $0x550] sm:$0xff] }
 0x57e   : > { %7400 = vmatpush1.bf16.xpose.msra.mxu1 %v8686_v49  ;;  %7358 = vmatprep.subr.bf16.mxu0 %v8677_v43  ;;  %v8758_v49 = vcombine.low %v4329_v19, %v4333_v29  ;;  %v8749_v43 = vcombine.high %v4320_v45, %v4324_v21  ;;  %v4278_v3 = vld [vmem:[%s9473_s23 + $0x570] sm:$0xff]  ;;  %v4275_v19 = vld [vmem:[%s9473_s23 + $0x558] sm:$0xff] }
 0x57f   : > { %7401 = vmatprep.subr.bf16.mxu1 %v8679_v47  ;;  %v8751_v47 = vcombine.high %v4321_v23, %v4325_v59  ;;  %v4279_v29 = vld [vmem:[%s9473_s23 + $0x578] sm:$0xff] }
 0x585   : > { %7359 = vmatpush1.bf16.xpose.msra.mxu0 %v8676_v50  ;;  %v8748_v50 = vcombine.low %v4320_v45, %v4324_v21  ;;  %v4266_v45 = vld [vmem:[%s9473_s23 + $0x510] sm:$0xff] }
 0x586   : > { %7402 = vmatpush1.bf16.xpose.msra.mxu1 %v8678_v53  ;;  %7360 = vmatprep.subr.bf16.mxu0 %v8669_v40  ;;  %v8750_v53 = vcombine.low %v4321_v23, %v4325_v59  ;;  %v8741_v40 = vcombine.high %v4312_v51, %v4316_v35  ;;  %v4270_v21 = vld [vmem:[%s9473_s23 + $0x530] sm:$0xff]  ;;  %v4267_v23 = vld [vmem:[%s9473_s23 + $0x518] sm:$0xff] }
 0x587   : > { %7403 = vmatprep.subr.bf16.mxu1 %v8671_v46  ;;  %v8743_v46 = vcombine.high %v4313_v52, %v4317_v1  ;;  %v4271_v59 = vld [vmem:[%s9473_s23 + $0x538] sm:$0xff] }
 0x58d   : > { %7361 = vmatpush1.bf16.xpose.msra.mxu0 %v8668_v28  ;;  %v8740_v28 = vcombine.low %v4312_v51, %v4316_v35  ;;  %v4258_v51 = vld [vmem:[%s9473_s23 + $0x4d0] sm:$0xff] }
 0x58e   : > { %7404 = vmatpush1.bf16.xpose.msra.mxu1 %v8670_v0  ;;  %7362 = vmatprep.subr.bf16.mxu0 %v8661_v4  ;;  %v8742_v0 = vcombine.low %v4313_v52, %v4317_v1  ;;  %v8733_v4 = vcombine.high %v4304_v54, %v4308_v12  ;;  %v4262_v35 = vld [vmem:[%s9473_s23 + $0x4f0] sm:$0xff]  ;;  %v4259_v52 = vld [vmem:[%s9473_s23 + $0x4d8] sm:$0xff] }
 0x58f   : > { %7405 = vmatprep.subr.bf16.mxu1 %v8663_v27  ;;  %v8735_v27 = vcombine.high %v4305_v30, %v4309_v55  ;;  %v4263_v1 = vld [vmem:[%s9473_s23 + $0x4f8] sm:$0xff] }
 0x595   : > { %7363 = vmatpush1.bf16.xpose.msra.mxu0 %v8660_v24  ;;  %v8732_v24 = vcombine.low %v4304_v54, %v4308_v12  ;;  %v4250_v54 = vld [vmem:[%s9473_s23 + $0x490] sm:$0xff] }
 0x596   : > { %7406 = vmatpush1.bf16.xpose.msra.mxu1 %v8662_v61  ;;  %7364 = vmatprep.subr.bf16.mxu0 %v8781_v13  ;;  %v8734_v61 = vcombine.low %v4305_v30, %v4309_v55  ;;  %v8725_v13 = vcombine.high %v4296_v57, %v4300_v58  ;;  %v4254_v12 = vld [vmem:[%s9473_s23 + $0x4b0] sm:$0xff]  ;;  %v4251_v30 = vld [vmem:[%s9473_s23 + $0x498] sm:$0xff] }
 0x597   : > { %7407 = vmatprep.subr.bf16.mxu1 %v8783_v16  ;;  %v8727_v16 = vcombine.high %v4297_v42, %v4301_v18  ;;  %v4255_v55 = vld [vmem:[%s9473_s23 + $0x4b8] sm:$0xff] }
 0x59d   : > { %7365 = vmatpush2.bf16.xpose.msra.mxu0 %v8780_v41  ;;  %v8724_v41 = vcombine.low %v4296_v57, %v4300_v58  ;;  %v4242_v57 = vld [vmem:[%s9473_s23 + $0x450] sm:$0xff] }
 0x59e   : > { %7408 = vmatpush2.bf16.xpose.msra.mxu1 %v8782_v7  ;;  %7366 = vmatprep.subr.bf16.mxu0 %v8773_v33  ;;  %v8726_v7 = vcombine.low %v4297_v42, %v4301_v18  ;;  %v8721_v33 = vcombine.high %v4290_v62, %v4294_v26  ;;  %v4246_v58 = vld [vmem:[%s9473_s23 + $0x470] sm:$0xff]  ;;  %v4243_v42 = vld [vmem:[%s9473_s23 + $0x458] sm:$0xff] }
 0x59f   : > { %7409 = vmatprep.subr.bf16.mxu1 %v8775_v8  ;;  %v8723_v8 = vcombine.high %v4291_v5, %v4295_v6  ;;  %v4247_v18 = vld [vmem:[%s9473_s23 + $0x478] sm:$0xff]  ;;  %v4234_v62 = vld [vmem:[%s9473_s23 + $0x410] sm:$0xff] }
 0x5a0   : > { %v4238_v26 = vld [vmem:[%s9473_s23 + $0x430] sm:$0xff] }
 0x5a5   : > { %7367 = vmatpush2.bf16.xpose.msra.mxu0 %v8772_v25  ;;  %v4287_v25 = vld [vmem:[%s9473_s23 + $0x5b8] sm:$0xff] }
 0x5a6   : > { %7410 = vmatpush2.bf16.xpose.msra.mxu1 %v8774_v37  ;;  %7368 = vmatprep.subr.bf16.mxu0 %v8765_v14  ;;  %v8722_v37 = vcombine.low %v4291_v5, %v4295_v6  ;;  %v8713_v14 = vcombine.high %v4282_v9, %v4286_v48  ;;  %v4235_v5 = vld [vmem:[%s9473_s23 + $0x418] sm:$0xff] }
 0x5a7   : > { %7411 = vmatprep.subr.bf16.mxu1 %v8767_v15  ;;  %v8715_v15 = vcombine.high %v4283_v36, %v4287_v25  ;;  %v4239_v6 = vld [vmem:[%s9473_s23 + $0x438] sm:$0xff] }
 0x5ad   : > { %7369 = vmatpush2.bf16.xpose.msra.mxu0 %v8764_v31  ;;  %v8712_v31 = vcombine.low %v4282_v9, %v4286_v48  ;;  %v7210_v9 = vpop.f32.mrf.mxu0  ;;  %v7253_v48 = vpop.f32.mrf.mxu1 }
 0x5ae   : > { %7412 = vmatpush2.bf16.xpose.msra.mxu1 %v8766_v56  ;;  %7370 = vmatprep.subr.bf16.mxu0 %v8757_v17  ;;  %v8714_v56 = vcombine.low %v4283_v36, %v4287_v25  ;;  %v8705_v17 = vcombine.high %v4274_v2, %v4278_v3  ;;  %v4358_v36 = vld [vmem:[%s9473_s23 + $0x7f0] sm:$0xff]  ;;  %v4355_v25 = vld [vmem:[%s9473_s23 + $0x7d8] sm:$0xff] }
 0x5af   : > { %7413 = vmatprep.subr.bf16.mxu1 %v8759_v20  ;;  %v8707_v20 = vcombine.high %v4275_v19, %v4279_v29 }
 0x5b5   : > { %7371 = vmatpush2.bf16.xpose.msra.mxu0 %v8756_v44  ;;  %v8704_v44 = vcombine.low %v4274_v2, %v4278_v3  ;;  %v8666_v2 = vcombine.low %v4235_v5, %v4239_v6 }
 0x5b6   : > { %7414 = vmatpush2.bf16.xpose.msra.mxu1 %v8758_v49  ;;  %7372 = vmatprep.subr.bf16.mxu0 %v8749_v43  ;;  %v8706_v49 = vcombine.low %v4275_v19, %v4279_v29  ;;  %v8697_v43 = vcombine.high %v4266_v45, %v4270_v21  ;;  %v7255_v19 = vpop.f32.mrf.mxu1 }
 0x5b7   : > { %7415 = vmatprep.subr.bf16.mxu1 %v8751_v47  ;;  %v8699_v47 = vcombine.high %v4267_v23, %v4271_v59 }
 0x5bd   : > { %7373 = vmatpush2.bf16.xpose.msra.mxu0 %v8748_v50  ;;  %v8696_v50 = vcombine.low %v4266_v45, %v4270_v21  ;;  %v4347_v45 = vld [vmem:[%s9473_s23 + $0x798] sm:$0xff] }
 0x5be   : > { %7416 = vmatpush2.bf16.xpose.msra.mxu1 %v8750_v53  ;;  %7374 = vmatprep.subr.bf16.mxu0 %v8741_v40  ;;  %v8698_v53 = vcombine.low %v4267_v23, %v4271_v59  ;;  %v8689_v40 = vcombine.high %v4258_v51, %v4262_v35  ;;  %v4351_v21 = vld [vmem:[%s9473_s23 + $0x7b8] sm:$0xff] }
 0x5bf   : > { %7417 = vmatprep.subr.bf16.mxu1 %v8743_v46  ;;  %v8691_v46 = vcombine.high %v4259_v52, %v4263_v1 }
 0x5c5   : > { %7375 = vmatpush2.bf16.xpose.msra.mxu0 %v8740_v28  ;;  %v8688_v28 = vcombine.low %v4258_v51, %v4262_v35  ;;  %v8779_v51 = vcombine.high %v4347_v45, %v4351_v21 }
 0x5c6   : > { %7418 = vmatpush2.bf16.xpose.msra.mxu1 %v8742_v0  ;;  %7376 = vmatprep.subr.bf16.mxu0 %v8733_v4  ;;  %v8690_v0 = vcombine.low %v4259_v52, %v4263_v1  ;;  %v8681_v4 = vcombine.high %v4250_v54, %v4254_v12 }
 0x5c7   : > { %7419 = vmatprep.subr.bf16.mxu1 %v8735_v27  ;;  %v8683_v27 = vcombine.high %v4251_v30, %v4255_v55 }
 0x5cd   : > { %7377 = vmatpush2.bf16.xpose.msra.mxu0 %v8732_v24  ;;  %v8680_v24 = vcombine.low %v4250_v54, %v4254_v12 }
 0x5ce   : > { %7420 = vmatpush2.bf16.xpose.msra.mxu1 %v8734_v61  ;;  %7378 = vmatprep.subr.bf16.mxu0 %v8725_v13  ;;  %v8682_v61 = vcombine.low %v4251_v30, %v4255_v55  ;;  %v8673_v13 = vcombine.high %v4242_v57, %v4246_v58  ;;  %v4338_v55 = vld [vmem:[%s9473_s23 + $0x750] sm:$0xff] }
 0x5cf   : > { %7421 = vmatprep.subr.bf16.mxu1 %v8727_v16  ;;  %v8675_v16 = vcombine.high %v4243_v42, %v4247_v18 }
 0x5d5   : > { %7379 = vmatpush2.bf16.xpose.msra.mxu0 %v8724_v41  ;;  %v8672_v41 = vcombine.low %v4242_v57, %v4246_v58  ;;  %v4339_v57 = vld [vmem:[%s9473_s23 + $0x758] sm:$0xff] }
 0x5d6   : > { %7422 = vmatpush2.bf16.xpose.msra.mxu1 %v8726_v7  ;;  %7434 = vmatprep.subr.bf16.mxu0 %v8721_v33  ;;  %v8674_v7 = vcombine.low %v4243_v42, %v4247_v18  ;;  %v8665_v33 = vcombine.high %v4234_v62, %v4238_v26  ;;  %v4343_v58 = vld [vmem:[%s9473_s23 + $0x778] sm:$0xff] }
 0x5d7   : > { %7477 = vmatprep.subr.bf16.mxu1 %v8723_v8  ;;  %v8667_v8 = vcombine.high %v4235_v5, %v4239_v6 }
 0x5dc   : > { %7381 = vmatmul.mubr.bf16.vlgmr.msra.gmra.mxu0 %v9760_v60 }
 0x5dd   : > { %7424 = vmatmul.mubr.bf16.vlgmr.msra.gmra.mxu1 %v9920_v63  ;;  %7435 = vmatpush1.bf16.xpose.msra.mxu0 %v8720_v34  ;;  %v4354_v34 = vld [vmem:[%s9473_s23 + $0x7d0] sm:$0xff] }
 0x5de   : > { %7466 = vmatprep.mubr.bf16.mxu0 %v10204_v10  ;;  %7478 = vmatpush1.bf16.xpose.msra.mxu1 %v8722_v37  ;;  %v4359_v37 = vld [vmem:[%s9473_s23 + $0x7f8] sm:$0xff]  ;;  %v8785_v3 = vcombine.high %v4354_v34, %v4358_v36  ;;  %v8784_v23 = vcombine.low %v4354_v34, %v4358_v36 }
 0x5df   : > { %7509 = vmatprep.mubr.bf16.mxu1 %v10265_v11  ;;  %7436 = vmatprep.subr.bf16.mxu0 %v8713_v14  ;;  %v8664_v14 = vcombine.low %v4234_v62, %v4238_v26  ;;  %v8787_v29 = vcombine.high %v4355_v25, %v4359_v37  ;;  %v8778_v26 = vcombine.low %v4347_v45, %v4351_v21 }
 0x5e0   : > { %7479 = vmatprep.subr.bf16.mxu1 %v8715_v15  ;;  %v7212_v15 = vpop.f32.mrf.mxu0 }
 0x5e1   : > { %v7256_v52 = vadd.f32 %v7255_v19, %v7212_v15  ;;  %v4335_v15 = vld [vmem:[%s9473_s23 + $0x738] sm:$0xff] }
 0x5e5   : > { %7437 = vmatpush1.bf16.xpose.msra.mxu0 %v8712_v31  ;;  %v7214_v31 = vpop.f32.mrf.mxu0 }
 0x5e6   : > { %7480 = vmatpush1.bf16.xpose.msra.mxu1 %v8714_v56  ;;  %7438 = vmatprep.subr.bf16.mxu0 %v8705_v17  ;;  %v7257_v56 = vpop.f32.mrf.mxu1  ;;  %v4346_v17 = vld [vmem:[%s9473_s23 + $0x790] sm:$0xff] }
 0x5e7   : > { %7481 = vmatprep.subr.bf16.mxu1 %v8707_v20  ;;  %v4350_v20 = vld [vmem:[%s9473_s23 + $0x7b0] sm:$0xff]  ;;  %v7216_v59 = vpop.f32.mrf.mxu0 }
 0x5ed   : > { %7439 = vmatpush1.bf16.xpose.msra.mxu0 %v8704_v44  ;;  %v8786_v44 = vcombine.low %v4355_v25, %v4359_v37  ;;  %v4330_v25 = vld [vmem:[%s9473_s23 + $0x710] sm:$0xff] }
 0x5ee   : > { %7482 = vmatpush1.bf16.xpose.msra.mxu1 %v8706_v49  ;;  %7440 = vmatprep.subr.bf16.mxu0 %v8697_v43  ;;  %v8777_v49 = vcombine.high %v4346_v17, %v4350_v20  ;;  %v7254_v43 = vadd.f32 %v7253_v48, %v7210_v9  ;;  %v4334_v37 = vld [vmem:[%s9473_s23 + $0x730] sm:$0xff] }
 0x5ef   : > { %7483 = vmatprep.subr.bf16.mxu1 %v8699_v47  ;;  %v7259_v47 = vpop.f32.mrf.mxu1  ;;  %v8761_v19 = vcombine.high %v4330_v25, %v4334_v37  ;;  %v8760_v45 = vcombine.low %v4330_v25, %v4334_v37  ;;  %v4400_v25 = vld [vmem:[%s9473_s23 + $0x940] sm:$0xff] }
 0x5f0   : > { %v4404_v37 = vld [vmem:[%s9473_s23 + $0x960] sm:$0xff] }
 0x5f5   : > { %7441 = vmatpush1.bf16.xpose.msra.mxu0 %v8696_v50 }
 0x5f6   : > { %7484 = vmatpush1.bf16.xpose.msra.mxu1 %v8698_v53  ;;  %7442 = vmatprep.subr.bf16.mxu0 %v8689_v40  ;;  %v4088_v53 = vld [vmem:[#allocation8] sm:$0xff] }
 0x5f7   : > { %7485 = vmatprep.subr.bf16.mxu1 %v8691_v46  ;;  %v7258_v46 = vadd.f32 %v7257_v56, %v7214_v31  ;;  %v4322_v31 = vld [vmem:[%s9473_s23 + $0x6d0] sm:$0xff] }
 0x5f8   : > { %v4326_v56 = vld [vmem:[%s9473_s23 + $0x6f0] sm:$0xff] }
 0x5fd   : > { %7443 = vmatpush1.bf16.xpose.msra.mxu0 %v8688_v28  ;;  %v4342_v28 = vld [vmem:[%s9473_s23 + $0x770] sm:$0xff] }
 0x5fe   : > { %7486 = vmatpush1.bf16.xpose.msra.mxu1 %v8690_v0  ;;  %7444 = vmatprep.subr.bf16.mxu0 %v8681_v4  ;;  %v7260_v0 = vadd.f32 %v7259_v47, %v7216_v59  ;;  %v4089_v4 = vld [vmem:[#allocation8 + $0x8] sm:$0xff]  ;;  %v8769_v5 = vcombine.high %v4338_v55, %v4342_v28  ;;  %v4319_v47 = vld [vmem:[%s9473_s23 + $0x6b8] sm:$0xff] }
 0x5ff   : > { %7487 = vmatprep.subr.bf16.mxu1 %v8683_v27 }
 0x605   : > { %7445 = vmatpush1.bf16.xpose.msra.mxu0 %v8680_v24 }
 0x606   : > { %7488 = vmatpush1.bf16.xpose.msra.mxu1 %v8682_v61  ;;  %7446 = vmatprep.subr.bf16.mxu0 %v8673_v13  ;;  %v8776_v13 = vcombine.low %v4346_v17, %v4350_v20  ;;  %v4323_v17 = vld [vmem:[%s9473_s23 + $0x6d8] sm:$0xff] }
 0x607   : > { %7489 = vmatprep.subr.bf16.mxu1 %v8675_v16  ;;  %v4096_v16 = vld [vmem:[#allocation8 + $0x40] sm:$0xff]  ;;  %v4327_v20 = vld [vmem:[%s9473_s23 + $0x6f8] sm:$0xff] }
 0x608   : > { %v8755_v59 = vcombine.high %v4323_v17, %v4327_v20 }
 0x60d   : > { %7447 = vmatpush1.bf16.xpose.msra.mxu0 %v8672_v41 }
 0x60e   : > { %7490 = vmatpush1.bf16.xpose.msra.mxu1 %v8674_v7  ;;  %7448 = vmatprep.subr.bf16.mxu0 %v8665_v33  ;;  %v8771_v33 = vcombine.high %v4339_v57, %v4343_v58 }
 0x60f   : > { %7491 = vmatprep.subr.bf16.mxu1 %v8667_v8  ;;  %v4097_v8 = vld [vmem:[#allocation8 + $0x48] sm:$0xff] }
 0x615   : > { %7449 = vmatpush1.bf16.xpose.msra.mxu0 %v8664_v14  ;;  %v4331_v14 = vld [vmem:[%s9473_s23 + $0x718] sm:$0xff] }
 0x616   : > { %7492 = vmatpush1.bf16.xpose.msra.mxu1 %v8666_v2  ;;  %7450 = vmatprep.subr.bf16.mxu0 %v8785_v3  ;;  %v8768_v2 = vcombine.low %v4338_v55, %v4342_v28  ;;  %v8770_v3 = vcombine.low %v4339_v57, %v4343_v58  ;;  %v8762_v21 = vcombine.low %v4331_v14, %v4335_v15  ;;  %v4298_v28 = vld [vmem:[%s9473_s23 + $0x610] sm:$0xff] }
 0x617   : > { %7493 = vmatprep.subr.bf16.mxu1 %v8787_v29  ;;  %v8763_v29 = vcombine.high %v4331_v14, %v4335_v15  ;;  %v4401_v14 = vld [vmem:[%s9473_s23 + $0x948] sm:$0xff] }
 0x618   : > { %v4405_v15 = vld [vmem:[%s9473_s23 + $0x968] sm:$0xff] }
 0x61c   : > { %v7296_v35 = vpop.f32.mrf.mxu0 }
 0x61d   : > { %v7297_v1 = vadd.f32 %v7296_v35, %v7254_v43  ;;  %v7339_v50 = vpop.f32.mrf.mxu1  ;;  %7451 = vmatpush2.bf16.xpose.msra.mxu0 %v8784_v23  ;;  %v8753_v23 = vcombine.high %v4322_v31, %v4326_v56  ;;  %v4315_v43 = vld [vmem:[%s9473_s23 + $0x698] sm:$0xff]  ;;  %v8754_v35 = vcombine.low %v4323_v17, %v4327_v20  ;;  %v4393_v17 = vld [vmem:[%s9473_s23 + $0x908] sm:$0xff] }
 0x61e   : > { %7494 = vmatpush2.bf16.xpose.msra.mxu1 %v8786_v44  ;;  %v7298_v40 = vpop.f32.mrf.mxu0  ;;  %7452 = vmatprep.subr.bf16.mxu0 %v8777_v49  ;;  %v4314_v44 = vld [vmem:[%s9473_s23 + $0x690] sm:$0xff]  ;;  %v4397_v20 = vld [vmem:[%s9473_s23 + $0x928] sm:$0xff] }
 0x61f   : > { %v7340_v54 = vadd.f32 %v7339_v50, %v7297_v1  ;;  %v7299_v12 = vadd.f32 %v7298_v40, %v7256_v52  ;;  %v7341_v30 = vpop.f32.mrf.mxu1  ;;  %7495 = vmatprep.subr.bf16.mxu1 %v8779_v51  ;;  %v4318_v49 = vld [vmem:[%s9473_s23 + $0x6b0] sm:$0xff]  ;;  %v8752_v51 = vcombine.low %v4322_v31, %v4326_v56  ;;  %v8747_v1 = vcombine.high %v4315_v43, %v4319_v47  ;;  %v4307_v40 = vld [vmem:[%s9473_s23 + $0x658] sm:$0xff]  ;;  %v4392_v31 = vld [vmem:[%s9473_s23 + $0x900] sm:$0xff] }
 0x620   : > { %v7300_v27 = vpop.f32.mrf.mxu0  ;;  %v8745_v52 = vcombine.high %v4314_v44, %v4318_v49  ;;  %v4306_v50 = vld [vmem:[%s9473_s23 + $0x650] sm:$0xff]  ;;  %v4396_v56 = vld [vmem:[%s9473_s23 + $0x920] sm:$0xff] }
 0x621   : > { %v7864_v42 = vadd.f32 %v7340_v54, %v4088_v53  ;;  %v7342_v18 = vadd.f32 %v7341_v30, %v7299_v12  ;;  %v7301_v24 = vadd.f32 %v7300_v27, %v7258_v46  ;;  %v7343_v61 = vpop.f32.mrf.mxu1  ;;  %v4310_v53 = vld [vmem:[%s9473_s23 + $0x670] sm:$0xff]  ;;  %v4311_v46 = vld [vmem:[%s9473_s23 + $0x678] sm:$0xff]  ;;  %v8744_v54 = vcombine.low %v4314_v44, %v4318_v49  ;;  %v4384_v44 = vld [vmem:[%s9473_s23 + $0x8c0] sm:$0xff] }
 0x622   : > { %v7302_v62 = vpop.f32.mrf.mxu0  ;;  %v8746_v12 = vcombine.low %v4315_v43, %v4319_v47  ;;  %v8737_v30 = vcombine.high %v4306_v50, %v4310_v53  ;;  %v8739_v55 = vcombine.high %v4307_v40, %v4311_v46  ;;  %v4303_v27 = vld [vmem:[%s9473_s23 + $0x638] sm:$0xff]  ;;  %v8736_v57 = vcombine.low %v4306_v50, %v4310_v53  ;;  %v4388_v49 = vld [vmem:[%s9473_s23 + $0x8e0] sm:$0xff]  ;;  %v4385_v43 = vld [vmem:[%s9473_s23 + $0x8c8] sm:$0xff] }
 0x623   : > { %7880 = vst [vmem:[#allocation8] sm:$0xff] %v7864_v42  ;;  %v7865_v6 = vadd.f32 %v7342_v18, %v4089_v4  ;;  %v7344_v41 = vadd.f32 %v7343_v61, %v7301_v24  ;;  %v7303_v7 = vadd.f32 %v7302_v62, %v7260_v0  ;;  %v7345_v9 = vpop.f32.mrf.mxu1  ;;  %v4302_v0 = vld [vmem:[%s9473_s23 + $0x630] sm:$0xff]  ;;  %v4299_v4 = vld [vmem:[%s9473_s23 + $0x618] sm:$0xff]  ;;  %v8738_v58 = vcombine.low %v4307_v40, %v4311_v46  ;;  %v4416_v24 = vld [vmem:[%s9473_s23 + $0x9c0] sm:$0xff] }
 0x624   : > { %v8729_v42 = vcombine.high %v4298_v28, %v4302_v0  ;;  %v8731_v18 = vcombine.high %v4299_v4, %v4303_v27  ;;  %v4420_v61 = vld [vmem:[%s9473_s23 + $0x9e0] sm:$0xff]  ;;  %v8728_v62 = vcombine.low %v4298_v28, %v4302_v0  ;;  %v4389_v47 = vld [vmem:[%s9473_s23 + $0x8e8] sm:$0xff] }
 0x625   : > { %7881 = vst [vmem:[#allocation8 + $0x8] sm:$0xff] %v7865_v6  ;;  %v7872_v48 = vadd.f32 %v7344_v41, %v4096_v16  ;;  %v7346_v34 = vadd.f32 %v7345_v9, %v7303_v7  ;;  %7453 = vmatpush2.bf16.xpose.msra.mxu0 %v8776_v13  ;;  %v4417_v13 = vld [vmem:[%s9473_s23 + $0x9c8] sm:$0xff]  ;;  %v4408_v41 = vld [vmem:[%s9473_s23 + $0x980] sm:$0xff] }
 0x626   : > { %7496 = vmatpush2.bf16.xpose.msra.mxu1 %v8778_v26  ;;  %7454 = vmatprep.subr.bf16.mxu0 %v8769_v5  ;;  %v4421_v16 = vld [vmem:[%s9473_s23 + $0x9e8] sm:$0xff]  ;;  %v8730_v26 = vcombine.low %v4299_v4, %v4303_v27  ;;  %v8845_v5 = vcombine.high %v4416_v24, %v4420_v61  ;;  %v4412_v7 = vld [vmem:[%s9473_s23 + $0x9a0] sm:$0xff] }
 0x627   : > { %7888 = vst [vmem:[#allocation8 + $0x40] sm:$0xff] %v7872_v48  ;;  %v7873_v36 = vadd.f32 %v7346_v34, %v4097_v8  ;;  %7497 = vmatprep.subr.bf16.mxu1 %v8771_v33  ;;  %v8847_v6 = vcombine.high %v4417_v13, %v4421_v16  ;;  %v8844_v33 = vcombine.low %v4416_v24, %v4420_v61  ;;  %v4409_v8 = vld [vmem:[%s9473_s23 + $0x988] sm:$0xff]  ;;  %v4376_v50 = vld [vmem:[%s9473_s23 + $0x880] sm:$0xff] }
 0x628   : > { %v4413_v9 = vld [vmem:[%s9473_s23 + $0x9a8] sm:$0xff]  ;;  %v8846_v48 = vcombine.low %v4417_v13, %v4421_v16  ;;  %v8837_v34 = vcombine.high %v4408_v41, %v4412_v7  ;;  %v4380_v53 = vld [vmem:[%s9473_s23 + $0x8a0] sm:$0xff] }
 0x629   : > { %7889 = vst [vmem:[#allocation8 + $0x48] sm:$0xff] %v7873_v36  ;;  %v8839_v36 = vcombine.high %v4409_v8, %v4413_v9  ;;  %v4377_v40 = vld [vmem:[%s9473_s23 + $0x888] sm:$0xff]  ;;  %v4368_v28 = vld [vmem:[%s9473_s23 + $0x840] sm:$0xff] }
 0x62a   : > { %v4381_v46 = vld [vmem:[%s9473_s23 + $0x8a8] sm:$0xff]  ;;  %v4372_v0 = vld [vmem:[%s9473_s23 + $0x860] sm:$0xff] }
 0x62b   : > { %v4369_v4 = vld [vmem:[%s9473_s23 + $0x848] sm:$0xff]  ;;  %v4360_v24 = vld [vmem:[%s9473_s23 + $0x800] sm:$0xff] }
 0x62c   : > { %v4373_v27 = vld [vmem:[%s9473_s23 + $0x868] sm:$0xff]  ;;  %v4364_v61 = vld [vmem:[%s9473_s23 + $0x820] sm:$0xff] }
 0x62d   : > { %7455 = vmatpush2.bf16.xpose.msra.mxu0 %v8768_v2  ;;  %v8836_v2 = vcombine.low %v4408_v41, %v4412_v7  ;;  %v4361_v13 = vld [vmem:[%s9473_s23 + $0x808] sm:$0xff]  ;;  %v4480_v41 = vld [vmem:[%s9473_s23 + $0xbc0] sm:$0xff] }
 0x62e   : > { %7498 = vmatpush2.bf16.xpose.msra.mxu1 %v8770_v3  ;;  %7456 = vmatprep.subr.bf16.mxu0 %v8761_v19  ;;  %v8838_v3 = vcombine.low %v4409_v8, %v4413_v9  ;;  %v8829_v19 = vcombine.high %v4400_v25, %v4404_v37  ;;  %v4365_v16 = vld [vmem:[%s9473_s23 + $0x828] sm:$0xff]  ;;  %v4484_v7 = vld [vmem:[%s9473_s23 + $0xbe0] sm:$0xff]  ;;  %v8788_v9 = vcombine.low %v4360_v24, %v4364_v61 }
 0x62f   : > { %7499 = vmatprep.subr.bf16.mxu1 %v8763_v29  ;;  %v8831_v29 = vcombine.high %v4401_v14, %v4405_v15  ;;  %v4485_v8 = vld [vmem:[%s9473_s23 + $0xbe8] sm:$0xff] }
 0x635   : > { %7457 = vmatpush2.bf16.xpose.msra.mxu0 %v8760_v45  ;;  %v8828_v45 = vcombine.low %v4400_v25, %v4404_v37  ;;  %v4472_v25 = vld [vmem:[%s9473_s23 + $0xb80] sm:$0xff] }
 0x636   : > { %7500 = vmatpush2.bf16.xpose.msra.mxu1 %v8762_v21  ;;  %7458 = vmatprep.subr.bf16.mxu0 %v8753_v23  ;;  %v8830_v21 = vcombine.low %v4401_v14, %v4405_v15  ;;  %v8821_v23 = vcombine.high %v4392_v31, %v4396_v56  ;;  %v4476_v37 = vld [vmem:[%s9473_s23 + $0xba0] sm:$0xff]  ;;  %v4473_v14 = vld [vmem:[%s9473_s23 + $0xb88] sm:$0xff] }
 0x637   : > { %7501 = vmatprep.subr.bf16.mxu1 %v8755_v59  ;;  %v8823_v59 = vcombine.high %v4393_v17, %v4397_v20  ;;  %v4477_v15 = vld [vmem:[%s9473_s23 + $0xba8] sm:$0xff] }
 0x63d   : > { %7459 = vmatpush2.bf16.xpose.msra.mxu0 %v8752_v51  ;;  %v8820_v51 = vcombine.low %v4392_v31, %v4396_v56  ;;  %v4464_v31 = vld [vmem:[%s9473_s23 + $0xb40] sm:$0xff] }
 0x63e   : > { %7502 = vmatpush2.bf16.xpose.msra.mxu1 %v8754_v35  ;;  %7460 = vmatprep.subr.bf16.mxu0 %v8745_v52  ;;  %v8822_v35 = vcombine.low %v4393_v17, %v4397_v20  ;;  %v8813_v52 = vcombine.high %v4384_v44, %v4388_v49  ;;  %v4468_v56 = vld [vmem:[%s9473_s23 + $0xb60] sm:$0xff]  ;;  %v4465_v17 = vld [vmem:[%s9473_s23 + $0xb48] sm:$0xff] }
 0x63f   : > { %7503 = vmatprep.subr.bf16.mxu1 %v8747_v1  ;;  %v8815_v1 = vcombine.high %v4385_v43, %v4389_v47  ;;  %v4469_v20 = vld [vmem:[%s9473_s23 + $0xb68] sm:$0xff] }
 0x645   : > { %7461 = vmatpush2.bf16.xpose.msra.mxu0 %v8744_v54  ;;  %v8812_v54 = vcombine.low %v4384_v44, %v4388_v49  ;;  %v4456_v44 = vld [vmem:[%s9473_s23 + $0xb00] sm:$0xff] }
 0x646   : > { %7504 = vmatpush2.bf16.xpose.msra.mxu1 %v8746_v12  ;;  %7462 = vmatprep.subr.bf16.mxu0 %v8737_v30  ;;  %v8814_v12 = vcombine.low %v4385_v43, %v4389_v47  ;;  %v8805_v30 = vcombine.high %v4376_v50, %v4380_v53  ;;  %v4460_v49 = vld [vmem:[%s9473_s23 + $0xb20] sm:$0xff]  ;;  %v4457_v43 = vld [vmem:[%s9473_s23 + $0xb08] sm:$0xff] }
 0x647   : > { %7505 = vmatprep.subr.bf16.mxu1 %v8739_v55  ;;  %v8807_v55 = vcombine.high %v4377_v40, %v4381_v46  ;;  %v4461_v47 = vld [vmem:[%s9473_s23 + $0xb28] sm:$0xff] }
 0x64d   : > { %7463 = vmatpush2.bf16.xpose.msra.mxu0 %v8736_v57  ;;  %v8804_v57 = vcombine.low %v4376_v50, %v4380_v53  ;;  %v4448_v50 = vld [vmem:[%s9473_s23 + $0xac0] sm:$0xff] }
 0x64e   : > { %7506 = vmatpush2.bf16.xpose.msra.mxu1 %v8738_v58  ;;  %7464 = vmatprep.subr.bf16.mxu0 %v8729_v42  ;;  %v8806_v58 = vcombine.low %v4377_v40, %v4381_v46  ;;  %v8797_v42 = vcombine.high %v4368_v28, %v4372_v0  ;;  %v4452_v53 = vld [vmem:[%s9473_s23 + $0xae0] sm:$0xff]  ;;  %v4449_v40 = vld [vmem:[%s9473_s23 + $0xac8] sm:$0xff] }
 0x64f   : > { %7507 = vmatprep.subr.bf16.mxu1 %v8731_v18  ;;  %v8799_v18 = vcombine.high %v4369_v4, %v4373_v27  ;;  %v4453_v46 = vld [vmem:[%s9473_s23 + $0xae8] sm:$0xff] }
 0x655   : > { %7465 = vmatpush2.bf16.xpose.msra.mxu0 %v8728_v62  ;;  %v8796_v62 = vcombine.low %v4368_v28, %v4372_v0  ;;  %v4440_v28 = vld [vmem:[%s9473_s23 + $0xa80] sm:$0xff] }
 0x656   : > { %7508 = vmatpush2.bf16.xpose.msra.mxu1 %v8730_v26  ;;  %7520 = vmatprep.subr.bf16.mxu0 %v8845_v5  ;;  %v8798_v26 = vcombine.low %v4369_v4, %v4373_v27  ;;  %v8789_v5 = vcombine.high %v4360_v24, %v4364_v61  ;;  %v4444_v0 = vld [vmem:[%s9473_s23 + $0xaa0] sm:$0xff]  ;;  %v4441_v4 = vld [vmem:[%s9473_s23 + $0xa88] sm:$0xff] }
 0x657   : > { %7563 = vmatprep.subr.bf16.mxu1 %v8847_v6  ;;  %v8791_v6 = vcombine.high %v4361_v13, %v4365_v16  ;;  %v4445_v27 = vld [vmem:[%s9473_s23 + $0xaa8] sm:$0xff]  ;;  %v4432_v24 = vld [vmem:[%s9473_s23 + $0xa40] sm:$0xff] }
 0x658   : > { %v4436_v61 = vld [vmem:[%s9473_s23 + $0xa60] sm:$0xff] }
 0x65c   : > { %7467 = vmatmul.mubr.bf16.vlgmr.msra.gmra.mxu0 %v10080_v22 }
 0x65d   : > { %7510 = vmatmul.mubr.bf16.vlgmr.msra.gmra.mxu1 %v10300_v39  ;;  %7521 = vmatpush1.bf16.xpose.msra.mxu0 %v8844_v33  ;;  %v4481_v33 = vld [vmem:[%s9473_s23 + $0xbc8] sm:$0xff] }
 0x65e   : > { %7552 = vmatprep.mubr.bf16.mxu0 %v10126_v32  ;;  %7564 = vmatpush1.bf16.xpose.msra.mxu1 %v8846_v48  ;;  %v8790_v48 = vcombine.low %v4361_v13, %v4365_v16  ;;  %v4433_v13 = vld [vmem:[%s9473_s23 + $0xa48] sm:$0xff] }
 0x65f   : > { %7595 = vmatprep.mubr.bf16.mxu1 %v10129_v38  ;;  %7522 = vmatprep.subr.bf16.mxu0 %v8837_v34  ;;  %v8909_v34 = vcombine.high %v4480_v41, %v4484_v7  ;;  %v4437_v16 = vld [vmem:[%s9473_s23 + $0xa68] sm:$0xff] }
 0x660   : > { %7565 = vmatprep.subr.bf16.mxu1 %v8839_v36  ;;  %v8911_v36 = vcombine.high %v4481_v33, %v4485_v8 }
 0x665   : > { %7523 = vmatpush1.bf16.xpose.msra.mxu0 %v8836_v2  ;;  %v8908_v2 = vcombine.low %v4480_v41, %v4484_v7  ;;  %v4424_v41 = vld [vmem:[%s9473_s23 + $0xa00] sm:$0xff] }
 0x666   : > { %7566 = vmatpush1.bf16.xpose.msra.mxu1 %v8838_v3  ;;  %7524 = vmatprep.subr.bf16.mxu0 %v8829_v19  ;;  %v8910_v3 = vcombine.low %v4481_v33, %v4485_v8  ;;  %v8901_v19 = vcombine.high %v4472_v25, %v4476_v37  ;;  %v4428_v7 = vld [vmem:[%s9473_s23 + $0xa20] sm:$0xff]  ;;  %v4425_v33 = vld [vmem:[%s9473_s23 + $0xa08] sm:$0xff] }
 0x667   : > { %7567 = vmatprep.subr.bf16.mxu1 %v8831_v29  ;;  %v8903_v29 = vcombine.high %v4473_v14, %v4477_v15  ;;  %v4429_v8 = vld [vmem:[%s9473_s23 + $0xa28] sm:$0xff] }
 0x66d   : > { %7525 = vmatpush1.bf16.xpose.msra.mxu0 %v8828_v45  ;;  %v8900_v45 = vcombine.low %v4472_v25, %v4476_v37  ;;  %v4418_v25 = vld [vmem:[%s9473_s23 + $0x9d0] sm:$0xff] }
 0x66e   : > { %7568 = vmatpush1.bf16.xpose.msra.mxu1 %v8830_v21  ;;  %7526 = vmatprep.subr.bf16.mxu0 %v8821_v23  ;;  %v8902_v21 = vcombine.low %v4473_v14, %v4477_v15  ;;  %v8893_v23 = vcombine.high %v4464_v31, %v4468_v56  ;;  %v4422_v37 = vld [vmem:[%s9473_s23 + $0x9f0] sm:$0xff]  ;;  %v4419_v14 = vld [vmem:[%s9473_s23 + $0x9d8] sm:$0xff] }
 0x66f   : > { %7569 = vmatprep.subr.bf16.mxu1 %v8823_v59  ;;  %v8895_v59 = vcombine.high %v4465_v17, %v4469_v20  ;;  %v4423_v15 = vld [vmem:[%s9473_s23 + $0x9f8] sm:$0xff] }
 0x675   : > { %7527 = vmatpush1.bf16.xpose.msra.mxu0 %v8820_v51  ;;  %v8892_v51 = vcombine.low %v4464_v31, %v4468_v56  ;;  %v4410_v31 = vld [vmem:[%s9473_s23 + $0x990] sm:$0xff] }
 0x676   : > { %7570 = vmatpush1.bf16.xpose.msra.mxu1 %v8822_v35  ;;  %7528 = vmatprep.subr.bf16.mxu0 %v8813_v52  ;;  %v8894_v35 = vcombine.low %v4465_v17, %v4469_v20  ;;  %v8885_v52 = vcombine.high %v4456_v44, %v4460_v49  ;;  %v4414_v56 = vld [vmem:[%s9473_s23 + $0x9b0] sm:$0xff]  ;;  %v8848_v17 = vcombine.low %v4418_v25, %v4422_v37  ;;  %v4411_v20 = vld [vmem:[%s9473_s23 + $0x998] sm:$0xff] }
 0x677   : > { %7571 = vmatprep.subr.bf16.mxu1 %v8815_v1  ;;  %v8887_v1 = vcombine.high %v4457_v43, %v4461_v47 }
 0x67d   : > { %7529 = vmatpush1.bf16.xpose.msra.mxu0 %v8812_v54  ;;  %v8884_v54 = vcombine.low %v4456_v44, %v4460_v49  ;;  %v4402_v44 = vld [vmem:[%s9473_s23 + $0x950] sm:$0xff] }
 0x67e   : > { %7572 = vmatpush1.bf16.xpose.msra.mxu1 %v8814_v12  ;;  %7530 = vmatprep.subr.bf16.mxu0 %v8805_v30  ;;  %v8886_v12 = vcombine.low %v4457_v43, %v4461_v47  ;;  %v8877_v30 = vcombine.high %v4448_v50, %v4452_v53  ;;  %v4406_v49 = vld [vmem:[%s9473_s23 + $0x970] sm:$0xff]  ;;  %v4403_v43 = vld [vmem:[%s9473_s23 + $0x958] sm:$0xff] }
 0x67f   : > { %7573 = vmatprep.subr.bf16.mxu1 %v8807_v55  ;;  %v8879_v55 = vcombine.high %v4449_v40, %v4453_v46  ;;  %v4407_v47 = vld [vmem:[%s9473_s23 + $0x978] sm:$0xff] }
 0x685   : > { %7531 = vmatpush1.bf16.xpose.msra.mxu0 %v8804_v57  ;;  %v8876_v57 = vcombine.low %v4448_v50, %v4452_v53  ;;  %v4394_v50 = vld [vmem:[%s9473_s23 + $0x910] sm:$0xff] }
 0x686   : > { %7574 = vmatpush1.bf16.xpose.msra.mxu1 %v8806_v58  ;;  %7532 = vmatprep.subr.bf16.mxu0 %v8797_v42  ;;  %v8878_v58 = vcombine.low %v4449_v40, %v4453_v46  ;;  %v8869_v42 = vcombine.high %v4440_v28, %v4444_v0  ;;  %v4398_v53 = vld [vmem:[%s9473_s23 + $0x930] sm:$0xff]  ;;  %v4395_v40 = vld [vmem:[%s9473_s23 + $0x918] sm:$0xff] }
 0x687   : > { %7575 = vmatprep.subr.bf16.mxu1 %v8799_v18  ;;  %v8871_v18 = vcombine.high %v4441_v4, %v4445_v27  ;;  %v4399_v46 = vld [vmem:[%s9473_s23 + $0x938] sm:$0xff] }
 0x68d   : > { %7533 = vmatpush1.bf16.xpose.msra.mxu0 %v8796_v62  ;;  %v8868_v62 = vcombine.low %v4440_v28, %v4444_v0  ;;  %v4386_v28 = vld [vmem:[%s9473_s23 + $0x8d0] sm:$0xff] }
 0x68e   : > { %7576 = vmatpush1.bf16.xpose.msra.mxu1 %v8798_v26  ;;  %7534 = vmatprep.subr.bf16.mxu0 %v8789_v5  ;;  %v8870_v26 = vcombine.low %v4441_v4, %v4445_v27  ;;  %v8861_v5 = vcombine.high %v4432_v24, %v4436_v61  ;;  %v4390_v0 = vld [vmem:[%s9473_s23 + $0x8f0] sm:$0xff]  ;;  %v4387_v4 = vld [vmem:[%s9473_s23 + $0x8d8] sm:$0xff] }
 0x68f   : > { %7577 = vmatprep.subr.bf16.mxu1 %v8791_v6  ;;  %v8863_v6 = vcombine.high %v4433_v13, %v4437_v16  ;;  %v4391_v27 = vld [vmem:[%s9473_s23 + $0x8f8] sm:$0xff] }
 0x695   : > { %7535 = vmatpush1.bf16.xpose.msra.mxu0 %v8788_v9  ;;  %v8860_v9 = vcombine.low %v4432_v24, %v4436_v61  ;;  %v4378_v24 = vld [vmem:[%s9473_s23 + $0x890] sm:$0xff] }
 0x696   : > { %7578 = vmatpush1.bf16.xpose.msra.mxu1 %v8790_v48  ;;  %7536 = vmatprep.subr.bf16.mxu0 %v8909_v34  ;;  %v8862_v48 = vcombine.low %v4433_v13, %v4437_v16  ;;  %v8853_v34 = vcombine.high %v4424_v41, %v4428_v7  ;;  %v4382_v61 = vld [vmem:[%s9473_s23 + $0x8b0] sm:$0xff]  ;;  %v4379_v13 = vld [vmem:[%s9473_s23 + $0x898] sm:$0xff] }
 0x697   : > { %7579 = vmatprep.subr.bf16.mxu1 %v8911_v36  ;;  %v8855_v36 = vcombine.high %v4425_v33, %v4429_v8  ;;  %v4383_v16 = vld [vmem:[%s9473_s23 + $0x8b8] sm:$0xff] }
 0x69d   : > { %7537 = vmatpush2.bf16.xpose.msra.mxu0 %v8908_v2  ;;  %v8852_v2 = vcombine.low %v4424_v41, %v4428_v7  ;;  %v4370_v41 = vld [vmem:[%s9473_s23 + $0x850] sm:$0xff] }
 0x69e   : > { %7580 = vmatpush2.bf16.xpose.msra.mxu1 %v8910_v3  ;;  %7538 = vmatprep.subr.bf16.mxu0 %v8901_v19  ;;  %v8854_v3 = vcombine.low %v4425_v33, %v4429_v8  ;;  %v8849_v19 = vcombine.high %v4418_v25, %v4422_v37  ;;  %v4374_v7 = vld [vmem:[%s9473_s23 + $0x870] sm:$0xff]  ;;  %v4371_v33 = vld [vmem:[%s9473_s23 + $0x858] sm:$0xff] }
 0x69f   : > { %7581 = vmatprep.subr.bf16.mxu1 %v8903_v29  ;;  %v8851_v29 = vcombine.high %v4419_v14, %v4423_v15  ;;  %v4375_v8 = vld [vmem:[%s9473_s23 + $0x878] sm:$0xff]  ;;  %v4362_v25 = vld [vmem:[%s9473_s23 + $0x810] sm:$0xff] }
 0x6a0   : > { %v4366_v37 = vld [vmem:[%s9473_s23 + $0x830] sm:$0xff] }
 0x6a5   : > { %7539 = vmatpush2.bf16.xpose.msra.mxu0 %v8900_v45  ;;  %v4415_v45 = vld [vmem:[%s9473_s23 + $0x9b8] sm:$0xff] }
 0x6a6   : > { %7582 = vmatpush2.bf16.xpose.msra.mxu1 %v8902_v21  ;;  %7540 = vmatprep.subr.bf16.mxu0 %v8893_v23  ;;  %v8850_v21 = vcombine.low %v4419_v14, %v4423_v15  ;;  %v8841_v23 = vcombine.high %v4410_v31, %v4414_v56  ;;  %v4363_v14 = vld [vmem:[%s9473_s23 + $0x818] sm:$0xff] }
 0x6a7   : > { %7583 = vmatprep.subr.bf16.mxu1 %v8895_v59  ;;  %v8843_v59 = vcombine.high %v4411_v20, %v4415_v45  ;;  %v4367_v15 = vld [vmem:[%s9473_s23 + $0x838] sm:$0xff] }
 0x6ad   : > { %7541 = vmatpush2.bf16.xpose.msra.mxu0 %v8892_v51  ;;  %v8840_v51 = vcombine.low %v4410_v31, %v4414_v56  ;;  %v7382_v31 = vpop.f32.mrf.mxu0  ;;  %v7425_v56 = vpop.f32.mrf.mxu1 }
 0x6ae   : > { %7584 = vmatpush2.bf16.xpose.msra.mxu1 %v8894_v35  ;;  %7542 = vmatprep.subr.bf16.mxu0 %v8885_v52  ;;  %v8842_v35 = vcombine.low %v4411_v20, %v4415_v45  ;;  %v8833_v52 = vcombine.high %v4402_v44, %v4406_v49  ;;  %v4486_v20 = vld [vmem:[%s9473_s23 + $0xbf0] sm:$0xff]  ;;  %v4483_v45 = vld [vmem:[%s9473_s23 + $0xbd8] sm:$0xff] }
 0x6af   : > { %7585 = vmatprep.subr.bf16.mxu1 %v8887_v1  ;;  %v8835_v1 = vcombine.high %v4403_v43, %v4407_v47 }
 0x6b5   : > { %7543 = vmatpush2.bf16.xpose.msra.mxu0 %v8884_v54  ;;  %v8832_v54 = vcombine.low %v4402_v44, %v4406_v49  ;;  %v8794_v44 = vcombine.low %v4363_v14, %v4367_v15 }
 0x6b6   : > { %7586 = vmatpush2.bf16.xpose.msra.mxu1 %v8886_v12  ;;  %7544 = vmatprep.subr.bf16.mxu0 %v8877_v30  ;;  %v8834_v12 = vcombine.low %v4403_v43, %v4407_v47  ;;  %v8825_v30 = vcombine.high %v4394_v50, %v4398_v53  ;;  %v7427_v43 = vpop.f32.mrf.mxu1 }
 0x6b7   : > { %7587 = vmatprep.subr.bf16.mxu1 %v8879_v55  ;;  %v8827_v55 = vcombine.high %v4395_v40, %v4399_v46 }
 0x6bd   : > { %7545 = vmatpush2.bf16.xpose.msra.mxu0 %v8876_v57  ;;  %v8824_v57 = vcombine.low %v4394_v50, %v4398_v53  ;;  %v4475_v50 = vld [vmem:[%s9473_s23 + $0xb98] sm:$0xff] }
 0x6be   : > { %7588 = vmatpush2.bf16.xpose.msra.mxu1 %v8878_v58  ;;  %7546 = vmatprep.subr.bf16.mxu0 %v8869_v42  ;;  %v8826_v58 = vcombine.low %v4395_v40, %v4399_v46  ;;  %v8817_v42 = vcombine.high %v4386_v28, %v4390_v0  ;;  %v4479_v53 = vld [vmem:[%s9473_s23 + $0xbb8] sm:$0xff] }
 0x6bf   : > { %7589 = vmatprep.subr.bf16.mxu1 %v8871_v18  ;;  %v8819_v18 = vcombine.high %v4387_v4, %v4391_v27 }
 0x6c5   : > { %7547 = vmatpush2.bf16.xpose.msra.mxu0 %v8868_v62  ;;  %v8816_v62 = vcombine.low %v4386_v28, %v4390_v0  ;;  %v8907_v28 = vcombine.high %v4475_v50, %v4479_v53 }
 0x6c6   : > { %7590 = vmatpush2.bf16.xpose.msra.mxu1 %v8870_v26  ;;  %7548 = vmatprep.subr.bf16.mxu0 %v8861_v5  ;;  %v8818_v26 = vcombine.low %v4387_v4, %v4391_v27  ;;  %v8809_v5 = vcombine.high %v4378_v24, %v4382_v61 }
 0x6c7   : > { %7591 = vmatprep.subr.bf16.mxu1 %v8863_v6  ;;  %v8811_v6 = vcombine.high %v4379_v13, %v4383_v16 }
 0x6cd   : > { %7549 = vmatpush2.bf16.xpose.msra.mxu0 %v8860_v9  ;;  %v8808_v9 = vcombine.low %v4378_v24, %v4382_v61 }
 0x6ce   : > { %7592 = vmatpush2.bf16.xpose.msra.mxu1 %v8862_v48  ;;  %7550 = vmatprep.subr.bf16.mxu0 %v8853_v34  ;;  %v8810_v48 = vcombine.low %v4379_v13, %v4383_v16  ;;  %v8801_v34 = vcombine.high %v4370_v41, %v4374_v7  ;;  %v4466_v16 = vld [vmem:[%s9473_s23 + $0xb50] sm:$0xff] }
 0x6cf   : > { %7593 = vmatprep.subr.bf16.mxu1 %v8855_v36  ;;  %v8803_v36 = vcombine.high %v4371_v33, %v4375_v8 }
 0x6d5   : > { %7551 = vmatpush2.bf16.xpose.msra.mxu0 %v8852_v2  ;;  %v8800_v2 = vcombine.low %v4370_v41, %v4374_v7  ;;  %v4467_v41 = vld [vmem:[%s9473_s23 + $0xb58] sm:$0xff] }
 0x6d6   : > { %7594 = vmatpush2.bf16.xpose.msra.mxu1 %v8854_v3  ;;  %7606 = vmatprep.subr.bf16.mxu0 %v8849_v19  ;;  %v8802_v3 = vcombine.low %v4371_v33, %v4375_v8  ;;  %v8793_v19 = vcombine.high %v4362_v25, %v4366_v37  ;;  %v4471_v7 = vld [vmem:[%s9473_s23 + $0xb78] sm:$0xff] }
 0x6d7   : > { %7649 = vmatprep.subr.bf16.mxu1 %v8851_v29  ;;  %v8795_v29 = vcombine.high %v4363_v14, %v4367_v15 }
 0x6dc   : > { %7553 = vmatmul.mubr.bf16.vlgmr.msra.gmra.mxu0 %v9760_v60 }
 0x6dd   : > { %7596 = vmatmul.mubr.bf16.vlgmr.msra.gmra.mxu1 %v9920_v63  ;;  %7607 = vmatpush1.bf16.xpose.msra.mxu0 %v8848_v17  ;;  %v4482_v17 = vld [vmem:[%s9473_s23 + $0xbd0] sm:$0xff] }
 0x6de   : > { %7638 = vmatprep.mubr.bf16.mxu0 %v10204_v10  ;;  %7650 = vmatpush1.bf16.xpose.msra.mxu1 %v8850_v21  ;;  %v4487_v21 = vld [vmem:[%s9473_s23 + $0xbf8] sm:$0xff]  ;;  %v8913_v49 = vcombine.high %v4482_v17, %v4486_v20  ;;  %v8912_v40 = vcombine.low %v4482_v17, %v4486_v20 }
 0x6df   : > { %7681 = vmatprep.mubr.bf16.mxu1 %v10265_v11  ;;  %7608 = vmatprep.subr.bf16.mxu0 %v8841_v23  ;;  %v8792_v23 = vcombine.low %v4362_v25, %v4366_v37  ;;  %v8915_v47 = vcombine.high %v4483_v45, %v4487_v21  ;;  %v8906_v37 = vcombine.low %v4475_v50, %v4479_v53 }
 0x6e0   : > { %7651 = vmatprep.subr.bf16.mxu1 %v8843_v59  ;;  %v7384_v59 = vpop.f32.mrf.mxu0 }
 0x6e1   : > { %v7428_v4 = vadd.f32 %v7427_v43, %v7384_v59  ;;  %v4463_v59 = vld [vmem:[%s9473_s23 + $0xb38] sm:$0xff] }
 0x6e5   : > { %7609 = vmatpush1.bf16.xpose.msra.mxu0 %v8840_v51  ;;  %v7386_v51 = vpop.f32.mrf.mxu0 }
 0x6e6   : > { %7652 = vmatpush1.bf16.xpose.msra.mxu1 %v8842_v35  ;;  %7610 = vmatprep.subr.bf16.mxu0 %v8833_v52  ;;  %v7429_v35 = vpop.f32.mrf.mxu1  ;;  %v4474_v52 = vld [vmem:[%s9473_s23 + $0xb90] sm:$0xff] }
 0x6e7   : > { %7653 = vmatprep.subr.bf16.mxu1 %v8835_v1  ;;  %v4478_v1 = vld [vmem:[%s9473_s23 + $0xbb0] sm:$0xff]  ;;  %v7388_v46 = vpop.f32.mrf.mxu0 }
 0x6ed   : > { %7611 = vmatpush1.bf16.xpose.msra.mxu0 %v8832_v54  ;;  %v8914_v54 = vcombine.low %v4483_v45, %v4487_v21  ;;  %v4458_v45 = vld [vmem:[%s9473_s23 + $0xb10] sm:$0xff] }
 0x6ee   : > { %7654 = vmatpush1.bf16.xpose.msra.mxu1 %v8834_v12  ;;  %7612 = vmatprep.subr.bf16.mxu0 %v8825_v30  ;;  %v8905_v12 = vcombine.high %v4474_v52, %v4478_v1  ;;  %v7426_v30 = vadd.f32 %v7425_v56, %v7382_v31  ;;  %v4462_v21 = vld [vmem:[%s9473_s23 + $0xb30] sm:$0xff] }
 0x6ef   : > { %7655 = vmatprep.subr.bf16.mxu1 %v8827_v55  ;;  %v7431_v55 = vpop.f32.mrf.mxu1  ;;  %v8889_v43 = vcombine.high %v4458_v45, %v4462_v21  ;;  %v8888_v50 = vcombine.low %v4458_v45, %v4462_v21  ;;  %v4528_v45 = vld [vmem:[%s9473_s23 + $0xd40] sm:$0xff] }
 0x6f0   : > { %v4532_v21 = vld [vmem:[%s9473_s23 + $0xd60] sm:$0xff] }
 0x6f5   : > { %7613 = vmatpush1.bf16.xpose.msra.mxu0 %v8824_v57 }
 0x6f6   : > { %7656 = vmatpush1.bf16.xpose.msra.mxu1 %v8826_v58  ;;  %7614 = vmatprep.subr.bf16.mxu0 %v8817_v42  ;;  %v4090_v58 = vld [vmem:[#allocation8 + $0x10] sm:$0xff] }
 0x6f7   : > { %7657 = vmatprep.subr.bf16.mxu1 %v8819_v18  ;;  %v7430_v18 = vadd.f32 %v7429_v35, %v7386_v51  ;;  %v4450_v51 = vld [vmem:[%s9473_s23 + $0xad0] sm:$0xff] }
 0x6f8   : > { %v4454_v35 = vld [vmem:[%s9473_s23 + $0xaf0] sm:$0xff] }
 0x6fd   : > { %7615 = vmatpush1.bf16.xpose.msra.mxu0 %v8816_v62  ;;  %v4470_v62 = vld [vmem:[%s9473_s23 + $0xb70] sm:$0xff] }
 0x6fe   : > { %7658 = vmatpush1.bf16.xpose.msra.mxu1 %v8818_v26  ;;  %7616 = vmatprep.subr.bf16.mxu0 %v8809_v5  ;;  %v7432_v26 = vadd.f32 %v7431_v55, %v7388_v46  ;;  %v4091_v5 = vld [vmem:[#allocation8 + $0x18] sm:$0xff]  ;;  %v8897_v14 = vcombine.high %v4466_v16, %v4470_v62 }
 0x6ff   : > { %7659 = vmatprep.subr.bf16.mxu1 %v8811_v6  ;;  %v4447_v55 = vld [vmem:[%s9473_s23 + $0xab8] sm:$0xff] }
 0x705   : > { %7617 = vmatpush1.bf16.xpose.msra.mxu0 %v8808_v9 }
 0x706   : > { %7660 = vmatpush1.bf16.xpose.msra.mxu1 %v8810_v48  ;;  %7618 = vmatprep.subr.bf16.mxu0 %v8801_v34  ;;  %v8904_v34 = vcombine.low %v4474_v52, %v4478_v1  ;;  %v4451_v52 = vld [vmem:[%s9473_s23 + $0xad8] sm:$0xff] }
 0x707   : > { %7661 = vmatprep.subr.bf16.mxu1 %v8803_v36  ;;  %v4098_v36 = vld [vmem:[#allocation8 + $0x50] sm:$0xff]  ;;  %v4455_v1 = vld [vmem:[%s9473_s23 + $0xaf8] sm:$0xff] }
 0x708   : > { %v8883_v46 = vcombine.high %v4451_v52, %v4455_v1 }
 0x70d   : > { %7619 = vmatpush1.bf16.xpose.msra.mxu0 %v8800_v2 }
 0x70e   : > { %7662 = vmatpush1.bf16.xpose.msra.mxu1 %v8802_v3  ;;  %7620 = vmatprep.subr.bf16.mxu0 %v8793_v19  ;;  %v8899_v19 = vcombine.high %v4467_v41, %v4471_v7 }
 0x70f   : > { %7663 = vmatprep.subr.bf16.mxu1 %v8795_v29  ;;  %v4099_v29 = vld [vmem:[#allocation8 + $0x58] sm:$0xff] }
 0x715   : > { %7621 = vmatpush1.bf16.xpose.msra.mxu0 %v8792_v23  ;;  %v4459_v23 = vld [vmem:[%s9473_s23 + $0xb18] sm:$0xff] }
 0x716   : > { %7664 = vmatpush1.bf16.xpose.msra.mxu1 %v8794_v44  ;;  %7622 = vmatprep.subr.bf16.mxu0 %v8913_v49  ;;  %v8896_v44 = vcombine.low %v4466_v16, %v4470_v62  ;;  %v8898_v49 = vcombine.low %v4467_v41, %v4471_v7  ;;  %v8890_v53 = vcombine.low %v4459_v23, %v4463_v59  ;;  %v4426_v62 = vld [vmem:[%s9473_s23 + $0xa10] sm:$0xff] }
 0x717   : > { %7665 = vmatprep.subr.bf16.mxu1 %v8915_v47  ;;  %v8891_v47 = vcombine.high %v4459_v23, %v4463_v59  ;;  %v4529_v23 = vld [vmem:[%s9473_s23 + $0xd48] sm:$0xff] }
 0x718   : > { %v4533_v59 = vld [vmem:[%s9473_s23 + $0xd68] sm:$0xff] }
 0x71c   : > { %v7468_v0 = vpop.f32.mrf.mxu0 }
 0x71d   : > { %v7469_v27 = vadd.f32 %v7468_v0, %v7426_v30  ;;  %v7511_v57 = vpop.f32.mrf.mxu1  ;;  %7623 = vmatpush2.bf16.xpose.msra.mxu0 %v8912_v40  ;;  %v8881_v40 = vcombine.high %v4450_v51, %v4454_v35  ;;  %v4443_v30 = vld [vmem:[%s9473_s23 + $0xa98] sm:$0xff]  ;;  %v8882_v0 = vcombine.low %v4451_v52, %v4455_v1  ;;  %v8956_v52 = vcombine.low %v4528_v45, %v4532_v21 }
 0x71e   : > { %7666 = vmatpush2.bf16.xpose.msra.mxu1 %v8914_v54  ;;  %v7470_v42 = vpop.f32.mrf.mxu0  ;;  %7624 = vmatprep.subr.bf16.mxu0 %v8905_v12  ;;  %v4442_v54 = vld [vmem:[%s9473_s23 + $0xa90] sm:$0xff]  ;;  %v8958_v1 = vcombine.low %v4529_v23, %v4533_v59 }
 0x71f   : > { %v7512_v24 = vadd.f32 %v7511_v57, %v7469_v27  ;;  %v7471_v61 = vadd.f32 %v7470_v42, %v7428_v4  ;;  %v7513_v13 = vpop.f32.mrf.mxu1  ;;  %7667 = vmatprep.subr.bf16.mxu1 %v8907_v28  ;;  %v4446_v12 = vld [vmem:[%s9473_s23 + $0xab0] sm:$0xff]  ;;  %v8880_v28 = vcombine.low %v4450_v51, %v4454_v35  ;;  %v8875_v27 = vcombine.high %v4443_v30, %v4447_v55  ;;  %v4435_v42 = vld [vmem:[%s9473_s23 + $0xa58] sm:$0xff]  ;;  %v4521_v51 = vld [vmem:[%s9473_s23 + $0xd08] sm:$0xff] }
 0x720   : > { %v7472_v6 = vpop.f32.mrf.mxu0  ;;  %v8873_v4 = vcombine.high %v4442_v54, %v4446_v12  ;;  %v4434_v57 = vld [vmem:[%s9473_s23 + $0xa50] sm:$0xff]  ;;  %v4525_v35 = vld [vmem:[%s9473_s23 + $0xd28] sm:$0xff] }
 0x721   : > { %v7866_v33 = vadd.f32 %v7512_v24, %v4090_v58  ;;  %v7514_v8 = vadd.f32 %v7513_v13, %v7471_v61  ;;  %v7473_v9 = vadd.f32 %v7472_v6, %v7430_v18  ;;  %v7515_v48 = vpop.f32.mrf.mxu1  ;;  %v4438_v58 = vld [vmem:[%s9473_s23 + $0xa70] sm:$0xff]  ;;  %v4439_v18 = vld [vmem:[%s9473_s23 + $0xa78] sm:$0xff]  ;;  %v8872_v24 = vcombine.low %v4442_v54, %v4446_v12  ;;  %v4513_v54 = vld [vmem:[%s9473_s23 + $0xcc8] sm:$0xff] }
 0x722   : > { %v7474_v25 = vpop.f32.mrf.mxu0  ;;  %v8874_v61 = vcombine.low %v4443_v30, %v4447_v55  ;;  %v8865_v13 = vcombine.high %v4434_v57, %v4438_v58  ;;  %v8867_v16 = vcombine.high %v4435_v42, %v4439_v18  ;;  %v4431_v6 = vld [vmem:[%s9473_s23 + $0xa38] sm:$0xff]  ;;  %v8864_v41 = vcombine.low %v4434_v57, %v4438_v58  ;;  %v4517_v12 = vld [vmem:[%s9473_s23 + $0xce8] sm:$0xff] }
 0x723   : > { %7882 = vst [vmem:[#allocation8 + $0x10] sm:$0xff] %v7866_v33  ;;  %v7867_v15 = vadd.f32 %v7514_v8, %v4091_v5  ;;  %v7516_v2 = vadd.f32 %v7515_v48, %v7473_v9  ;;  %v7475_v3 = vadd.f32 %v7474_v25, %v7432_v26  ;;  %v7517_v31 = vpop.f32.mrf.mxu1  ;;  %v4430_v26 = vld [vmem:[%s9473_s23 + $0xa30] sm:$0xff]  ;;  %v4427_v5 = vld [vmem:[%s9473_s23 + $0xa18] sm:$0xff]  ;;  %v8866_v7 = vcombine.low %v4435_v42, %v4439_v18  ;;  %v4544_v9 = vld [vmem:[%s9473_s23 + $0xdc0] sm:$0xff] }
 0x724   : > { %v8857_v33 = vcombine.high %v4426_v62, %v4430_v26  ;;  %v8859_v8 = vcombine.high %v4427_v5, %v4431_v6  ;;  %v4548_v48 = vld [vmem:[%s9473_s23 + $0xde0] sm:$0xff]  ;;  %v8856_v25 = vcombine.low %v4426_v62, %v4430_v26  ;;  %v8950_v55 = vcombine.low %v4521_v51, %v4525_v35  ;;  %v4505_v57 = vld [vmem:[%s9473_s23 + $0xc88] sm:$0xff] }
 0x725   : > { %7883 = vst [vmem:[#allocation8 + $0x18] sm:$0xff] %v7867_v15  ;;  %v7874_v56 = vadd.f32 %v7516_v2, %v4098_v36  ;;  %v7518_v17 = vadd.f32 %v7517_v31, %v7475_v3  ;;  %7625 = vmatpush2.bf16.xpose.msra.mxu0 %v8904_v34  ;;  %v4545_v34 = vld [vmem:[%s9473_s23 + $0xdc8] sm:$0xff]  ;;  %v4536_v2 = vld [vmem:[%s9473_s23 + $0xd80] sm:$0xff]  ;;  %v8942_v18 = vcombine.low %v4513_v54, %v4517_v12 }
 0x726   : > { %7668 = vmatpush2.bf16.xpose.msra.mxu1 %v8906_v37  ;;  %7626 = vmatprep.subr.bf16.mxu0 %v8897_v14  ;;  %v4549_v36 = vld [vmem:[%s9473_s23 + $0xde8] sm:$0xff]  ;;  %v8858_v37 = vcombine.low %v4427_v5, %v4431_v6  ;;  %v8973_v14 = vcombine.high %v4544_v9, %v4548_v48  ;;  %v4540_v3 = vld [vmem:[%s9473_s23 + $0xda0] sm:$0xff] }
 0x727   : > { %7890 = vst [vmem:[#allocation8 + $0x50] sm:$0xff] %v7874_v56  ;;  %v7875_v20 = vadd.f32 %v7518_v17, %v4099_v29  ;;  %7669 = vmatprep.subr.bf16.mxu1 %v8899_v19  ;;  %v8975_v15 = vcombine.high %v4545_v34, %v4549_v36  ;;  %v8972_v19 = vcombine.low %v4544_v9, %v4548_v48  ;;  %v4537_v29 = vld [vmem:[%s9473_s23 + $0xd88] sm:$0xff] }
 0x728   : > { %v4541_v31 = vld [vmem:[%s9473_s23 + $0xda8] sm:$0xff]  ;;  %v8974_v56 = vcombine.low %v4545_v34, %v4549_v36  ;;  %v8965_v17 = vcombine.high %v4536_v2, %v4540_v3 }
 0x729   : > { %7891 = vst [vmem:[#allocation8 + $0x58] sm:$0xff] %v7875_v20  ;;  %v8967_v20 = vcombine.high %v4537_v29, %v4541_v31  ;;  %v4509_v58 = vld [vmem:[%s9473_s23 + $0xca8] sm:$0xff] }
 0x72a   : > { %v4497_v62 = vld [vmem:[%s9473_s23 + $0xc48] sm:$0xff]  ;;  %v8934_v6 = vcombine.low %v4505_v57, %v4509_v58 }
 0x72b   : > { %v4501_v26 = vld [vmem:[%s9473_s23 + $0xc68] sm:$0xff] }
 0x72c   : > { %v4489_v9 = vld [vmem:[%s9473_s23 + $0xc08] sm:$0xff]  ;;  %v8926_v36 = vcombine.low %v4497_v62, %v4501_v26 }
 0x72d   : > { %7627 = vmatpush2.bf16.xpose.msra.mxu0 %v8896_v44  ;;  %v8964_v44 = vcombine.low %v4536_v2, %v4540_v3  ;;  %v4493_v48 = vld [vmem:[%s9473_s23 + $0xc28] sm:$0xff] }
 0x72e   : > { %7670 = vmatpush2.bf16.xpose.msra.mxu1 %v8898_v49  ;;  %7628 = vmatprep.subr.bf16.mxu0 %v8889_v43  ;;  %v8966_v49 = vcombine.low %v4537_v29, %v4541_v31  ;;  %v8957_v43 = vcombine.high %v4528_v45, %v4532_v21  ;;  %v4609_v2 = vld [vmem:[%s9473_s23 + $0xfc8] sm:$0xff]  ;;  %v8918_v29 = vcombine.low %v4489_v9, %v4493_v48 }
 0x72f   : > { %7671 = vmatprep.subr.bf16.mxu1 %v8891_v47  ;;  %v8959_v47 = vcombine.high %v4529_v23, %v4533_v59  ;;  %v4613_v3 = vld [vmem:[%s9473_s23 + $0xfe8] sm:$0xff] }
 0x730   : > { %v4601_v45 = vld [vmem:[%s9473_s23 + $0xf88] sm:$0xff]  ;;  %v9038_v59 = vcombine.low %v4609_v2, %v4613_v3 }
 0x731   : > { %v4605_v21 = vld [vmem:[%s9473_s23 + $0xfa8] sm:$0xff] }
 0x735   : > { %7629 = vmatpush2.bf16.xpose.msra.mxu0 %v8888_v50 }
 0x736   : > { %7672 = vmatpush2.bf16.xpose.msra.mxu1 %v8890_v53  ;;  %7630 = vmatprep.subr.bf16.mxu0 %v8881_v40  ;;  %v8951_v53 = vcombine.high %v4521_v51, %v4525_v35  ;;  %v4512_v40 = vld [vmem:[%s9473_s23 + $0xcc0] sm:$0xff]  ;;  %v9030_v35 = vcombine.low %v4601_v45, %v4605_v21 }
 0x737   : > { %7673 = vmatprep.subr.bf16.mxu1 %v8883_v46  ;;  %v4516_v46 = vld [vmem:[%s9473_s23 + $0xce0] sm:$0xff] }
 0x738   : > { %v8940_v42 = vcombine.low %v4512_v40, %v4516_v46 }
 0x73d   : > { %7631 = vmatpush2.bf16.xpose.msra.mxu0 %v8880_v28  ;;  %v8941_v28 = vcombine.high %v4512_v40, %v4516_v46  ;;  %v4585_v40 = vld [vmem:[%s9473_s23 + $0xf08] sm:$0xff] }
 0x73e   : > { %7674 = vmatpush2.bf16.xpose.msra.mxu1 %v8882_v0  ;;  %7632 = vmatprep.subr.bf16.mxu0 %v8873_v4  ;;  %v8943_v0 = vcombine.high %v4513_v54, %v4517_v12  ;;  %v4504_v4 = vld [vmem:[%s9473_s23 + $0xc80] sm:$0xff]  ;;  %v4589_v46 = vld [vmem:[%s9473_s23 + $0xf28] sm:$0xff] }
 0x73f   : > { %7675 = vmatprep.subr.bf16.mxu1 %v8875_v27  ;;  %v4508_v27 = vld [vmem:[%s9473_s23 + $0xca0] sm:$0xff] }
 0x740   : > { %v8932_v5 = vcombine.low %v4504_v4, %v4508_v27 }
 0x745   : > { %7633 = vmatpush2.bf16.xpose.msra.mxu0 %v8872_v24  ;;  %v8933_v24 = vcombine.high %v4504_v4, %v4508_v27  ;;  %v4577_v4 = vld [vmem:[%s9473_s23 + $0xec8] sm:$0xff] }
 0x746   : > { %7676 = vmatpush2.bf16.xpose.msra.mxu1 %v8874_v61  ;;  %7634 = vmatprep.subr.bf16.mxu0 %v8865_v13  ;;  %v8935_v61 = vcombine.high %v4505_v57, %v4509_v58  ;;  %v4496_v13 = vld [vmem:[%s9473_s23 + $0xc40] sm:$0xff]  ;;  %v4581_v27 = vld [vmem:[%s9473_s23 + $0xee8] sm:$0xff]  ;;  %v9014_v58 = vcombine.low %v4585_v40, %v4589_v46 }
 0x747   : > { %7677 = vmatprep.subr.bf16.mxu1 %v8867_v16  ;;  %v4500_v16 = vld [vmem:[%s9473_s23 + $0xc60] sm:$0xff] }
 0x748   : > { %v8924_v34 = vcombine.low %v4496_v13, %v4500_v16 }
 0x74d   : > { %7635 = vmatpush2.bf16.xpose.msra.mxu0 %v8864_v41  ;;  %v8925_v41 = vcombine.high %v4496_v13, %v4500_v16  ;;  %v4569_v13 = vld [vmem:[%s9473_s23 + $0xe88] sm:$0xff] }
 0x74e   : > { %7678 = vmatpush2.bf16.xpose.msra.mxu1 %v8866_v7  ;;  %7636 = vmatprep.subr.bf16.mxu0 %v8857_v33  ;;  %v8927_v7 = vcombine.high %v4497_v62, %v4501_v26  ;;  %v4488_v33 = vld [vmem:[%s9473_s23 + $0xc00] sm:$0xff]  ;;  %v4573_v16 = vld [vmem:[%s9473_s23 + $0xea8] sm:$0xff]  ;;  %v9006_v26 = vcombine.low %v4577_v4, %v4581_v27 }
 0x74f   : > { %7679 = vmatprep.subr.bf16.mxu1 %v8859_v8  ;;  %v4492_v8 = vld [vmem:[%s9473_s23 + $0xc20] sm:$0xff] }
 0x755   : > { %7637 = vmatpush2.bf16.xpose.msra.mxu0 %v8856_v25  ;;  %v8917_v25 = vcombine.high %v4488_v33, %v4492_v8 }
 0x756   : > { %7680 = vmatpush2.bf16.xpose.msra.mxu1 %v8858_v37  ;;  %7692 = vmatprep.subr.bf16.mxu0 %v8973_v14  ;;  %v8919_v37 = vcombine.high %v4489_v9, %v4493_v48  ;;  %v4608_v14 = vld [vmem:[%s9473_s23 + $0xfc0] sm:$0xff]  ;;  %v8998_v48 = vcombine.low %v4569_v13, %v4573_v16 }
 0x757   : > { %7735 = vmatprep.subr.bf16.mxu1 %v8975_v15  ;;  %v4612_v15 = vld [vmem:[%s9473_s23 + $0xfe0] sm:$0xff] }
 0x758   : > { %v9037_v31 = vcombine.high %v4608_v14, %v4612_v15  ;;  %v9036_v23 = vcombine.low %v4608_v14, %v4612_v15  ;;  %v4553_v14 = vld [vmem:[%s9473_s23 + $0xe08] sm:$0xff] }
 0x759   : > { %v4557_v15 = vld [vmem:[%s9473_s23 + $0xe28] sm:$0xff] }
 0x75c   : > { %7639 = vmatmul.mubr.bf16.vlgmr.msra.gmra.mxu0 %v10080_v22 }
 0x75d   : > { %7682 = vmatmul.mubr.bf16.vlgmr.msra.gmra.mxu1 %v10300_v39  ;;  %7693 = vmatpush1.bf16.xpose.msra.mxu0 %v8972_v19  ;;  %v8916_v19 = vcombine.low %v4488_v33, %v4492_v8  ;;  %v4561_v33 = vld [vmem:[%s9473_s23 + $0xe48] sm:$0xff] }
 0x75e   : > { %7724 = vmatprep.mubr.bf16.mxu0 %v10126_v32  ;;  %7736 = vmatpush1.bf16.xpose.msra.mxu1 %v8974_v56  ;;  %v4520_v32 = vld [vmem:[%s9473_s23 + $0xd00] sm:$0xff]  ;;  %v9039_v56 = vcombine.high %v4609_v2, %v4613_v3  ;;  %v4565_v8 = vld [vmem:[%s9473_s23 + $0xe68] sm:$0xff] }
 0x75f   : > { %7767 = vmatprep.mubr.bf16.mxu1 %v10129_v38  ;;  %7694 = vmatprep.subr.bf16.mxu0 %v8965_v17  ;;  %v4524_v38 = vld [vmem:[%s9473_s23 + $0xd20] sm:$0xff]  ;;  %v8990_v3 = vcombine.low %v4561_v33, %v4565_v8 }
 0x760   : > { %7737 = vmatprep.subr.bf16.mxu1 %v8967_v20  ;;  %v8949_v50 = vcombine.high %v4520_v32, %v4524_v38  ;;  %v8948_v30 = vcombine.low %v4520_v32, %v4524_v38  ;;  %v4600_v17 = vld [vmem:[%s9473_s23 + $0xf80] sm:$0xff]  ;;  %v4593_v32 = vld [vmem:[%s9473_s23 + $0xf48] sm:$0xff] }
 0x761   : > { %v4604_v20 = vld [vmem:[%s9473_s23 + $0xfa0] sm:$0xff]  ;;  %v4597_v38 = vld [vmem:[%s9473_s23 + $0xf68] sm:$0xff] }
 0x762   : > { %v9028_v51 = vcombine.low %v4600_v17, %v4604_v20  ;;  %v9022_v12 = vcombine.low %v4593_v32, %v4597_v38 }
 0x765   : > { %7695 = vmatpush1.bf16.xpose.msra.mxu0 %v8964_v44  ;;  %v9029_v44 = vcombine.high %v4600_v17, %v4604_v20  ;;  %v4547_v17 = vld [vmem:[%s9473_s23 + $0xdd8] sm:$0xff] }
 0x766   : > { %7738 = vmatpush1.bf16.xpose.msra.mxu1 %v8966_v49  ;;  %7696 = vmatprep.subr.bf16.mxu0 %v8957_v43  ;;  %v9031_v49 = vcombine.high %v4601_v45, %v4605_v21  ;;  %v4592_v43 = vld [vmem:[%s9473_s23 + $0xf40] sm:$0xff]  ;;  %v4551_v20 = vld [vmem:[%s9473_s23 + $0xdf8] sm:$0xff]  ;;  %v8982_v21 = vcombine.low %v4553_v14, %v4557_v15 }
 0x767   : > { %7739 = vmatprep.subr.bf16.mxu1 %v8959_v47  ;;  %v4596_v47 = vld [vmem:[%s9473_s23 + $0xf60] sm:$0xff] }
 0x768   : > { %v9020_v54 = vcombine.low %v4592_v43, %v4596_v47 }
 0x76d   : > { %7697 = vmatpush1.bf16.xpose.msra.mxu0 %v8956_v52  ;;  %v9021_v52 = vcombine.high %v4592_v43, %v4596_v47  ;;  %v4539_v47 = vld [vmem:[%s9473_s23 + $0xd98] sm:$0xff] }
 0x76e   : > { %7740 = vmatpush1.bf16.xpose.msra.mxu1 %v8958_v1  ;;  %7698 = vmatprep.subr.bf16.mxu0 %v8949_v50  ;;  %v9023_v1 = vcombine.high %v4593_v32, %v4597_v38  ;;  %v4584_v50 = vld [vmem:[%s9473_s23 + $0xf00] sm:$0xff]  ;;  %v4543_v32 = vld [vmem:[%s9473_s23 + $0xdb8] sm:$0xff]  ;;  %v8978_v38 = vcombine.low %v4547_v17, %v4551_v20 }
 0x76f   : > { %7741 = vmatprep.subr.bf16.mxu1 %v8951_v53  ;;  %v4588_v53 = vld [vmem:[%s9473_s23 + $0xf20] sm:$0xff] }
 0x770   : > { %v9012_v57 = vcombine.low %v4584_v50, %v4588_v53 }
 0x775   : > { %7699 = vmatpush1.bf16.xpose.msra.mxu0 %v8948_v30  ;;  %v9013_v30 = vcombine.high %v4584_v50, %v4588_v53  ;;  %v4531_v50 = vld [vmem:[%s9473_s23 + $0xd58] sm:$0xff] }
 0x776   : > { %7742 = vmatpush1.bf16.xpose.msra.mxu1 %v8950_v55  ;;  %7700 = vmatprep.subr.bf16.mxu0 %v8941_v28  ;;  %v9015_v55 = vcombine.high %v4585_v40, %v4589_v46  ;;  %v4576_v28 = vld [vmem:[%s9473_s23 + $0xec0] sm:$0xff]  ;;  %v4535_v53 = vld [vmem:[%s9473_s23 + $0xd78] sm:$0xff]  ;;  %v8970_v40 = vcombine.low %v4539_v47, %v4543_v32 }
 0x777   : > { %7743 = vmatprep.subr.bf16.mxu1 %v8943_v0  ;;  %v4580_v0 = vld [vmem:[%s9473_s23 + $0xee0] sm:$0xff] }
 0x778   : > { %v9004_v62 = vcombine.low %v4576_v28, %v4580_v0 }
 0x77d   : > { %7701 = vmatpush1.bf16.xpose.msra.mxu0 %v8940_v42  ;;  %v9005_v42 = vcombine.high %v4576_v28, %v4580_v0 }
 0x77e   : > { %7744 = vmatpush1.bf16.xpose.msra.mxu1 %v8942_v18  ;;  %7702 = vmatprep.subr.bf16.mxu0 %v8933_v24  ;;  %v9007_v18 = vcombine.high %v4577_v4, %v4581_v27  ;;  %v4568_v24 = vld [vmem:[%s9473_s23 + $0xe80] sm:$0xff]  ;;  %v4514_v4 = vld [vmem:[%s9473_s23 + $0xcd0] sm:$0xff] }
 0x77f   : > { %7745 = vmatprep.subr.bf16.mxu1 %v8935_v61  ;;  %v4572_v61 = vld [vmem:[%s9473_s23 + $0xea0] sm:$0xff]  ;;  %v4518_v27 = vld [vmem:[%s9473_s23 + $0xcf0] sm:$0xff] }
 0x780   : > { %v8996_v9 = vcombine.low %v4568_v24, %v4572_v61 }
 0x785   : > { %7703 = vmatpush1.bf16.xpose.msra.mxu0 %v8932_v5  ;;  %v8997_v5 = vcombine.high %v4568_v24, %v4572_v61  ;;  %v8945_v24 = vcombine.high %v4514_v4, %v4518_v27 }
 0x786   : > { %7746 = vmatpush1.bf16.xpose.msra.mxu1 %v8934_v6  ;;  %7704 = vmatprep.subr.bf16.mxu0 %v8925_v41  ;;  %v8999_v6 = vcombine.high %v4569_v13, %v4573_v16  ;;  %v4560_v41 = vld [vmem:[%s9473_s23 + $0xe40] sm:$0xff]  ;;  %v4506_v13 = vld [vmem:[%s9473_s23 + $0xc90] sm:$0xff] }
 0x787   : > { %7747 = vmatprep.subr.bf16.mxu1 %v8927_v7  ;;  %v4564_v7 = vld [vmem:[%s9473_s23 + $0xe60] sm:$0xff]  ;;  %v4510_v16 = vld [vmem:[%s9473_s23 + $0xcb0] sm:$0xff] }
 0x788   : > { %v8988_v2 = vcombine.low %v4560_v41, %v4564_v7 }
 0x78d   : > { %7705 = vmatpush1.bf16.xpose.msra.mxu0 %v8924_v34  ;;  %v8989_v34 = vcombine.high %v4560_v41, %v4564_v7  ;;  %v8937_v41 = vcombine.high %v4506_v13, %v4510_v16 }
 0x78e   : > { %7748 = vmatpush1.bf16.xpose.msra.mxu1 %v8926_v36  ;;  %7706 = vmatprep.subr.bf16.mxu0 %v8917_v25  ;;  %v8991_v36 = vcombine.high %v4561_v33, %v4565_v8  ;;  %v4552_v25 = vld [vmem:[%s9473_s23 + $0xe00] sm:$0xff]  ;;  %v4498_v33 = vld [vmem:[%s9473_s23 + $0xc50] sm:$0xff] }
 0x78f   : > { %7749 = vmatprep.subr.bf16.mxu1 %v8919_v37  ;;  %v4556_v37 = vld [vmem:[%s9473_s23 + $0xe20] sm:$0xff]  ;;  %v4502_v8 = vld [vmem:[%s9473_s23 + $0xc70] sm:$0xff] }
 0x790   : > { %v8980_v45 = vcombine.low %v4552_v25, %v4556_v37 }
 0x795   : > { %7707 = vmatpush1.bf16.xpose.msra.mxu0 %v8916_v19  ;;  %v8981_v19 = vcombine.high %v4552_v25, %v4556_v37  ;;  %v8929_v25 = vcombine.high %v4498_v33, %v4502_v8 }
 0x796   : > { %7750 = vmatpush1.bf16.xpose.msra.mxu1 %v8918_v29  ;;  %7708 = vmatprep.subr.bf16.mxu0 %v9037_v31  ;;  %v8983_v29 = vcombine.high %v4553_v14, %v4557_v15  ;;  %v4546_v31 = vld [vmem:[%s9473_s23 + $0xdd0] sm:$0xff] }
 0x797   : > { %7751 = vmatprep.subr.bf16.mxu1 %v9039_v56  ;;  %v4550_v56 = vld [vmem:[%s9473_s23 + $0xdf0] sm:$0xff] }
 0x798   : > { %v8976_v43 = vcombine.low %v4546_v31, %v4550_v56  ;;  %v4490_v14 = vld [vmem:[%s9473_s23 + $0xc10] sm:$0xff] }
 0x799   : > { %v4494_v15 = vld [vmem:[%s9473_s23 + $0xc30] sm:$0xff] }
 0x79d   : > { %7709 = vmatpush2.bf16.xpose.msra.mxu0 %v9036_v23  ;;  %v8977_v23 = vcombine.high %v4546_v31, %v4550_v56  ;;  %v8921_v31 = vcombine.high %v4490_v14, %v4494_v15 }
 0x79e   : > { %7752 = vmatpush2.bf16.xpose.msra.mxu1 %v9038_v59  ;;  %7710 = vmatprep.subr.bf16.mxu0 %v9029_v44  ;;  %v8979_v59 = vcombine.high %v4547_v17, %v4551_v20  ;;  %v4538_v44 = vld [vmem:[%s9473_s23 + $0xd90] sm:$0xff]  ;;  %v7554_v17 = vpop.f32.mrf.mxu0  ;;  %v7597_v20 = vpop.f32.mrf.mxu1 }
 0x79f   : > { %7753 = vmatprep.subr.bf16.mxu1 %v9031_v49  ;;  %v4542_v49 = vld [vmem:[%s9473_s23 + $0xdb0] sm:$0xff] }
 0x7a5   : > { %7711 = vmatpush2.bf16.xpose.msra.mxu0 %v9028_v51  ;;  %v8969_v51 = vcombine.high %v4538_v44, %v4542_v49 }
 0x7a6   : > { %7754 = vmatpush2.bf16.xpose.msra.mxu1 %v9030_v35  ;;  %7712 = vmatprep.subr.bf16.mxu0 %v9021_v52  ;;  %v8971_v35 = vcombine.high %v4539_v47, %v4543_v32  ;;  %v4530_v52 = vld [vmem:[%s9473_s23 + $0xd50] sm:$0xff]  ;;  %v7599_v32 = vpop.f32.mrf.mxu1 }
 0x7a7   : > { %7755 = vmatprep.subr.bf16.mxu1 %v9023_v1  ;;  %v4534_v1 = vld [vmem:[%s9473_s23 + $0xd70] sm:$0xff] }
 0x7a8   : > { %v8961_v46 = vcombine.high %v4530_v52, %v4534_v1 }
 0x7ad   : > { %7713 = vmatpush2.bf16.xpose.msra.mxu0 %v9020_v54  ;;  %v4523_v54 = vld [vmem:[%s9473_s23 + $0xd18] sm:$0xff] }
 0x7ae   : > { %7756 = vmatpush2.bf16.xpose.msra.mxu1 %v9022_v12  ;;  %7714 = vmatprep.subr.bf16.mxu0 %v9013_v30  ;;  %v4527_v12 = vld [vmem:[%s9473_s23 + $0xd38] sm:$0xff]  ;;  %v8960_v30 = vcombine.low %v4530_v52, %v4534_v1  ;;  %v4602_v52 = vld [vmem:[%s9473_s23 + $0xf90] sm:$0xff] }
 0x7af   : > { %7757 = vmatprep.subr.bf16.mxu1 %v9015_v55  ;;  %v8962_v55 = vcombine.low %v4531_v50, %v4535_v53  ;;  %v8955_v0 = vcombine.high %v4523_v54, %v4527_v12  ;;  %v4606_v1 = vld [vmem:[%s9473_s23 + $0xfb0] sm:$0xff] }
 0x7b5   : > { %7715 = vmatpush2.bf16.xpose.msra.mxu0 %v9012_v57  ;;  %v4515_v57 = vld [vmem:[%s9473_s23 + $0xcd8] sm:$0xff] }
 0x7b6   : > { %7758 = vmatpush2.bf16.xpose.msra.mxu1 %v9014_v58  ;;  %7716 = vmatprep.subr.bf16.mxu0 %v9005_v42  ;;  %v4519_v58 = vld [vmem:[%s9473_s23 + $0xcf8] sm:$0xff] }
 0x7b7   : > { %7759 = vmatprep.subr.bf16.mxu1 %v9007_v18  ;;  %v8954_v18 = vcombine.low %v4523_v54, %v4527_v12  ;;  %v8947_v61 = vcombine.high %v4515_v57, %v4519_v58 }
 0x7bd   : > { %7717 = vmatpush2.bf16.xpose.msra.mxu0 %v9004_v62  ;;  %v4507_v62 = vld [vmem:[%s9473_s23 + $0xc98] sm:$0xff] }
 0x7be   : > { %7760 = vmatpush2.bf16.xpose.msra.mxu1 %v9006_v26  ;;  %7718 = vmatprep.subr.bf16.mxu0 %v8997_v5  ;;  %v4511_v26 = vld [vmem:[%s9473_s23 + $0xcb8] sm:$0xff]  ;;  %v8944_v5 = vcombine.low %v4514_v4, %v4518_v27 }
 0x7bf   : > { %7761 = vmatprep.subr.bf16.mxu1 %v8999_v6  ;;  %v8946_v6 = vcombine.low %v4515_v57, %v4519_v58  ;;  %v8939_v7 = vcombine.high %v4507_v62, %v4511_v26 }
 0x7c5   : > { %7719 = vmatpush2.bf16.xpose.msra.mxu0 %v8996_v9  ;;  %v4499_v9 = vld [vmem:[%s9473_s23 + $0xc58] sm:$0xff] }
 0x7c6   : > { %7762 = vmatpush2.bf16.xpose.msra.mxu1 %v8998_v48  ;;  %7720 = vmatprep.subr.bf16.mxu0 %v8989_v34  ;;  %v4503_v48 = vld [vmem:[%s9473_s23 + $0xc78] sm:$0xff]  ;;  %v8936_v34 = vcombine.low %v4506_v13, %v4510_v16  ;;  %v4093_v13 = vld [vmem:[#allocation8 + $0x28] sm:$0xff] }
 0x7c7   : > { %7763 = vmatprep.subr.bf16.mxu1 %v8991_v36  ;;  %v8938_v36 = vcombine.low %v4507_v62, %v4511_v26  ;;  %v8931_v37 = vcombine.high %v4499_v9, %v4503_v48  ;;  %v4595_v62 = vld [vmem:[%s9473_s23 + $0xf58] sm:$0xff] }
 0x7c8   : > { %v4599_v26 = vld [vmem:[%s9473_s23 + $0xf78] sm:$0xff] }
 0x7cd   : > { %7721 = vmatpush2.bf16.xpose.msra.mxu0 %v8988_v2  ;;  %v4491_v2 = vld [vmem:[%s9473_s23 + $0xc18] sm:$0xff] }
 0x7ce   : > { %7764 = vmatpush2.bf16.xpose.msra.mxu1 %v8990_v3  ;;  %7722 = vmatprep.subr.bf16.mxu0 %v8981_v19  ;;  %v4495_v3 = vld [vmem:[%s9473_s23 + $0xc38] sm:$0xff]  ;;  %v8928_v19 = vcombine.low %v4498_v33, %v4502_v8  ;;  %v9032_v33 = vcombine.low %v4602_v52, %v4606_v1  ;;  %v4100_v8 = vld [vmem:[#allocation8 + $0x60] sm:$0xff] }
 0x7cf   : > { %7765 = vmatprep.subr.bf16.mxu1 %v8983_v29  ;;  %v8930_v29 = vcombine.low %v4499_v9, %v4503_v48  ;;  %v8923_v56 = vcombine.high %v4491_v2, %v4495_v3 }
 0x7d5   : > { %7723 = vmatpush2.bf16.xpose.msra.mxu0 %v8980_v45  ;;  %v4610_v45 = vld [vmem:[%s9473_s23 + $0xfd0] sm:$0xff] }
 0x7d6   : > { %7766 = vmatpush2.bf16.xpose.msra.mxu1 %v8982_v21  ;;  %7778 = vmatprep.subr.bf16.mxu0 %v8977_v23  ;;  %v4614_v21 = vld [vmem:[%s9473_s23 + $0xff0] sm:$0xff]  ;;  %v4611_v23 = vld [vmem:[%s9473_s23 + $0xfd8] sm:$0xff] }
 0x7d7   : > { %7821 = vmatprep.subr.bf16.mxu1 %v8979_v59  ;;  %v4615_v59 = vld [vmem:[%s9473_s23 + $0xff8] sm:$0xff]  ;;  %v9041_v47 = vcombine.high %v4610_v45, %v4614_v21 }
 0x7dc   : > { %7725 = vmatmul.mubr.bf16.vlgmr.msra.gmra.mxu0 %v9760_v60  ;;  %v8968_v60 = vcombine.low %v4538_v44, %v4542_v49  ;;  %v8920_v44 = vcombine.low %v4490_v14, %v4494_v15  ;;  %v7556_v49 = vpop.f32.mrf.mxu0  ;;  %v9027_v14 = vcombine.high %v4595_v62, %v4599_v26  ;;  %v4101_v15 = vld [vmem:[#allocation8 + $0x68] sm:$0xff] }
 0x7dd   : > { %7768 = vmatmul.mubr.bf16.vlgmr.msra.gmra.mxu1 %v9920_v63  ;;  %7779 = vmatpush1.bf16.xpose.msra.mxu0 %v8976_v43  ;;  %v8963_v63 = vcombine.high %v4531_v50, %v4535_v53  ;;  %v8922_v43 = vcombine.low %v4491_v2, %v4495_v3  ;;  %v4603_v50 = vld [vmem:[%s9473_s23 + $0xf98] sm:$0xff] }
 0x7de   : > { %7810 = vmatprep.mubr.bf16.mxu0 %v10204_v10  ;;  %7822 = vmatpush1.bf16.xpose.msra.mxu1 %v8978_v38  ;;  %v4522_v10 = vld [vmem:[%s9473_s23 + $0xd10] sm:$0xff]  ;;  %v9043_v38 = vcombine.high %v4611_v23, %v4615_v59  ;;  %v4607_v53 = vld [vmem:[%s9473_s23 + $0xfb8] sm:$0xff] }
 0x7df   : > { %7853 = vmatprep.mubr.bf16.mxu1 %v10265_v11  ;;  %7780 = vmatprep.subr.bf16.mxu0 %v8969_v51  ;;  %v4526_v11 = vld [vmem:[%s9473_s23 + $0xd30] sm:$0xff]  ;;  %v7558_v51 = vpop.f32.mrf.mxu0  ;;  %v9035_v54 = vcombine.high %v4603_v50, %v4607_v53  ;;  %v9034_v48 = vcombine.low %v4603_v50, %v4607_v53  ;;  %v4571_v50 = vld [vmem:[%s9473_s23 + $0xe98] sm:$0xff] }
 0x7e0   : > { %7823 = vmatprep.subr.bf16.mxu1 %v8971_v35  ;;  %v8953_v28 = vcombine.high %v4522_v10, %v4526_v11  ;;  %v8952_v42 = vcombine.low %v4522_v10, %v4526_v11  ;;  %v7601_v35 = vpop.f32.mrf.mxu1  ;;  %v7598_v10 = vadd.f32 %v7597_v20, %v7554_v17  ;;  %v4587_v17 = vld [vmem:[%s9473_s23 + $0xf18] sm:$0xff] }
 0x7e1   : > { %v7602_v27 = vadd.f32 %v7601_v35, %v7558_v51  ;;  %v4591_v20 = vld [vmem:[%s9473_s23 + $0xf38] sm:$0xff] }
 0x7e2   : > { %v7603_v11 = vpop.f32.mrf.mxu1  ;;  %v4575_v53 = vld [vmem:[%s9473_s23 + $0xeb8] sm:$0xff] }
 0x7e5   : > { %7781 = vmatpush1.bf16.xpose.msra.mxu0 %v8968_v60  ;;  %v9040_v60 = vcombine.low %v4610_v45, %v4614_v21  ;;  %v9026_v21 = vcombine.low %v4595_v62, %v4599_v26 }
 0x7e6   : > { %7824 = vmatpush1.bf16.xpose.msra.mxu1 %v8970_v40  ;;  %7782 = vmatprep.subr.bf16.mxu0 %v8961_v46  ;;  %v7560_v40 = vpop.f32.mrf.mxu0  ;;  %v9042_v46 = vcombine.low %v4611_v23, %v4615_v59  ;;  %v9019_v59 = vcombine.high %v4587_v17, %v4591_v20 }
 0x7e7   : > { %7825 = vmatprep.subr.bf16.mxu1 %v8963_v63  ;;  %v9033_v63 = vcombine.high %v4602_v52, %v4606_v1  ;;  %v4570_v52 = vld [vmem:[%s9473_s23 + $0xe90] sm:$0xff] }
 0x7e8   : > { %v4574_v1 = vld [vmem:[%s9473_s23 + $0xeb0] sm:$0xff] }
 0x7ed   : > { %7783 = vmatpush1.bf16.xpose.msra.mxu0 %v8960_v30  ;;  %v7600_v30 = vadd.f32 %v7599_v32, %v7556_v49  ;;  %v4582_v49 = vld [vmem:[%s9473_s23 + $0xef0] sm:$0xff] }
 0x7ee   : > { %7826 = vmatpush1.bf16.xpose.msra.mxu1 %v8962_v55  ;;  %7784 = vmatprep.subr.bf16.mxu0 %v8953_v28 }
 0x7ef   : > { %7827 = vmatprep.subr.bf16.mxu1 %v8955_v0  ;;  %v4092_v0 = vld [vmem:[#allocation8 + $0x20] sm:$0xff] }
 0x7f5   : > { %7785 = vmatpush1.bf16.xpose.msra.mxu0 %v8952_v42 }
 0x7f6   : > { %7828 = vmatpush1.bf16.xpose.msra.mxu1 %v8954_v18  ;;  %7786 = vmatprep.subr.bf16.mxu0 %v8945_v24  ;;  %v4594_v18 = vld [vmem:[%s9473_s23 + $0xf50] sm:$0xff] }
 0x7f7   : > { %7829 = vmatprep.subr.bf16.mxu1 %v8947_v61  ;;  %v4598_v24 = vld [vmem:[%s9473_s23 + $0xf70] sm:$0xff]  ;;  %v7604_v61 = vadd.f32 %v7603_v11, %v7560_v40 }
 0x7f8   : > { %v9024_v45 = vcombine.low %v4594_v18, %v4598_v24  ;;  %v4566_v11 = vld [vmem:[%s9473_s23 + $0xe70] sm:$0xff] }
 0x7fd   : > { %7787 = vmatpush1.bf16.xpose.msra.mxu0 %v8944_v5 }
 0x7fe   : > { %7830 = vmatpush1.bf16.xpose.msra.mxu1 %v8946_v6  ;;  %7788 = vmatprep.subr.bf16.mxu0 %v8937_v41 }
 0x7ff   : > { %7831 = vmatprep.subr.bf16.mxu1 %v8939_v7 }
 0x805   : > { %7789 = vmatpush1.bf16.xpose.msra.mxu0 %v8936_v34  ;;  %v9025_v34 = vcombine.high %v4594_v18, %v4598_v24 }
 0x806   : > { %7832 = vmatpush1.bf16.xpose.msra.mxu1 %v8938_v36  ;;  %7790 = vmatprep.subr.bf16.mxu0 %v8929_v25 }
 0x807   : > { %7833 = vmatprep.subr.bf16.mxu1 %v8931_v37 }
 0x80d   : > { %7791 = vmatpush1.bf16.xpose.msra.mxu0 %v8928_v19 }
 0x80e   : > { %7834 = vmatpush1.bf16.xpose.msra.mxu1 %v8930_v29  ;;  %7792 = vmatprep.subr.bf16.mxu0 %v8921_v31  ;;  %v4586_v31 = vld [vmem:[%s9473_s23 + $0xf10] sm:$0xff] }
 0x80f   : > { %7835 = vmatprep.subr.bf16.mxu1 %v8923_v56  ;;  %v4590_v56 = vld [vmem:[%s9473_s23 + $0xf30] sm:$0xff] }
 0x810   : > { %v9017_v23 = vcombine.high %v4586_v31, %v4590_v56  ;;  %v9016_v32 = vcombine.low %v4586_v31, %v4590_v56 }
 0x815   : > { %7793 = vmatpush1.bf16.xpose.msra.mxu0 %v8920_v44  ;;  %v4578_v44 = vld [vmem:[%s9473_s23 + $0xed0] sm:$0xff] }
 0x816   : > { %7836 = vmatpush1.bf16.xpose.msra.mxu1 %v8922_v43  ;;  %7794 = vmatprep.subr.bf16.mxu0 %v9041_v47  ;;  %v4579_v43 = vld [vmem:[%s9473_s23 + $0xed8] sm:$0xff]  ;;  %v9009_v51 = vcombine.high %v4578_v44, %v4582_v49 }
 0x817   : > { %7837 = vmatprep.subr.bf16.mxu1 %v9043_v38  ;;  %v4583_v47 = vld [vmem:[%s9473_s23 + $0xef8] sm:$0xff]  ;;  %v9018_v38 = vcombine.low %v4587_v17, %v4591_v20 }
 0x818   : > { %v9011_v35 = vcombine.high %v4579_v43, %v4583_v47  ;;  %v9010_v40 = vcombine.low %v4579_v43, %v4583_v47 }
 0x81c   : > { %v7640_v12 = vpop.f32.mrf.mxu0 }
 0x81d   : > { %v7641_v55 = vadd.f32 %v7640_v12, %v7598_v10  ;;  %v7683_v28 = vpop.f32.mrf.mxu1  ;;  %7795 = vmatpush2.bf16.xpose.msra.mxu0 %v9040_v60  ;;  %v9008_v60 = vcombine.low %v4578_v44, %v4582_v49  ;;  %v4562_v10 = vld [vmem:[%s9473_s23 + $0xe50] sm:$0xff]  ;;  %v4567_v12 = vld [vmem:[%s9473_s23 + $0xe78] sm:$0xff] }
 0x81e   : > { %7838 = vmatpush2.bf16.xpose.msra.mxu1 %v9042_v46  ;;  %v7642_v4 = vpop.f32.mrf.mxu0  ;;  %7796 = vmatprep.subr.bf16.mxu0 %v9033_v63  ;;  %v9001_v46 = vcombine.high %v4570_v52, %v4574_v1  ;;  %v9003_v63 = vcombine.high %v4571_v50, %v4575_v53  ;;  %v4103_v49 = vld [vmem:[#allocation8 + $0x78] sm:$0xff] }
 0x81f   : > { %v7684_v57 = vadd.f32 %v7683_v28, %v7641_v55  ;;  %v7643_v58 = vadd.f32 %v7642_v4, %v7600_v30  ;;  %v7685_v42 = vpop.f32.mrf.mxu1  ;;  %7839 = vmatprep.subr.bf16.mxu1 %v9035_v54  ;;  %v4563_v54 = vld [vmem:[%s9473_s23 + $0xe58] sm:$0xff]  ;;  %v9000_v30 = vcombine.low %v4570_v52, %v4574_v1  ;;  %v9002_v55 = vcombine.low %v4571_v50, %v4575_v53  ;;  %v4554_v4 = vld [vmem:[%s9473_s23 + $0xe10] sm:$0xff] }
 0x820   : > { %v7644_v16 = vpop.f32.mrf.mxu0  ;;  %v8993_v28 = vcombine.high %v4562_v10, %v4566_v11  ;;  %v8994_v18 = vcombine.low %v4563_v54, %v4567_v12 }
 0x821   : > { %v7868_v5 = vadd.f32 %v7684_v57, %v4092_v0  ;;  %v7686_v6 = vadd.f32 %v7685_v42, %v7643_v58  ;;  %v7645_v41 = vadd.f32 %v7644_v16, %v7602_v27  ;;  %v7687_v7 = vpop.f32.mrf.mxu1  ;;  %v8995_v0 = vcombine.high %v4563_v54, %v4567_v12  ;;  %v4558_v27 = vld [vmem:[%s9473_s23 + $0xe30] sm:$0xff]  ;;  %v4555_v57 = vld [vmem:[%s9473_s23 + $0xe18] sm:$0xff] }
 0x822   : > { %v7646_v9 = vpop.f32.mrf.mxu0  ;;  %v4559_v58 = vld [vmem:[%s9473_s23 + $0xe38] sm:$0xff]  ;;  %v8992_v42 = vcombine.low %v4562_v10, %v4566_v11  ;;  %v8985_v24 = vcombine.high %v4554_v4, %v4558_v27 }
 0x823   : > { %7884 = vst [vmem:[#allocation8 + $0x20] sm:$0xff] %v7868_v5  ;;  %v7869_v36 = vadd.f32 %v7686_v6, %v4093_v13  ;;  %v7688_v25 = vadd.f32 %v7687_v7, %v7645_v41  ;;  %v7647_v37 = vadd.f32 %v7646_v9, %v7604_v61  ;;  %v7689_v2 = vpop.f32.mrf.mxu1  ;;  %v8987_v61 = vcombine.high %v4555_v57, %v4559_v58 }
 0x824   : > { %v8984_v13 = vcombine.low %v4554_v4, %v4558_v27  ;;  %v8986_v16 = vcombine.low %v4555_v57, %v4559_v58 }
 0x825   : > { %7885 = vst [vmem:[#allocation8 + $0x28] sm:$0xff] %v7869_v36  ;;  %v7876_v3 = vadd.f32 %v7688_v25, %v4100_v8  ;;  %v7690_v19 = vadd.f32 %v7689_v2, %v7647_v37  ;;  %7797 = vmatpush2.bf16.xpose.msra.mxu0 %v9032_v33  ;;  %v4094_v37 = vld [vmem:[#allocation8 + $0x30] sm:$0xff] }
 0x826   : > { %7840 = vmatpush2.bf16.xpose.msra.mxu1 %v9034_v48  ;;  %7798 = vmatprep.subr.bf16.mxu0 %v9025_v34 }
 0x827   : > { %7892 = vst [vmem:[#allocation8 + $0x60] sm:$0xff] %v7876_v3  ;;  %v7877_v29 = vadd.f32 %v7690_v19, %v4101_v15  ;;  %7841 = vmatprep.subr.bf16.mxu1 %v9027_v14 }
 0x829   : > { %7893 = vst [vmem:[#allocation8 + $0x68] sm:$0xff] %v7877_v29 }
 0x82d   : > { %7799 = vmatpush2.bf16.xpose.msra.mxu0 %v9024_v45  ;;  %v4102_v45 = vld [vmem:[#allocation8 + $0x70] sm:$0xff] }
 0x82e   : > { %7842 = vmatpush2.bf16.xpose.msra.mxu1 %v9026_v21  ;;  %7800 = vmatprep.subr.bf16.mxu0 %v9017_v23 }
 0x82f   : > { %7843 = vmatprep.subr.bf16.mxu1 %v9019_v59 }
 0x835   : > { %7801 = vmatpush2.bf16.xpose.msra.mxu0 %v9016_v32 }
 0x836   : > { %7844 = vmatpush2.bf16.xpose.msra.mxu1 %v9018_v38  ;;  %7802 = vmatprep.subr.bf16.mxu0 %v9009_v51 }
 0x837   : > { %7845 = vmatprep.subr.bf16.mxu1 %v9011_v35 }
 0x83d   : > { %7803 = vmatpush2.bf16.xpose.msra.mxu0 %v9008_v60 }
 0x83e   : > { %7846 = vmatpush2.bf16.xpose.msra.mxu1 %v9010_v40  ;;  %7804 = vmatprep.subr.bf16.mxu0 %v9001_v46 }
 0x83f   : > { %7847 = vmatprep.subr.bf16.mxu1 %v9003_v63 }
 0x845   : > { %7805 = vmatpush2.bf16.xpose.msra.mxu0 %v9000_v30 }
 0x846   : > { %7848 = vmatpush2.bf16.xpose.msra.mxu1 %v9002_v55  ;;  %7806 = vmatprep.subr.bf16.mxu0 %v8993_v28 }
 0x847   : > { %7849 = vmatprep.subr.bf16.mxu1 %v8995_v0 }
 0x84d   : > { %7807 = vmatpush2.bf16.xpose.msra.mxu0 %v8992_v42 }
 0x84e   : > { %7850 = vmatpush2.bf16.xpose.msra.mxu1 %v8994_v18  ;;  %7808 = vmatprep.subr.bf16.mxu0 %v8985_v24 }
 0x84f   : > { %7851 = vmatprep.subr.bf16.mxu1 %v8987_v61 }
 0x855   : > { %7809 = vmatpush2.bf16.xpose.msra.mxu0 %v8984_v13 }
 0x856   : > { %7852 = vmatpush2.bf16.xpose.msra.mxu1 %v8986_v16 }
 0x85c   : > { %7811 = vmatmul.mubr.bf16.vlgmr.msra.gmra.mxu0 %v10080_v22 }
 0x85d   : > { %7854 = vmatmul.mubr.bf16.vlgmr.msra.gmra.mxu1 %v10300_v39  ;;  %v4095_v39 = vld [vmem:[#allocation8 + $0x38] sm:$0xff] }
 0x89c   : > { %v7726_v62 = vpop.f32.mrf.mxu0 }
 0x89d   : > { %v7769_v26 = vpop.f32.mrf.mxu1 }
 0x89e   : > { %v7728_v5 = vpop.f32.mrf.mxu0  ;;  %v7770_v8 = vadd.f32 %v7769_v26, %v7726_v62 }
 0x89f   : > { %v7771_v6 = vpop.f32.mrf.mxu1 }
 0x8a0   : > { %v7730_v41 = vpop.f32.mrf.mxu0  ;;  %v7772_v34 = vadd.f32 %v7771_v6, %v7728_v5 }
 0x8a1   : > { %v7773_v7 = vpop.f32.mrf.mxu1 }
 0x8a2   : > { %v7732_v33 = vpop.f32.mrf.mxu0  ;;  %v7774_v15 = vadd.f32 %v7773_v7, %v7730_v41 }
 0x8a3   : > { %v7775_v9 = vpop.f32.mrf.mxu1 }
 0x8a4   : > { %v7776_v29 = vadd.f32 %v7775_v9, %v7732_v33 }
 0x91c   : > { %v7812_v48 = vpop.f32.mrf.mxu0 }
 0x91d   : > { %v7813_v36 = vadd.f32 %v7812_v48, %v7770_v8  ;;  %v7855_v25 = vpop.f32.mrf.mxu1 }
 0x91e   : > { %v7814_v14 = vpop.f32.mrf.mxu0 }
 0x91f   : > { %v7856_v2 = vadd.f32 %v7855_v25, %v7813_v36  ;;  %v7815_v22 = vadd.f32 %v7814_v14, %v7772_v34  ;;  %v7857_v3 = vpop.f32.mrf.mxu1 }
 0x920   : > { %v7816_v19 = vpop.f32.mrf.mxu0 }
 0x921   : > { %v7870_v31 = vadd.f32 %v7856_v2, %v4094_v37  ;;  %v7858_v56 = vadd.f32 %v7857_v3, %v7815_v22  ;;  %v7817_v17 = vadd.f32 %v7816_v19, %v7774_v15  ;;  %v7859_v20 = vpop.f32.mrf.mxu1 }
 0x922   : > { %v7818_v21 = vpop.f32.mrf.mxu0 }
 0x923   : > { %7886 = vst [vmem:[#allocation8 + $0x30] sm:$0xff] %v7870_v31  ;;  %v7871_v23 = vadd.f32 %v7858_v56, %v4095_v39  ;;  %v7860_v59 = vadd.f32 %v7859_v20, %v7817_v17  ;;  %v7819_v44 = vadd.f32 %v7818_v21, %v7776_v29  ;;  %v7861_v43 = vpop.f32.mrf.mxu1 }
 0x925   : > { %7887 = vst [vmem:[#allocation8 + $0x38] sm:$0xff] %v7871_v23  ;;  %v7878_v47 = vadd.f32 %v7860_v59, %v4102_v45  ;;  %v7862_v32 = vadd.f32 %v7861_v43, %v7819_v44 }
 0x927   : > { %7894 = vst [vmem:[#allocation8 + $0x70] sm:$0xff] %v7878_v47  ;;  %v7879_v38 = vadd.f32 %v7862_v32, %v4103_v49 }
 0x929   : > { %7895 = vst [vmem:[#allocation8 + $0x78] sm:$0xff] %v7879_v38 }
 0x92a   : > { %9232 = shalt.err (!%p9229_p11)
}
 0x92b   : > { %s9313_s4 = smov 1024   ;;  %s9314_s6 = smov 64  }
 0x92c   : > { %9060 = dma.vmem_to_hbm [thread:$0]  (%p9077_p2), %s7907_s22, 2048, %s10737_s3, [#allocation4], %s9313_s4, %s9313_s4, %s9314_s6  }
 0x92d   : > { %9276 = dma.done.wait (%p9077_p2), [#allocation4], 2048  }
 0x92e   : > { %9278 = vsyncadd (%p9077_p2), [#allocation4], 4294965248 }
 0x92f PF: > { %s18_s17 = sadd.s32 1, %s9301_s17   ;;  %s10742_s12 = smov %s9285_s13 }
 0x930   : > { %p15_p12 = scmp.ge.s32.totalorder %s18_s17, 6   ;;  %s10743_s13 = smov %s9289_s14 }
 0x931   : > { %s10744_s14 = smov %s9379_s24  ;;  %s10745_s15 = smov %s9297_s16 }
 0x932   : > { %s10746_s16 = smov %s10748_s18  ;;  %17 = sbr.rel (!%p15_p12) target bundleno = 6 (0x6), region = 91 }
 0x937   :  { %7922 = vsyncpa [#allocation3], 1 }
 0x938   :  { %7924 = vsyncpa [#allocation3 + $0x1], 1 }
 0x939   :  { %7925 = vsyncpa [#allocation6], 1 }
 0x93a   :  { %7927 = vsyncpa [#allocation6 + $0x1], 1 }
 0x93b   :  { %7928 = vsyncpa [#allocation4], 1 }
 0x93c   :  { %7930 = vsyncpa [#allocation4 + $0x1], 1 }

</bundles_post_ra>
